<compile_context>
chip_gen: v5e
topology: v5e:2x2
jax: 0.10.0
libtpu: 0.0.40
codegen_flags: <defaults>
</compile_context>

<pallas_src>
import functools
import math

import jax
import jax.numpy as jnp
from jax import lax
from jax.experimental import pallas as pl
from jax.experimental.pallas import tpu as pltpu

LANE = 128
ROW_TILE = 128  # node-row block for the streamed propagation matmuls


def _round_up(v, m):
    return (v + m - 1) // m * m


# ---------------------------------------------------------------------------
# Fused GNN kernel: 3 x (WeBConv + L2-normalize + LeakyReLU(0.1))
# grid = (num_layers, num_row_blocks); A_up/A_down streamed per row block.
# ---------------------------------------------------------------------------
def _webgnn_kernel(x_ref, w_ref, au_ref, ad_ref, web_ref, proj_ref, *,
                   c_slab, row_tile):
    l = pl.program_id(0)
    rb = pl.program_id(1)

    # First grid step: seed the resident output ref (it doubles as the
    # inter-layer h state) with the padded input features.
    @pl.when(jnp.logical_and(l == 0, rb == 0))
    def _():
        web_ref[...] = x_ref[...].astype(jnp.float32)

    # Layer prologue (once per layer): fused projection for ALL nodes,
    #   proj = h @ [W_up | W_down | W_bias]   -> bf16 scratch [N_pad, 3*CS]
    @pl.when(rb == 0)
    def _():
        h_bf16 = web_ref[...].astype(jnp.bfloat16)
        proj = jnp.dot(h_bf16, w_ref[0], preferred_element_type=jnp.float32)
        proj_ref[...] = proj.astype(jnp.bfloat16)

    # Per row block: degree-normalized, edge-weighted propagation
    #   up_rows   = A_up[l, rows, :]   @ proj[:, 0:CS]
    #   down_rows = A_down[l, rows, :] @ proj[:, CS:2CS]
    #   bias_rows = proj[rows, 2CS:3CS]
    r0 = pl.multiple_of(rb * row_tile, row_tile)
    up = jnp.dot(au_ref[0], proj_ref[:, 0:c_slab],
                 preferred_element_type=jnp.float32)
    down = jnp.dot(ad_ref[0], proj_ref[:, c_slab:2 * c_slab],
                   preferred_element_type=jnp.float32)
    bias = proj_ref[pl.ds(r0, row_tile),
                    2 * c_slab:3 * c_slab].astype(jnp.float32)

    # F.normalize(p=2, dim=-1, eps=1e-12) over the up|down|bias concat.
    # Padded lanes/rows are zero, so the sum of squares equals the real norm.
    ss = (jnp.sum(up * up, axis=-1, keepdims=True)
          + jnp.sum(down * down, axis=-1, keepdims=True)
          + jnp.sum(bias * bias, axis=-1, keepdims=True))
    inv = lax.rsqrt(jnp.maximum(ss, 1e-24))  # == 1 / max(||v||, 1e-12)

    def _act(v):  # LeakyReLU(negative_slope=0.1) after the normalize
        z = v * inv
        return jnp.where(z >= 0, z, 0.1 * z)

    # 128-aligned lane-slab stores straight into the resident output/state.
    web_ref[pl.ds(r0, row_tile), 0:c_slab] = _act(up)
    web_ref[pl.ds(r0, row_tile), c_slab:2 * c_slab] = _act(down)
    web_ref[pl.ds(r0, row_tile), 2 * c_slab:3 * c_slab] = _act(bias)


def fused_webgnn_call(x_pad, w_all, a_up, a_down, *, c_slab, row_tile,
                      vmem_limit_bytes=48 * 1024 * 1024):
    n_pad, c_all = x_pad.shape
    num_layers = w_all.shape[0]
    num_row_blocks = n_pad // row_tile
    kernel = functools.partial(_webgnn_kernel, c_slab=c_slab,
                               row_tile=row_tile)
    in_specs = [
        # input features: resident for the whole kernel (O(N), small)
        pl.BlockSpec((n_pad, c_all), lambda l, rb: (0, 0)),
        # current layer's fused weight matrix
        pl.BlockSpec((1, c_all, c_all), lambda l, rb: (l, 0, 0)),
        # streamed A row blocks (the only O(N^2) operands)
        pl.BlockSpec((1, row_tile, n_pad), lambda l, rb: (l, rb, 0)),
        pl.BlockSpec((1, row_tile, n_pad), lambda l, rb: (l, rb, 0)),
    ]
    out_specs = pl.BlockSpec((n_pad, c_all), lambda l, rb: (0, 0))
    return pl.pallas_call(
        kernel,
        grid=(num_layers, num_row_blocks),
        in_specs=in_specs,
        out_specs=out_specs,
        out_shape=jax.ShapeDtypeStruct((n_pad, c_all), jnp.float32),
        scratch_shapes=[pltpu.VMEM((n_pad, c_all), jnp.bfloat16)],
        compiler_params=pltpu.CompilerParams(
            dimension_semantics=("arbitrary", "arbitrary"),
            vmem_limit_bytes=vmem_limit_bytes),
    )(x_pad, w_all, a_up, a_down)


# ---------------------------------------------------------------------------
# Decoder kernel: bilinear scores for the requested drug pairs only.
#   score_i = ((xa_i P1) P2) . (xb_i P1)        (no transpose needed)
# ---------------------------------------------------------------------------
def _decoder_pairs_kernel(xa_ref, xb_ref, p1_ref, p2_ref, out_ref):
    ea = jnp.dot(xa_ref[...], p1_ref[...], preferred_element_type=jnp.float32)
    eb = jnp.dot(xb_ref[...], p1_ref[...], preferred_element_type=jnp.float32)
    m = jnp.dot(ea, p2_ref[...], preferred_element_type=jnp.float32)
    out_ref[...] = jnp.sum(m * eb, axis=-1, keepdims=True)


def decoder_pairs_call(xa_pad, xb_pad, p1_pad, p2_pad):
    p_pad = xa_pad.shape[0]
    return pl.pallas_call(
        _decoder_pairs_kernel,
        out_shape=jax.ShapeDtypeStruct((p_pad, 1), jnp.float32),
    )(xa_pad, xb_pad, p1_pad, p2_pad)


# ---------------------------------------------------------------------------
# Glue: padded lane-dense weight packing + dense propagation matrices
# ---------------------------------------------------------------------------
def _pack_layer_weight(w_up, w_down, w_bias, in_slabs, c_slab):
    """Pack the three [C_in, c_out] projections into one [3*CS, 3*CS] W_all."""
    c_all = 3 * c_slab
    c_out = w_up.shape[1]
    w_all = jnp.zeros((c_all, c_all), jnp.float32)
    for proj_idx, w in enumerate((w_up, w_down, w_bias)):
        col0 = proj_idx * c_slab
        for (p0, r0, n_rows) in in_slabs:
            w_all = w_all.at[p0:p0 + n_rows, col0:col0 + c_out].set(
                w[r0:r0 + n_rows, :])
    return w_all


def _pack_p1(p1, embedding_dim, c_slab, d_pad):
    c_all = 3 * c_slab
    dd = p1.shape[1]
    out = jnp.zeros((c_all, d_pad), jnp.float32)
    for s in range(3):
        out = out.at[s * c_slab:s * c_slab + embedding_dim, 0:dd].set(
            p1[s * embedding_dim:(s + 1) * embedding_dim, :])
    return out


def _pack_p2(p2, d_pad):
    dd = p2.shape[0]
    return jnp.zeros((d_pad, d_pad), jnp.float32).at[0:dd, 0:dd].set(p2)


def build_propagation_matrices(edge_index, layers, num_gene_edge, n, n_pad):
    """Dense degree-normalized, edge-weighted adjacency for all 3 layers.

    A_up[i, j]   = sum_{e: col[e]==i, row[e]==j} (1/deg_up(i))   * up_ew[e]
    A_down[i, j] = same with flipped edge_index and down edge weights.
    """
    num_edge = edge_index.shape[1]
    num_drug_edge = num_edge - num_gene_edge
    ones_drug = jnp.ones((num_drug_edge,), jnp.float32)

    up_row, up_col = edge_index[0], edge_index[1]
    down_row, down_col = edge_index[1], edge_index[0]

    def norm_for(col):
        deg = jnp.zeros((n,), jnp.float32).at[col].add(1.0)
        deg_inv = jnp.where(deg > 0, 1.0 / deg, 0.0)  # deg^-1, inf -> 0
        return deg_inv[col]

    up_norm = norm_for(up_col)        # hoisted: depends only on edge_index
    down_norm = norm_for(down_col)

    def make_a(row, col, norm, ew):
        coef = norm * ew
        return jnp.zeros((n_pad, n_pad), jnp.float32).at[col, row].add(coef)

    a_up, a_down, up_ews, down_ews = [], [], [], []
    for layer in layers:
        up_ew = jnp.concatenate([layer["up_gene"], ones_drug], axis=0)
        down_ew = jnp.concatenate([layer["down_gene"], ones_drug], axis=0)
        a_up.append(make_a(up_row, up_col, up_norm, up_ew))
        a_down.append(make_a(down_row, down_col, down_norm, down_ew))
        up_ews.append(up_ew)
        down_ews.append(down_ew)
    return jnp.stack(a_up), jnp.stack(a_down), up_ews, down_ews


# ---------------------------------------------------------------------------
# Parameters (deterministic synthetic init mirroring the module's shapes)
# ---------------------------------------------------------------------------
def init_params(key, input_dim, hidden_dim, embedding_dim, decoder_dim,
                num_gene_edge):
    gain_relu = math.sqrt(2.0)  # torch.nn.init.calculate_gain('relu')
    keys = jax.random.split(key, 17)

    def lin(k, cin, cout):
        bound = 1.0 / math.sqrt(cin)
        return jax.random.uniform(k, (cin, cout), jnp.float32, -bound, bound)

    dims = [(input_dim, hidden_dim),
            (3 * hidden_dim, hidden_dim),
            (3 * hidden_dim, embedding_dim)]
    layers = []
    ki = 0
    for cin, cout in dims:
        layers.append(dict(
            w_up=lin(keys[ki + 0], cin, cout),
            w_down=lin(keys[ki + 1], cin, cout),
            w_bias=lin(keys[ki + 2], cin, cout),
            up_gene=(jax.random.normal(keys[ki + 3], (num_gene_edge,),
                                       jnp.float32) * gain_relu),
            down_gene=(jax.random.normal(keys[ki + 4], (num_gene_edge,),
                                         jnp.float32) * gain_relu),
        ))
        ki += 5
    p1 = jax.random.normal(keys[15], (3 * embedding_dim, decoder_dim),
                           jnp.float32)
    p2 = jax.random.normal(keys[16], (decoder_dim, decoder_dim), jnp.float32)
    return layers, p1, p2


# ---------------------------------------------------------------------------
# Forward: GlobalWeBGNN + drug-pair bilinear decoder
# ---------------------------------------------------------------------------
def m3netflow_global_forward(layers, p1, p2, x, edge_index, drug_index,
                             num_gene_edge):
    n, input_dim = x.shape
    hidden_dim = layers[0]["w_up"].shape[1]
    embedding_dim = layers[2]["w_up"].shape[1]
    decoder_dim = p1.shape[1]

    c_slab = _round_up(max(input_dim, hidden_dim, embedding_dim), LANE)
    c_all = 3 * c_slab
    row_tile = ROW_TILE
    n_pad = _round_up(n, max(row_tile, LANE))
    d_pad = _round_up(decoder_dim, LANE)

    # ---- lane-dense padded operands (bf16 MXU operands) ----
    x_pad = (jnp.zeros((n_pad, c_all), jnp.float32)
             .at[:n, :input_dim].set(x).astype(jnp.bfloat16))

    in_slabs0 = [(0, 0, input_dim)]
    in_slabs_h = [(s * c_slab, s * hidden_dim, hidden_dim) for s in range(3)]
    w_all = jnp.stack([
        _pack_layer_weight(layers[0]["w_up"], layers[0]["w_down"],
                           layers[0]["w_bias"], in_slabs0, c_slab),
        _pack_layer_weight(layers[1]["w_up"], layers[1]["w_down"],
                           layers[1]["w_bias"], in_slabs_h, c_slab),
        _pack_layer_weight(layers[2]["w_up"], layers[2]["w_down"],
                           layers[2]["w_bias"], in_slabs_h, c_slab),
    ]).astype(jnp.bfloat16)

    a_up, a_down, up_ews, down_ews = build_propagation_matrices(
        edge_index, layers, num_gene_edge, n, n_pad)
    a_up = a_up.astype(jnp.bfloat16)
    a_down = a_down.astype(jnp.bfloat16)

    # ---- fused 3-layer WeBGNN kernel ----
    web_pad = fused_webgnn_call(x_pad, w_all, a_up, a_down,
                                c_slab=c_slab, row_tile=row_tile)

    # Un-pad: real features live at lane offsets {0, CS, 2*CS}.
    web_x = jnp.concatenate(
        [web_pad[:n, s * c_slab:s * c_slab + embedding_dim] for s in range(3)],
        axis=-1)

    # ---- decoder: bilinear scores only for the requested drug pairs ----
    da = drug_index[:, 0] - 1          # drug_index is 1-based
    db = drug_index[:, 1] - 1
    num_pairs = drug_index.shape[0]
    p_pad = _round_up(num_pairs, 8)
    xa = jnp.zeros((p_pad, c_all), jnp.float32).at[:num_pairs].set(web_pad[da])
    xb = jnp.zeros((p_pad, c_all), jnp.float32).at[:num_pairs].set(web_pad[db])
    p1_pad = _pack_p1(p1, embedding_dim, c_slab, d_pad)
    p2_pad = _pack_p2(p2, d_pad)
    ypred = decoder_pairs_call(xa, xb, p1_pad, p2_pad)[:num_pairs]

    mean_up = (up_ews[0] + up_ews[1] + up_ews[2]) / 3.0
    mean_down = (down_ews[0] + down_ews[1] + down_ews[2]) / 3.0
    return ypred, web_x, mean_up, mean_down


if __name__ == "__main__":
    key = jax.random.PRNGKey(0)
    input_dim, hidden_dim, embedding_dim, decoder_dim = 8, 16, 16, 32
    node_num, num_edge, num_gene_edge = 16, 32, 24
    batch_pairs = 4
    N = node_num  # batch_size = 1

    kx, ke, kd, kp = jax.random.split(key, 4)
    x = jax.random.normal(kx, (N, input_dim), jnp.float32)
    edge_index = jax.random.randint(ke, (2, num_edge), 0, N, dtype=jnp.int32)
    drug_index = jax.random.randint(kd, (batch_pairs, 2), 1, N + 1,
                                    dtype=jnp.int32)
    layers, p1, p2 = init_params(kp, input_dim, hidden_dim, embedding_dim,
                                 decoder_dim, num_gene_edge)

    fwd = jax.jit(m3netflow_global_forward, static_argnums=(6,))
    ypred, web_x, mean_up, mean_down = fwd(layers, p1, p2, x, edge_index,
                                           drug_index, num_gene_edge)
    jax.block_until_ready((ypred, web_x, mean_up, mean_down))

    assert ypred.shape == (batch_pairs, 1)
    assert web_x.shape == (N, 3 * embedding_dim)
    assert mean_up.shape == (num_edge,)
    assert mean_down.shape == (num_edge,)
    assert bool(jnp.all(jnp.isfinite(ypred)))
    assert bool(jnp.all(jnp.isfinite(web_x)))
    print("KERNEL_OK")
</pallas_src>

<mosaic_0001>
module attributes {stable_mosaic.version = 11 : i64} {
  func.func @_webgnn_kernel(%arg0: i32, %arg1: i32, %arg2: memref<128x384xbf16, #tpu.memory_space<vmem>>, %arg3: memref<1x384x384xbf16, #tpu.memory_space<vmem>>, %arg4: memref<1x128x128xbf16, #tpu.memory_space<vmem>>, %arg5: memref<1x128x128xbf16, #tpu.memory_space<vmem>>, %arg6: memref<128x384xf32, #tpu.memory_space<vmem>>, %arg7: memref<128x384xbf16, #tpu.memory_space<vmem>>) attributes {dimension_semantics = [#tpu.dimension_semantics<arbitrary>, #tpu.dimension_semantics<arbitrary>], iteration_bounds = array<i64: 3, 1>, scalar_prefetch = 0 : i64, scratch_operands = 1 : i64, tpu.core_type = #tpu.core_type<tc>, window_params = [{pipeline_mode = #tpu.pipeline_mode<synchronous>, transform_indices = @transform_0, window_bounds = array<i64: 128, 384>}, {transform_indices = @transform_1, window_bounds = array<i64: 1, 384, 384>}, {transform_indices = @transform_2, window_bounds = array<i64: 1, 128, 128>}, {transform_indices = @transform_3, window_bounds = array<i64: 1, 128, 128>}, {pipeline_mode = #tpu.pipeline_mode<synchronous>, transform_indices = @transform_4, window_bounds = array<i64: 128, 384>}]} {
    %c0_i32 = arith.constant 0 : i32
    %0 = arith.cmpi eq, %arg0, %c0_i32 : i32
    %c0_i32_0 = arith.constant 0 : i32
    %1 = arith.cmpi eq, %arg1, %c0_i32_0 : i32
    %2 = arith.andi %0, %1 : i1
    %3 = arith.extui %2 : i1 to i32
    %c0_i32_1 = arith.constant 0 : i32
    %4 = arith.cmpi ne, %3, %c0_i32_1 : i32
    scf.if %4 {
      %c0_26 = arith.constant 0 : index
      %c0_27 = arith.constant 0 : index
      %62 = vector.load %arg2[%c0_26, %c0_27] : memref<128x384xbf16, #tpu.memory_space<vmem>>, vector<128x384xbf16>
      %63 = arith.extf %62 : vector<128x384xbf16> to vector<128x384xf32>
      %c0_28 = arith.constant 0 : index
      %c0_29 = arith.constant 0 : index
      %64 = vector.load %arg6[%c0_28, %c0_29] : memref<128x384xf32, #tpu.memory_space<vmem>>, vector<128x384xf32>
      tpu.vector_store %arg6[%c0_28, %c0_29], %63 {strides = array<i32>} : memref<128x384xf32, #tpu.memory_space<vmem>>, vector<128x384xf32>,
    } else {
    }
    %c0_i32_2 = arith.constant 0 : i32
    %5 = arith.cmpi eq, %arg1, %c0_i32_2 : i32
    %6 = arith.extui %5 : i1 to i32
    %c0_i32_3 = arith.constant 0 : i32
    %7 = arith.cmpi ne, %6, %c0_i32_3 : i32
    scf.if %7 {
      %c0_26 = arith.constant 0 : index
      %c0_27 = arith.constant 0 : index
      %62 = vector.load %arg6[%c0_26, %c0_27] : memref<128x384xf32, #tpu.memory_space<vmem>>, vector<128x384xf32>
      %63 = arith.truncf %62 : vector<128x384xf32> to vector<128x384xbf16>
      %c0_28 = arith.constant 0 : index
      %c0_29 = arith.constant 0 : index
      %c0_30 = arith.constant 0 : index
      %64 = vector.load %arg3[%c0_28, %c0_29, %c0_30] : memref<1x384x384xbf16, #tpu.memory_space<vmem>>, vector<1x384x384xbf16>
      %65 = vector.shape_cast %64 : vector<1x384x384xbf16> to vector<384x384xbf16>
      %cst_31 = arith.constant dense<0.000000e+00> : vector<128x384xf32>
      %66 = tpu.matmul %63, %65, %cst_31 {dimension_numbers = #tpu.dot_dimension_numbers<[1], [0], [0], [1], [0, 0, 1, 1], [], []>} : vector<128x384xbf16>, vector<384x384xbf16>, vector<128x384xf32> -> vector<128x384xf32>
      %67 = arith.truncf %66 : vector<128x384xf32> to vector<128x384xbf16>
      %c0_32 = arith.constant 0 : index
      %c0_33 = arith.constant 0 : index
      %68 = vector.load %arg7[%c0_32, %c0_33] : memref<128x384xbf16, #tpu.memory_space<vmem>>, vector<128x384xbf16>
      tpu.vector_store %arg7[%c0_32, %c0_33], %67 {strides = array<i32>} : memref<128x384xbf16, #tpu.memory_space<vmem>>, vector<128x384xbf16>,
    } else {
    }
    %c128_i32 = arith.constant 128 : i32
    %8 = arith.muli %arg1, %c128_i32 : i32
    %9 = tpu.assume_multiple %8, 128 : i32
    %c0 = arith.constant 0 : index
    %c0_4 = arith.constant 0 : index
    %c0_5 = arith.constant 0 : index
    %10 = vector.load %arg4[%c0, %c0_4, %c0_5] : memref<1x128x128xbf16, #tpu.memory_space<vmem>>, vector<1x128x128xbf16>
    %11 = vector.shape_cast %10 : vector<1x128x128xbf16> to vector<128x128xbf16>
    %c0_6 = arith.constant 0 : index
    %c0_7 = arith.constant 0 : index
    %12 = vector.load %arg7[%c0_6, %c0_7] : memref<128x384xbf16, #tpu.memory_space<vmem>>, vector<128x128xbf16>
    %cst = arith.constant dense<0.000000e+00> : vector<128x128xf32>
    %13 = tpu.matmul %11, %12, %cst {dimension_numbers = #tpu.dot_dimension_numbers<[1], [0], [0], [1], [0, 0, 1, 1], [], []>} : vector<128x128xbf16>, vector<128x128xbf16>, vector<128x128xf32> -> vector<128x128xf32>
    %c0_8 = arith.constant 0 : index
    %c0_9 = arith.constant 0 : index
    %c0_10 = arith.constant 0 : index
    %14 = vector.load %arg5[%c0_8, %c0_9, %c0_10] : memref<1x128x128xbf16, #tpu.memory_space<vmem>>, vector<1x128x128xbf16>
    %15 = vector.shape_cast %14 : vector<1x128x128xbf16> to vector<128x128xbf16>
    %c0_11 = arith.constant 0 : index
    %c128 = arith.constant 128 : index
    %16 = vector.load %arg7[%c0_11, %c128] : memref<128x384xbf16, #tpu.memory_space<vmem>>, vector<128x128xbf16>
    %cst_12 = arith.constant dense<0.000000e+00> : vector<128x128xf32>
    %17 = tpu.matmul %15, %16, %cst_12 {dimension_numbers = #tpu.dot_dimension_numbers<[1], [0], [0], [1], [0, 0, 1, 1], [], []>} : vector<128x128xbf16>, vector<128x128xbf16>, vector<128x128xf32> -> vector<128x128xf32>
    %18 = arith.index_cast %9 : i32 to index
    %c256 = arith.constant 256 : index
    %19 = vector.load %arg7[%18, %c256] : memref<128x384xbf16, #tpu.memory_space<vmem>>, vector<128x128xbf16>
    %20 = arith.extf %19 : vector<128x128xbf16> to vector<128x128xf32>
    %21 = arith.mulf %13, %13 : vector<128x128xf32>
    %cst_13 = arith.constant dense<0.000000e+00> : vector<128xf32>
    %22 = vector.multi_reduction <add>, %21, %cst_13 [1] : vector<128x128xf32> to vector<128xf32>
    %23 = vector.shape_cast %22 : vector<128xf32> to vector<128x1xf32>
    %24 = arith.mulf %17, %17 : vector<128x128xf32>
    %cst_14 = arith.constant dense<0.000000e+00> : vector<128xf32>
    %25 = vector.multi_reduction <add>, %24, %cst_14 [1] : vector<128x128xf32> to vector<128xf32>
    %26 = vector.shape_cast %25 : vector<128xf32> to vector<128x1xf32>
    %27 = arith.addf %23, %26 : vector<128x1xf32>
    %28 = arith.mulf %20, %20 : vector<128x128xf32>
    %cst_15 = arith.constant dense<0.000000e+00> : vector<128xf32>
    %29 = vector.multi_reduction <add>, %28, %cst_15 [1] : vector<128x128xf32> to vector<128xf32>
    %30 = vector.shape_cast %29 : vector<128xf32> to vector<128x1xf32>
    %31 = arith.addf %27, %30 : vector<128x1xf32>
    %cst_16 = arith.constant 1.000000e-24 : f32
    %32 = vector.broadcast %cst_16 : f32 to vector<128x1xf32>
    %33 = arith.maximumf %31, %32 : vector<128x1xf32>
    %34 = math.rsqrt %33 : vector<128x1xf32>
    %35 = vector.broadcast %34 : vector<128x1xf32> to vector<128x128xf32>
    %36 = arith.mulf %13, %35 : vector<128x128xf32>
    %cst_17 = arith.constant 0.000000e+00 : f32
    %37 = vector.broadcast %cst_17 : f32 to vector<128x128xf32>
    %38 = arith.cmpf oge, %36, %37 : vector<128x128xf32>
    %cst_18 = arith.constant 1.000000e-01 : f32
    %39 = vector.broadcast %cst_18 : f32 to vector<128x128xf32>
    %40 = arith.mulf %39, %36 : vector<128x128xf32>
    %41 = arith.select %38, %36, %40 : vector<128x128xi1>, vector<128x128xf32>
    %42 = arith.index_cast %9 : i32 to index
    %c0_19 = arith.constant 0 : index
    %43 = vector.load %arg6[%42, %c0_19] : memref<128x384xf32, #tpu.memory_space<vmem>>, vector<128x128xf32>
    tpu.vector_store %arg6[%42, %c0_19], %41 {strides = array<i32>} : memref<128x384xf32, #tpu.memory_space<vmem>>, vector<128x128xf32>,
    %44 = vector.broadcast %34 : vector<128x1xf32> to vector<128x128xf32>
    %45 = arith.mulf %17, %44 : vector<128x128xf32>
    %cst_20 = arith.constant 0.000000e+00 : f32
    %46 = vector.broadcast %cst_20 : f32 to vector<128x128xf32>
    %47 = arith.cmpf oge, %45, %46 : vector<128x128xf32>
    %cst_21 = arith.constant 1.000000e-01 : f32
    %48 = vector.broadcast %cst_21 : f32 to vector<128x128xf32>
    %49 = arith.mulf %48, %45 : vector<128x128xf32>
    %50 = arith.select %47, %45, %49 : vector<128x128xi1>, vector<128x128xf32>
    %51 = arith.index_cast %9 : i32 to index
    %c128_22 = arith.constant 128 : index
    %52 = vector.load %arg6[%51, %c128_22] : memref<128x384xf32, #tpu.memory_space<vmem>>, vector<128x128xf32>
    tpu.vector_store %arg6[%51, %c128_22], %50 {strides = array<i32>} : memref<128x384xf32, #tpu.memory_space<vmem>>, vector<128x128xf32>,
    %53 = vector.broadcast %34 : vector<128x1xf32> to vector<128x128xf32>
    %54 = arith.mulf %20, %53 : vector<128x128xf32>
    %cst_23 = arith.constant 0.000000e+00 : f32
    %55 = vector.broadcast %cst_23 : f32 to vector<128x128xf32>
    %56 = arith.cmpf oge, %54, %55 : vector<128x128xf32>
    %cst_24 = arith.constant 1.000000e-01 : f32
    %57 = vector.broadcast %cst_24 : f32 to vector<128x128xf32>
    %58 = arith.mulf %57, %54 : vector<128x128xf32>
    %59 = arith.select %56, %54, %58 : vector<128x128xi1>, vector<128x128xf32>
    %60 = arith.index_cast %9 : i32 to index
    %c256_25 = arith.constant 256 : index
    %61 = vector.load %arg6[%60, %c256_25] : memref<128x384xf32, #tpu.memory_space<vmem>>, vector<128x128xf32>
    tpu.vector_store %arg6[%60, %c256_25], %59 {strides = array<i32>} : memref<128x384xf32, #tpu.memory_space<vmem>>, vector<128x128xf32>,
    return
  }
  func.func @transform_0(%arg0: i32, %arg1: i32) -> (i32, i32) {
    %c0_i32 = arith.constant 0 : i32
    %c0_i32_0 = arith.constant 0 : i32
    %c0_i32_1 = arith.constant 0 : i32
    return %c0_i32, %c0_i32_0 : i32, i32
  }
  func.func @transform_1(%arg0: i32, %arg1: i32) -> (i32, i32, i32) {
    %c0_i32 = arith.constant 0 : i32
    %c0_i32_0 = arith.constant 0 : i32
    %c0_i32_1 = arith.constant 0 : i32
    return %arg0, %c0_i32, %c0_i32_0 : i32, i32, i32
  }
  func.func @transform_2(%arg0: i32, %arg1: i32) -> (i32, i32, i32) {
    %c0_i32 = arith.constant 0 : i32
    %c0_i32_0 = arith.constant 0 : i32
    return %arg0, %arg1, %c0_i32 : i32, i32, i32
  }
  func.func @transform_3(%arg0: i32, %arg1: i32) -> (i32, i32, i32) {
    %c0_i32 = arith.constant 0 : i32
    %c0_i32_0 = arith.constant 0 : i32
    return %arg0, %arg1, %c0_i32 : i32, i32, i32
  }
  func.func @transform_4(%arg0: i32, %arg1: i32) -> (i32, i32) {
    %c0_i32 = arith.constant 0 : i32
    %c0_i32_0 = arith.constant 0 : i32
    %c0_i32_1 = arith.constant 0 : i32
    return %c0_i32, %c0_i32_0 : i32, i32
  }
}

module attributes {stable_mosaic.version = 11 : i64} {
  func.func @_decoder_pairs_kernel(%arg0: memref<8x384xf32, #tpu.memory_space<vmem>>, %arg1: memref<8x384xf32, #tpu.memory_space<vmem>>, %arg2: memref<384x128xf32, #tpu.memory_space<vmem>>, %arg3: memref<128x128xf32, #tpu.memory_space<vmem>>, %arg4: memref<8x1xf32, #tpu.memory_space<vmem>>) attributes {dimension_semantics = [], scalar_prefetch = 0 : i64, scratch_operands = 0 : i64, tpu.core_type = #tpu.core_type<tc>} {
    %c0 = arith.constant 0 : index
    %c0_0 = arith.constant 0 : index
    %0 = vector.load %arg0[%c0, %c0_0] : memref<8x384xf32, #tpu.memory_space<vmem>>, vector<8x384xf32>
    %c0_1 = arith.constant 0 : index
    %c0_2 = arith.constant 0 : index
    %1 = vector.load %arg2[%c0_1, %c0_2] : memref<384x128xf32, #tpu.memory_space<vmem>>, vector<384x128xf32>
    %cst = arith.constant dense<0.000000e+00> : vector<8x128xf32>
    %2 = tpu.matmul %0, %1, %cst {dimension_numbers = #tpu.dot_dimension_numbers<[1], [0], [0], [1], [0, 0, 1, 1], [], []>} : vector<8x384xf32>, vector<384x128xf32>, vector<8x128xf32> -> vector<8x128xf32>
    %c0_3 = arith.constant 0 : index
    %c0_4 = arith.constant 0 : index
    %3 = vector.load %arg1[%c0_3, %c0_4] : memref<8x384xf32, #tpu.memory_space<vmem>>, vector<8x384xf32>
    %c0_5 = arith.constant 0 : index
    %c0_6 = arith.constant 0 : index
    %4 = vector.load %arg2[%c0_5, %c0_6] : memref<384x128xf32, #tpu.memory_space<vmem>>, vector<384x128xf32>
    %cst_7 = arith.constant dense<0.000000e+00> : vector<8x128xf32>
    %5 = tpu.matmul %3, %4, %cst_7 {dimension_numbers = #tpu.dot_dimension_numbers<[1], [0], [0], [1], [0, 0, 1, 1], [], []>} : vector<8x384xf32>, vector<384x128xf32>, vector<8x128xf32> -> vector<8x128xf32>
    %c0_8 = arith.constant 0 : index
    %c0_9 = arith.constant 0 : index
    %6 = vector.load %arg3[%c0_8, %c0_9] : memref<128x128xf32, #tpu.memory_space<vmem>>, vector<128x128xf32>
    %cst_10 = arith.constant dense<0.000000e+00> : vector<8x128xf32>
    %7 = tpu.matmul %2, %6, %cst_10 {dimension_numbers = #tpu.dot_dimension_numbers<[1], [0], [0], [1], [0, 0, 1, 1], [], []>} : vector<8x128xf32>, vector<128x128xf32>, vector<8x128xf32> -> vector<8x128xf32>
    %8 = arith.mulf %7, %5 : vector<8x128xf32>
    %cst_11 = arith.constant dense<0.000000e+00> : vector<8xf32>
    %9 = vector.multi_reduction <add>, %8, %cst_11 [1] : vector<8x128xf32> to vector<8xf32>
    %10 = vector.shape_cast %9 : vector<8xf32> to vector<8x1xf32>
    %c0_12 = arith.constant 0 : index
    %c0_13 = arith.constant 0 : index
    %11 = vector.load %arg4[%c0_12, %c0_13] : memref<8x1xf32, #tpu.memory_space<vmem>>, vector<8x1xf32>
    tpu.vector_store %arg4[%c0_12, %c0_13], %10 {strides = array<i32>} : memref<8x1xf32, #tpu.memory_space<vmem>>, vector<8x1xf32>,
    return
  }
}

</mosaic_0001>

<bundles_post_ra>
// kernel: m3netflow_global_forward.3
= control target key start
LH: loop header
LB: loop body
LE: loop exit
PB: predicated region body
PF: predicated region fallthrough
CT: control target
= control target key end

     0   :  { %vm230_vm0 = vcmask 7168   ;;  %s602_s2 = inlined_call_operand.vmem [shape: f32[384,128], index: 2, kind: input, shape index: {}]   ;;  %s603_s0 = inlined_call_operand.vmem [shape: f32[8,384], index: 0, kind: input, shape index: {}]   ;;  %s604_s3 = inlined_call_operand.vmem [shape: f32[128,128], index: 3, kind: input, shape index: {}]   ;;  %s605_s1 = inlined_call_operand.vmem [shape: f32[8,384], index: 1, kind: input, shape index: {}]   ;;  %s606_s4 = inlined_call_operand.vmem [shape: f32[8,1], index: 4, kind: output, shape index: {}]  }
   0x1   :  { %v264_v0 = vld [vmem:[%s602_s2 + $0x178] sm:$0xff]  ;;  %v269_v1 = vld [vmem:[%s602_s2 + $0x170] sm:$0xff]  ;;  %v287_v5 = vld [vmem:[%s602_s2 + $0x168] sm:$0xff] }
   0x2   :  { %v35_v2 = vld [vmem:[%s602_s2 + $0x78] sm:$0xff]  ;;  %108 = vmatpush.msra.mxu2 %v264_v0  ;;  %v34_v4 = vld [vmem:[%s602_s2 + $0x70] sm:$0xff]  ;;  %v33_v7 = vld [vmem:[%s602_s2 + $0x68] sm:$0xff] }
   0x3   :  { %68 = vmatpush.msra.mxu0 %v35_v2  ;;  %v278_v3 = vld [vmem:[%s602_s2 + $0xf8] sm:$0xff]  ;;  %v292_v6 = vld [vmem:[%s602_s2 + $0xf0] sm:$0xff]  ;;  %131 = vmatpush.msra.mxu3 %v35_v2  ;;  %v301_v8 = vld [vmem:[%s602_s2 + $0xe8] sm:$0xff] }
   0x4   :  { %88 = vmatpush.msra.mxu1 %v278_v3  ;;  %109 = vmatpush.msra.mxu2 %v269_v1  ;;  %v307_v9 = vld [vmem:[%s602_s2 + $0x160] sm:$0xff]  ;;  %v322_v12 = vld [vmem:[%s602_s2 + $0x158] sm:$0xff]  ;;  %v337_v15 = vld [vmem:[%s602_s2 + $0x150] sm:$0xff] }
   0x5   :  { %69 = vmatpush.msra.mxu0 %v34_v4  ;;  %v32_v10 = vld [vmem:[%s602_s2 + $0x60] sm:$0xff]  ;;  %132 = vmatpush.msra.mxu3 %v34_v4  ;;  %v31_v13 = vld [vmem:[%s602_s2 + $0x58] sm:$0xff]  ;;  %v30_v16 = vld [vmem:[%s602_s2 + $0x50] sm:$0xff] }
   0x6   :  { %89 = vmatpush.msra.mxu1 %v292_v6  ;;  %110 = vmatpush.msra.mxu2 %v287_v5  ;;  %v316_v11 = vld [vmem:[%s602_s2 + $0xe0] sm:$0xff]  ;;  %v331_v14 = vld [vmem:[%s602_s2 + $0xd8] sm:$0xff]  ;;  %v346_v17 = vld [vmem:[%s602_s2 + $0xd0] sm:$0xff] }
   0x7   :  { %70 = vmatpush.msra.mxu0 %v33_v7  ;;  %133 = vmatpush.msra.mxu3 %v33_v7  ;;  %v352_v18 = vld [vmem:[%s602_s2 + $0x148] sm:$0xff]  ;;  %v367_v21 = vld [vmem:[%s602_s2 + $0x140] sm:$0xff]  ;;  %v382_v24 = vld [vmem:[%s602_s2 + $0x138] sm:$0xff] }
   0x8   :  { %90 = vmatpush.msra.mxu1 %v301_v8  ;;  %111 = vmatpush.msra.mxu2 %v307_v9  ;;  %v29_v19 = vld [vmem:[%s602_s2 + $0x48] sm:$0xff]  ;;  %v28_v22 = vld [vmem:[%s602_s2 + $0x40] sm:$0xff]  ;;  %v27_v25 = vld [vmem:[%s602_s2 + $0x38] sm:$0xff] }
   0x9   :  { %71 = vmatpush.msra.mxu0 %v32_v10  ;;  %134 = vmatpush.msra.mxu3 %v32_v10  ;;  %v361_v20 = vld [vmem:[%s602_s2 + $0xc8] sm:$0xff]  ;;  %v376_v23 = vld [vmem:[%s602_s2 + $0xc0] sm:$0xff]  ;;  %v391_v26 = vld [vmem:[%s602_s2 + $0xb8] sm:$0xff] }
   0xa   :  { %91 = vmatpush.msra.mxu1 %v316_v11  ;;  %112 = vmatpush.msra.mxu2 %v322_v12  ;;  %v397_v27 = vld [vmem:[%s602_s2 + $0x130] sm:$0xff]  ;;  %v412_v30 = vld [vmem:[%s602_s2 + $0x128] sm:$0xff]  ;;  %v427_v33 = vld [vmem:[%s602_s2 + $0x120] sm:$0xff] }
   0xb   :  { %72 = vmatpush.msra.mxu0 %v31_v13  ;;  %135 = vmatpush.msra.mxu3 %v31_v13  ;;  %v26_v28 = vld [vmem:[%s602_s2 + $0x30] sm:$0xff]  ;;  %v25_v31 = vld [vmem:[%s602_s2 + $0x28] sm:$0xff]  ;;  %v24_v34 = vld [vmem:[%s602_s2 + $0x20] sm:$0xff] }
   0xc   :  { %92 = vmatpush.msra.mxu1 %v331_v14  ;;  %113 = vmatpush.msra.mxu2 %v337_v15  ;;  %v406_v29 = vld [vmem:[%s602_s2 + $0xb0] sm:$0xff]  ;;  %v421_v32 = vld [vmem:[%s602_s2 + $0xa8] sm:$0xff]  ;;  %v436_v35 = vld [vmem:[%s602_s2 + $0xa0] sm:$0xff] }
   0xd   :  { %73 = vmatpush.msra.mxu0 %v30_v16  ;;  %136 = vmatpush.msra.mxu3 %v30_v16  ;;  %v442_v36 = vld [vmem:[%s602_s2 + $0x118] sm:$0xff]  ;;  %v457_v39 = vld [vmem:[%s602_s2 + $0x110] sm:$0xff]  ;;  %v472_v42 = vld [vmem:[%s602_s2 + $0x108] sm:$0xff] }
   0xe   :  { %93 = vmatpush.msra.mxu1 %v346_v17  ;;  %114 = vmatpush.msra.mxu2 %v352_v18  ;;  %v23_v37 = vld [vmem:[%s602_s2 + $0x18] sm:$0xff]  ;;  %v22_v40 = vld [vmem:[%s602_s2 + $0x10] sm:$0xff]  ;;  %v21_v43 = vld [vmem:[%s602_s2 + $0x8] sm:$0xff] }
   0xf   :  { %74 = vmatpush.msra.mxu0 %v29_v19  ;;  %137 = vmatpush.msra.mxu3 %v29_v19  ;;  %v451_v38 = vld [vmem:[%s602_s2 + $0x98] sm:$0xff]  ;;  %v466_v41 = vld [vmem:[%s602_s2 + $0x90] sm:$0xff]  ;;  %v481_v44 = vld [vmem:[%s602_s2 + $0x88] sm:$0xff] }
  0x10   :  { %94 = vmatpush.msra.mxu1 %v361_v20  ;;  %115 = vmatpush.msra.mxu2 %v367_v21  ;;  %v487_v45 = vld [vmem:[%s602_s2 + $0x100] sm:$0xff]  ;;  %v19_v47 = vld [vmem:[%s603_s0 + $0x10] sm:$0xff]  ;;  %v18_v50 = vld [vmem:[%s603_s0 + $0x8] sm:$0xff] }
  0x11   :  { %75 = vmatpush.msra.mxu0 %v28_v22  ;;  %138 = vmatpush.msra.mxu3 %v28_v22  ;;  %v20_v46 = vld [vmem:[%s602_s2] sm:$0xff]  ;;  %v206_v51 = vld [vmem:[%s604_s3 + $0x78] sm:$0xff]  ;;  %v205_v52 = vld [vmem:[%s604_s3 + $0x70] sm:$0xff] }
  0x12   :  { %95 = vmatpush.msra.mxu1 %v376_v23  ;;  %116 = vmatpush.msra.mxu2 %v382_v24  ;;  %v499_v48 = vld [vmem:[%s602_s2 + $0x80] sm:$0xff]  ;;  %v204_v53 = vld [vmem:[%s604_s3 + $0x68] sm:$0xff]  ;;  %v202_v55 = vld [vmem:[%s604_s3 + $0x58] sm:$0xff] }
  0x13   :  { %76 = vmatpush.msra.mxu0 %v27_v25  ;;  %139 = vmatpush.msra.mxu3 %v27_v25  ;;  %v17_v49 = vld [vmem:[%s603_s0] sm:$0xff]  ;;  %v201_v56 = vld [vmem:[%s604_s3 + $0x50] sm:$0xff]  ;;  %v200_v57 = vld [vmem:[%s604_s3 + $0x48] sm:$0xff] }
  0x14   :  { %96 = vmatpush.msra.mxu1 %v391_v26  ;;  %117 = vmatpush.msra.mxu2 %v397_v27  ;;  %v203_v54 = vld [vmem:[%s604_s3 + $0x60] sm:$0xff]  ;;  %v198_v59 = vld [vmem:[%s604_s3 + $0x38] sm:$0xff]  ;;  %v197_v60 = vld [vmem:[%s604_s3 + $0x30] sm:$0xff] }
  0x15   :  { %77 = vmatpush.msra.mxu0 %v26_v28  ;;  %140 = vmatpush.msra.mxu3 %v26_v28  ;;  %v199_v58 = vld [vmem:[%s604_s3 + $0x40] sm:$0xff]  ;;  %v196_v61 = vld [vmem:[%s604_s3 + $0x28] sm:$0xff]  ;;  %v194_v63 = vld [vmem:[%s604_s3 + $0x18] sm:$0xff] }
  0x16   :  { %97 = vmatpush.msra.mxu1 %v406_v29  ;;  %118 = vmatpush.msra.mxu2 %v412_v30  ;;  %v195_v62 = vld [vmem:[%s604_s3 + $0x20] sm:$0xff]  ;;  %v192_v2 = vld [vmem:[%s604_s3 + $0x8] sm:$0xff] }
  0x17   :  { %78 = vmatpush.msra.mxu0 %v25_v31  ;;  %141 = vmatpush.msra.mxu3 %v25_v31  ;;  %v129_v4 = vld [vmem:[%s605_s1 + $0x8] sm:$0xff] }
  0x18   :  { %98 = vmatpush.msra.mxu1 %v421_v32  ;;  %119 = vmatpush.msra.mxu2 %v427_v33 }
  0x19   :  { %79 = vmatpush.msra.mxu0 %v24_v34  ;;  %142 = vmatpush.msra.mxu3 %v24_v34 }
  0x1a   :  { %99 = vmatpush.msra.mxu1 %v436_v35  ;;  %120 = vmatpush.msra.mxu2 %v442_v36 }
  0x1b   :  { %80 = vmatpush.msra.mxu0 %v23_v37  ;;  %143 = vmatpush.msra.mxu3 %v23_v37 }
  0x1c   :  { %100 = vmatpush.msra.mxu1 %v451_v38  ;;  %121 = vmatpush.msra.mxu2 %v457_v39 }
  0x1d   :  { %81 = vmatpush.msra.mxu0 %v22_v40  ;;  %144 = vmatpush.msra.mxu3 %v22_v40 }
  0x1e   :  { %101 = vmatpush.msra.mxu1 %v466_v41  ;;  %122 = vmatpush.msra.mxu2 %v472_v42 }
  0x1f   :  { %82 = vmatpush.msra.mxu0 %v21_v43  ;;  %145 = vmatpush.msra.mxu3 %v21_v43 }
  0x20   :  { %102 = vmatpush.msra.mxu1 %v481_v44  ;;  %123 = vmatpush.msra.mxu2 %v487_v45 }
  0x21   :  { %83 = vmatpush.msra.mxu0 %v20_v46  ;;  %124 = vmatmul.f32.vlgmr.msra.gmra.mxu2 %v19_v47 }
  0x22   :  { %103 = vmatpush.msra.mxu1 %v499_v48  ;;  %84 = vmatmul.f32.vlgmr.msra.gmra.mxu0 %v17_v49 }
  0x23   :  { %104 = vmatmul.f32.vlgmr.msra.gmra.mxu1 %v18_v50  ;;  %207 = vmatpush.msrb.mxu2 %v206_v51 }
  0x24   :  { %151 = vmatpush.msrb.mxu0 %v278_v3  ;;  %171 = vmatpush.msrb.mxu1 %v264_v0  ;;  %v193_v0 = vld [vmem:[%s604_s3 + $0x10] sm:$0xff]  ;;  %v191_v3 = vld [vmem:[%s604_s3] sm:$0xff] }
  0x25   :  { %146 = vmatpush.msra.mxu3 %v20_v46  ;;  %208 = vmatpush.msrb.mxu2 %v205_v52 }
  0x26   :  { %152 = vmatpush.msrb.mxu0 %v292_v6  ;;  %172 = vmatpush.msrb.mxu1 %v269_v1  ;;  %v128_v1 = vld [vmem:[%s605_s1] sm:$0xff] }
  0x27   :  { %209 = vmatpush.msrb.mxu2 %v204_v53  ;;  %147 = vmatmul.f32.vlgmr.msra.gmra.mxu3 %v128_v1 }
  0x28   :  { %153 = vmatpush.msrb.mxu0 %v301_v8  ;;  %173 = vmatpush.msrb.mxu1 %v287_v5  ;;  %v130_v5 = vld [vmem:[%s605_s1 + $0x10] sm:$0xff] }
  0x29   :  { %210 = vmatpush.msrb.mxu2 %v203_v54 }
  0x2a   :  { %154 = vmatpush.msrb.mxu0 %v316_v11  ;;  %174 = vmatpush.msrb.mxu1 %v307_v9 }
  0x2b   :  { %211 = vmatpush.msrb.mxu2 %v202_v55 }
  0x2c   :  { %155 = vmatpush.msrb.mxu0 %v331_v14  ;;  %175 = vmatpush.msrb.mxu1 %v322_v12 }
  0x2d   :  { %212 = vmatpush.msrb.mxu2 %v201_v56 }
  0x2e   :  { %156 = vmatpush.msrb.mxu0 %v346_v17  ;;  %176 = vmatpush.msrb.mxu1 %v337_v15 }
  0x2f   :  { %213 = vmatpush.msrb.mxu2 %v200_v57 }
  0x30   :  { %157 = vmatpush.msrb.mxu0 %v361_v20  ;;  %177 = vmatpush.msrb.mxu1 %v352_v18 }
  0x31   :  { %214 = vmatpush.msrb.mxu2 %v199_v58 }
  0x32   :  { %158 = vmatpush.msrb.mxu0 %v376_v23  ;;  %178 = vmatpush.msrb.mxu1 %v367_v21 }
  0x33   :  { %215 = vmatpush.msrb.mxu2 %v198_v59 }
  0x34   :  { %159 = vmatpush.msrb.mxu0 %v391_v26  ;;  %179 = vmatpush.msrb.mxu1 %v382_v24 }
  0x35   :  { %216 = vmatpush.msrb.mxu2 %v197_v60 }
  0x36   :  { %160 = vmatpush.msrb.mxu0 %v406_v29  ;;  %180 = vmatpush.msrb.mxu1 %v397_v27 }
  0x37   :  { %217 = vmatpush.msrb.mxu2 %v196_v61 }
  0x38   :  { %161 = vmatpush.msrb.mxu0 %v421_v32  ;;  %181 = vmatpush.msrb.mxu1 %v412_v30 }
  0x39   :  { %218 = vmatpush.msrb.mxu2 %v195_v62 }
  0x3a   :  { %162 = vmatpush.msrb.mxu0 %v436_v35  ;;  %182 = vmatpush.msrb.mxu1 %v427_v33 }
  0x3b   :  { %219 = vmatpush.msrb.mxu2 %v194_v63 }
  0x3c   :  { %163 = vmatpush.msrb.mxu0 %v451_v38  ;;  %183 = vmatpush.msrb.mxu1 %v442_v36 }
  0x3d   :  { %220 = vmatpush.msrb.mxu2 %v193_v0 }
  0x3e   :  { %164 = vmatpush.msrb.mxu0 %v466_v41  ;;  %184 = vmatpush.msrb.mxu1 %v457_v39 }
  0x3f   :  { %221 = vmatpush.msrb.mxu2 %v192_v2 }
  0x40   :  { %165 = vmatpush.msrb.mxu0 %v481_v44  ;;  %185 = vmatpush.msrb.mxu1 %v472_v42 }
  0x41   :  { %222 = vmatpush.msrb.mxu2 %v191_v3 }
  0x42   :  { %166 = vmatpush.msrb.mxu0 %v499_v48  ;;  %186 = vmatpush.msrb.mxu1 %v487_v45 }
  0x43   :  { %167 = vmatmul.f32.vlgmr.msrb.gmra.mxu0 %v129_v4  ;;  %187 = vmatmul.f32.vlgmr.msrb.gmra.mxu1 %v130_v5 }
  0x9f   :  { %v85_v6 = vpop.f32.mrf.mxu0 }
  0xa0   :  { %v105_v7 = vpop.f32.mrf.mxu1 }
  0xa1   :  { %v106_v8 = vadd.f32 %v105_v7, %v85_v6 }
  0xa4   :  { %v125_v9 = vpop.f32.mrf.mxu2 }
  0xa5   :  { %v126_v10 = vadd.f32 %v125_v9, %v106_v8 }
  0xa7   :  { %223 = vmatmul.f32.vlgmr.msrb.gmra.mxu2 %v126_v10 }
  0xaa   :  { %v148_v11 = vpop.f32.mrf.mxu3 }
  0xc0   :  { %v168_v12 = vpop.f32.mrf.mxu0  ;;  %v188_v14 = vpop.f32.mrf.mxu1 }
  0xc1   :  { %v169_v13 = vadd.f32 %v168_v12, %v148_v11 }
  0xc3   :  { %v189_v15 = vadd.f32 %v188_v14, %v169_v13 }
 0x12a   :  { %v224_v16 = vpop.f32.mrf.mxu2 }
 0x12b   :  { %v227_v17 = vmul.f32 %v224_v16, %v189_v15 }
 0x12d   :  { %228 = vadd.xlane.f32.xlu0 %v227_v17 }
 0x1a0   :  { %v229_v18 = vpop.xlane.xlu0 %228 }
 0x1a1   :  { %231 = vst.msk [vmem:[%s606_s4] sm:$0xff] %vm230_vm0, %v229_v18 }

// kernel: m3netflow_global_forward.2
= control target key start
LH: loop header
LB: loop body
LE: loop exit
PB: predicated region body
PF: predicated region fallthrough
CT: control target
= control target key end

     0   :  { %s3188_s15 = smov 0   ;;  %s3190_s16 = smov 0   ;;  %s4493_s0 = inlined_call_operand.vmem [shape: bf16[128,384], index: 0, kind: input, shape index: {}]   ;;  %s4494_s1 = inlined_call_operand.vmem [shape: bf16[3,384,384], index: 1, kind: input, shape index: {}]   ;;  %s4495_s2 = inlined_call_operand.vmem [shape: bf16[3,128,128], index: 2, kind: input, shape index: {}]   ;;  %s4496_s3 = inlined_call_operand.vmem [shape: bf16[3,128,128], index: 3, kind: input, shape index: {}]   ;;  %s4497_s4 = inlined_call_operand.vmem [shape: f32[128,384], index: 4, kind: output, shape index: {}]  }
   0x1   :  { %s3192_s17 = smov 0  }
   0x2 LB: > { %s26_s18 = sadd.s32 1, %s3157_s16  ;;  %p2526_p0 = scmp.ge.s32.totalorder %s3161_s17, 1  ;;  %s3161_s17 = sphi %s3192_s17, %s14_s17   ;;  %s3157_s16 = sphi %s3190_s16, %s4546_s16   ;;  %s3153_s15 = sphi %s3188_s15, %s4545_s15  }
   0x3   : > { %p28_p1 = scmp.ge.s32.totalorder %s26_s18, 3  ;;  %p203_p2 = scmp.lt.s32.totalorder %s3161_s17, 4 }
   0x5   : > { %s4548_s18 = smov (%p28_p1, %s26_s18), 0  ;;  %p204_p3 = pnand %p2526_p0, %p203_p2 }
   0x7   : > { %207 = sbr.rel (%p204_p3) target bundleno = 905 (0x389), region = 36 }
   0xc   : > { %p242_p4 = scmp.lt.s32.totalorder %s3153_s15, 2  ;;  %p267_p5 = scmp.eq.s32.totalorder %s3153_s15, 0 }
   0xd   : > { %v273_v0 = vld [vmem:[%s4493_s0] sm:$0xff] (%p267_p5)  ;;  %v274_v1 = vld [vmem:[%s4493_s0 + $0x8] sm:$0xf] (%p267_p5)  ;;  %v275_v2 = vld [vmem:[%s4493_s0 + $0xc] sm:$0xff] (%p267_p5) }
   0xe   : > { %s4550_s15 = smov (!%p242_p4, %s3153_s15), 2  ;;  %272 = sbr.rel (!%p267_p5) target bundleno = 64 (0x40), region = 40  ;;  %v305_v3 = vunpack.c.l.bf16 (%p267_p5), %v273_v0  ;;  %v306_v4 = vunpack.c.h.bf16 (%p267_p5), %v273_v0  ;;  %v307_v5 = vunpack.c.l.bf16 (%p267_p5), %v274_v1  ;;  %v276_v6 = vld [vmem:[%s4493_s0 + $0x14] sm:$0xf] (%p267_p5)  ;;  %v308_v7 = vunpack.c.l.bf16 (%p267_p5), %v275_v2  ;;  %v277_v8 = vld [vmem:[%s4493_s0 + $0x18] sm:$0xff] (%p267_p5)  ;;  %v279_v13 = vld [vmem:[%s4493_s0 + $0x24] sm:$0xff] (%p267_p5) }
   0xf   : > { %s3082_s19 = smul.u32 576, %s4550_s15  ;;  %s2951_s20 = sshll.u32 %s4550_s15, 6  ;;  %v309_v9 = vunpack.c.h.bf16 (%p267_p5), %v275_v2  ;;  %v310_v10 = vunpack.c.l.bf16 (%p267_p5), %v276_v6  ;;  %v278_v11 = vld [vmem:[%s4493_s0 + $0x20] sm:$0xf] (%p267_p5)  ;;  %v311_v12 = vunpack.c.l.bf16 (%p267_p5), %v277_v8  ;;  %v312_v14 = vunpack.c.h.bf16 (%p267_p5), %v277_v8  ;;  %v280_v16 = vld [vmem:[%s4493_s0 + $0x2c] sm:$0xf] (%p267_p5) }
  0x10   : > { %s3209_s23 = scalar_lea.vmem %s4495_s2, %s2951_s20  ;;  %s3214_s26 = scalar_lea.vmem %s4496_s3, %s2951_s20  ;;  %353 = vst [vmem:[%s4497_s4] sm:$0xff] (%p267_p5), %v305_v3  ;;  %v313_v15 = vunpack.c.l.bf16 (%p267_p5), %v278_v11  ;;  %v314_v17 = vunpack.c.l.bf16 (%p267_p5), %v279_v13  ;;  %v281_v18 = vld [vmem:[%s4493_s0 + $0x30] sm:$0xff] (%p267_p5)  ;;  %v315_v19 = vunpack.c.h.bf16 (%p267_p5), %v279_v13  ;;  %v316_v20 = vunpack.c.l.bf16 (%p267_p5), %v280_v16  ;;  %v282_v21 = vld [vmem:[%s4493_s0 + $0x38] sm:$0xf] (%p267_p5)  ;;  %v283_v23 = vld [vmem:[%s4493_s0 + $0x3c] sm:$0xff] (%p267_p5) }
  0x11   : > { %s3219_s29 = scalar_lea.vmem %s4494_s1, %s3082_s19  ;;  %354 = vst [vmem:[%s4497_s4 + $0x8] sm:$0xff] (%p267_p5), %v306_v4  ;;  %v317_v22 = vunpack.c.l.bf16 (%p267_p5), %v281_v18  ;;  %v318_v24 = vunpack.c.h.bf16 (%p267_p5), %v281_v18  ;;  %v319_v25 = vunpack.c.l.bf16 (%p267_p5), %v282_v21  ;;  %v284_v26 = vld [vmem:[%s4493_s0 + $0x44] sm:$0xf] (%p267_p5)  ;;  %v320_v27 = vunpack.c.l.bf16 (%p267_p5), %v283_v23  ;;  %v285_v28 = vld [vmem:[%s4493_s0 + $0x48] sm:$0xff] (%p267_p5)  ;;  %v286_v31 = vld [vmem:[%s4493_s0 + $0x50] sm:$0xf] (%p267_p5) }
  0x12   : > { %355 = vst [vmem:[%s4497_s4 + $0x10] sm:$0xff] (%p267_p5), %v307_v5  ;;  %v321_v29 = vunpack.c.h.bf16 (%p267_p5), %v283_v23  ;;  %v322_v30 = vunpack.c.l.bf16 (%p267_p5), %v284_v26  ;;  %v323_v32 = vunpack.c.l.bf16 (%p267_p5), %v285_v28  ;;  %v287_v33 = vld [vmem:[%s4493_s0 + $0x54] sm:$0xff] (%p267_p5)  ;;  %v324_v34 = vunpack.c.h.bf16 (%p267_p5), %v285_v28  ;;  %v288_v36 = vld [vmem:[%s4493_s0 + $0x5c] sm:$0xf] (%p267_p5)  ;;  %v289_v38 = vld [vmem:[%s4493_s0 + $0x60] sm:$0xff] (%p267_p5) }
  0x13   : > { %356 = vst [vmem:[%s4497_s4 + $0x18] sm:$0xff] %v308_v7  ;;  %v325_v35 = vunpack.c.l.bf16 %v286_v31  ;;  %v326_v37 = vunpack.c.l.bf16 %v287_v33  ;;  %v327_v39 = vunpack.c.h.bf16 %v287_v33  ;;  %v328_v40 = vunpack.c.l.bf16 %v288_v36  ;;  %v290_v41 = vld [vmem:[%s4493_s0 + $0x68] sm:$0xf]  ;;  %v291_v43 = vld [vmem:[%s4493_s0 + $0x6c] sm:$0xff]  ;;  %v292_v46 = vld [vmem:[%s4493_s0 + $0x74] sm:$0xf] }
  0x14   : > { %357 = vst [vmem:[%s4497_s4 + $0x20] sm:$0xff] %v309_v9  ;;  %v329_v42 = vunpack.c.l.bf16 %v289_v38  ;;  %v330_v44 = vunpack.c.h.bf16 %v289_v38  ;;  %v331_v45 = vunpack.c.l.bf16 %v290_v41  ;;  %v332_v47 = vunpack.c.l.bf16 %v291_v43  ;;  %v293_v48 = vld [vmem:[%s4493_s0 + $0x78] sm:$0xff]  ;;  %v294_v51 = vld [vmem:[%s4493_s0 + $0x80] sm:$0xf]  ;;  %v295_v53 = vld [vmem:[%s4493_s0 + $0x84] sm:$0xff] }
  0x15   : > { %358 = vst [vmem:[%s4497_s4 + $0x28] sm:$0xff] %v310_v10  ;;  %v333_v49 = vunpack.c.h.bf16 %v291_v43  ;;  %v334_v50 = vunpack.c.l.bf16 %v292_v46  ;;  %v335_v52 = vunpack.c.l.bf16 %v293_v48  ;;  %v336_v54 = vunpack.c.h.bf16 %v293_v48  ;;  %v296_v56 = vld [vmem:[%s4493_s0 + $0x8c] sm:$0xf]  ;;  %v297_v58 = vld [vmem:[%s4493_s0 + $0x90] sm:$0xff]  ;;  %v298_v61 = vld [vmem:[%s4493_s0 + $0x98] sm:$0xf] }
  0x16   : > { %359 = vst [vmem:[%s4497_s4 + $0x30] sm:$0xff] %v311_v12  ;;  %v337_v55 = vunpack.c.l.bf16 %v294_v51  ;;  %v338_v57 = vunpack.c.l.bf16 %v295_v53  ;;  %v339_v59 = vunpack.c.h.bf16 %v295_v53  ;;  %v340_v60 = vunpack.c.l.bf16 %v296_v56  ;;  %v299_v63 = vld [vmem:[%s4493_s0 + $0x9c] sm:$0xff]  ;;  %v300_v2 = vld [vmem:[%s4493_s0 + $0xa4] sm:$0xf]  ;;  %v301_v4 = vld [vmem:[%s4493_s0 + $0xa8] sm:$0xff] }
  0x17   : > { %360 = vst [vmem:[%s4497_s4 + $0x38] sm:$0xff] %v312_v14  ;;  %v341_v62 = vunpack.c.l.bf16 %v297_v58  ;;  %v342_v0 = vunpack.c.h.bf16 %v297_v58  ;;  %v343_v1 = vunpack.c.l.bf16 %v298_v61  ;;  %v344_v3 = vunpack.c.l.bf16 %v299_v63  ;;  %v302_v7 = vld [vmem:[%s4493_s0 + $0xb0] sm:$0xf]  ;;  %v303_v9 = vld [vmem:[%s4493_s0 + $0xb4] sm:$0xff]  ;;  %v304_v12 = vld [vmem:[%s4493_s0 + $0xbc] sm:$0xf] }
  0x18   : > { %361 = vst [vmem:[%s4497_s4 + $0x40] sm:$0xff] %v313_v15  ;;  %v345_v5 = vunpack.c.h.bf16 %v299_v63  ;;  %v346_v6 = vunpack.c.l.bf16 %v300_v2  ;;  %v347_v8 = vunpack.c.l.bf16 %v301_v4  ;;  %v348_v10 = vunpack.c.h.bf16 %v301_v4 }
  0x19   : > { %362 = vst [vmem:[%s4497_s4 + $0x48] sm:$0xff] %v314_v17  ;;  %v349_v11 = vunpack.c.l.bf16 %v302_v7  ;;  %v350_v13 = vunpack.c.l.bf16 %v303_v9  ;;  %v351_v14 = vunpack.c.h.bf16 %v303_v9  ;;  %v352_v15 = vunpack.c.l.bf16 %v304_v12 }
  0x1a   : > { %363 = vst [vmem:[%s4497_s4 + $0x50] sm:$0xff] %v315_v19 }
  0x1b   : > { %364 = vst [vmem:[%s4497_s4 + $0x58] sm:$0xff] %v316_v20 }
  0x1c   : > { %365 = vst [vmem:[%s4497_s4 + $0x60] sm:$0xff] %v317_v22 }
  0x1d   : > { %366 = vst [vmem:[%s4497_s4 + $0x68] sm:$0xff] %v318_v24 }
  0x1e   : > { %367 = vst [vmem:[%s4497_s4 + $0x70] sm:$0xff] %v319_v25 }
  0x1f   : > { %368 = vst [vmem:[%s4497_s4 + $0x78] sm:$0xff] %v320_v27 }
  0x20   : > { %369 = vst [vmem:[%s4497_s4 + $0x80] sm:$0xff] %v321_v29 }
  0x21   : > { %370 = vst [vmem:[%s4497_s4 + $0x88] sm:$0xff] %v322_v30 }
  0x22   : > { %371 = vst [vmem:[%s4497_s4 + $0x90] sm:$0xff] %v323_v32 }
  0x23   : > { %372 = vst [vmem:[%s4497_s4 + $0x98] sm:$0xff] %v324_v34 }
  0x24   : > { %373 = vst [vmem:[%s4497_s4 + $0xa0] sm:$0xff] %v325_v35 }
  0x25   : > { %374 = vst [vmem:[%s4497_s4 + $0xa8] sm:$0xff] %v326_v37 }
  0x26   : > { %375 = vst [vmem:[%s4497_s4 + $0xb0] sm:$0xff] %v327_v39 }
  0x27   : > { %376 = vst [vmem:[%s4497_s4 + $0xb8] sm:$0xff] %v328_v40 }
  0x28   : > { %377 = vst [vmem:[%s4497_s4 + $0xc0] sm:$0xff] %v329_v42 }
  0x29   : > { %378 = vst [vmem:[%s4497_s4 + $0xc8] sm:$0xff] %v330_v44 }
  0x2a   : > { %379 = vst [vmem:[%s4497_s4 + $0xd0] sm:$0xff] %v331_v45 }
  0x2b   : > { %380 = vst [vmem:[%s4497_s4 + $0xd8] sm:$0xff] %v332_v47 }
  0x2c   : > { %381 = vst [vmem:[%s4497_s4 + $0xe0] sm:$0xff] %v333_v49 }
  0x2d   : > { %382 = vst [vmem:[%s4497_s4 + $0xe8] sm:$0xff] %v334_v50 }
  0x2e   : > { %383 = vst [vmem:[%s4497_s4 + $0xf0] sm:$0xff] %v335_v52 }
  0x2f   : > { %384 = vst [vmem:[%s4497_s4 + $0xf8] sm:$0xff] %v336_v54 }
  0x30   : > { %385 = vst [vmem:[%s4497_s4 + $0x100] sm:$0xff] %v337_v55 }
  0x31   : > { %386 = vst [vmem:[%s4497_s4 + $0x108] sm:$0xff] %v338_v57 }
  0x32   : > { %387 = vst [vmem:[%s4497_s4 + $0x110] sm:$0xff] %v339_v59 }
  0x33   : > { %388 = vst [vmem:[%s4497_s4 + $0x118] sm:$0xff] %v340_v60 }
  0x34   : > { %389 = vst [vmem:[%s4497_s4 + $0x120] sm:$0xff] %v341_v62 }
  0x35   : > { %390 = vst [vmem:[%s4497_s4 + $0x128] sm:$0xff] %v342_v0 }
  0x36   : > { %391 = vst [vmem:[%s4497_s4 + $0x130] sm:$0xff] %v343_v1 }
  0x37   : > { %392 = vst [vmem:[%s4497_s4 + $0x138] sm:$0xff] %v344_v3 }
  0x38   : > { %393 = vst [vmem:[%s4497_s4 + $0x140] sm:$0xff] %v345_v5 }
  0x39   : > { %394 = vst [vmem:[%s4497_s4 + $0x148] sm:$0xff] %v346_v6 }
  0x3a   : > { %395 = vst [vmem:[%s4497_s4 + $0x150] sm:$0xff] %v347_v8 }
  0x3b   : > { %396 = vst [vmem:[%s4497_s4 + $0x158] sm:$0xff] %v348_v10 }
  0x3c   : > { %397 = vst [vmem:[%s4497_s4 + $0x160] sm:$0xff] %v349_v11 }
  0x3d   : > { %398 = vst [vmem:[%s4497_s4 + $0x168] sm:$0xff] %v350_v13 }
  0x3e   : > { %399 = vst [vmem:[%s4497_s4 + $0x170] sm:$0xff] %v351_v14 }
  0x3f   : > { %400 = vst [vmem:[%s4497_s4 + $0x178] sm:$0xff] %v352_v15 }
  0x40 PF: > { %v2619_v16 = vld [vmem:[%s3219_s29 + $0xa8] sm:$0xf]  ;;  %v2976_v17 = vld [vmem:[%s3219_s29 + $0xb0] sm:$0xf0]  ;;  %v2607_v25 = vld [vmem:[%s3219_s29 + $0x90] sm:$0xf] }
  0x41   : > { %v2715_v18 = vld [vmem:[%s3219_s29 + $0x168] sm:$0xf]  ;;  %v2620_v19 = vor.u32 %v2976_v17, %v2619_v16  ;;  %v3000_v20 = vld [vmem:[%s3219_s29 + $0x170] sm:$0xf0]  ;;  %v2973_v26 = vld [vmem:[%s3219_s29 + $0x98] sm:$0xf0] }
  0x42   : > { %v2811_v21 = vld [vmem:[%s3219_s29 + $0x228] sm:$0xf]  ;;  %v3024_v22 = vld [vmem:[%s3219_s29 + $0x230] sm:$0xf0]  ;;  %v3467_v23 = vor.u32 %v3000_v20, %v2715_v18  ;;  %v2703_v27 = vld [vmem:[%s3219_s29 + $0x150] sm:$0xf]  ;;  %v2608_v28 = vor.u32 %v2973_v26, %v2607_v25 }
  0x43   : > { %v3469_v24 = vor.u32 %v3024_v22, %v2811_v21  ;;  %956 = vmatpush.bf16.msra.mxu0 %v2620_v19  ;;  %3058 = vmatpush.bf16.msra.mxu3 %v2620_v19  ;;  %v2997_v29 = vld [vmem:[%s3219_s29 + $0x158] sm:$0xf0]  ;;  %v2799_v30 = vld [vmem:[%s3219_s29 + $0x210] sm:$0xf]  ;;  %v2595_v34 = vld [vmem:[%s3219_s29 + $0x78] sm:$0xf] }
  0x44   : > { %v3021_v31 = vld [vmem:[%s3219_s29 + $0x218] sm:$0xf0]  ;;  %3066 = vmatpush.bf16.msra.mxu1 %v3467_v23  ;;  %v3479_v32 = vor.u32 %v2997_v29, %v2703_v27  ;;  %v2970_v35 = vld [vmem:[%s3219_s29 + $0x80] sm:$0xf0]  ;;  %v2691_v36 = vld [vmem:[%s3219_s29 + $0x138] sm:$0xf] }
  0x45   : > { %3074 = vmatpush.bf16.msra.mxu2 %v3469_v24  ;;  %v3481_v33 = vor.u32 %v3021_v31, %v2799_v30  ;;  %v2994_v37 = vld [vmem:[%s3219_s29 + $0x140] sm:$0xf0]  ;;  %v2787_v38 = vld [vmem:[%s3219_s29 + $0x1f8] sm:$0xf]  ;;  %v2596_v40 = vor.u32 %v2970_v35, %v2595_v34  ;;  %v2583_v43 = vld [vmem:[%s3219_s29 + $0x60] sm:$0xf] }
  0x46   : > { %v3018_v39 = vld [vmem:[%s3219_s29 + $0x200] sm:$0xf0]  ;;  %v3491_v41 = vor.u32 %v2994_v37, %v2691_v36  ;;  %v2967_v44 = vld [vmem:[%s3219_s29 + $0x68] sm:$0xf0]  ;;  %v2679_v45 = vld [vmem:[%s3219_s29 + $0x120] sm:$0xf] }
  0x47   : > { %957 = vmatpush.bf16.msra.mxu0 %v2608_v28  ;;  %3059 = vmatpush.bf16.msra.mxu3 %v2608_v28  ;;  %v3493_v42 = vor.u32 %v3018_v39, %v2787_v38  ;;  %v2991_v46 = vld [vmem:[%s3219_s29 + $0x128] sm:$0xf0]  ;;  %v2775_v47 = vld [vmem:[%s3219_s29 + $0x1e0] sm:$0xf]  ;;  %v2584_v49 = vor.u32 %v2967_v44, %v2583_v43  ;;  %v2571_v52 = vld [vmem:[%s3219_s29 + $0x48] sm:$0xf] }
  0x48   : > { %3067 = vmatpush.bf16.msra.mxu1 %v3479_v32  ;;  %v3015_v48 = vld [vmem:[%s3219_s29 + $0x1e8] sm:$0xf0]  ;;  %v3503_v50 = vor.u32 %v2991_v46, %v2679_v45  ;;  %v2964_v53 = vld [vmem:[%s3219_s29 + $0x50] sm:$0xf0]  ;;  %v2667_v54 = vld [vmem:[%s3219_s29 + $0x108] sm:$0xf] }
  0x49   : > { %3075 = vmatpush.bf16.msra.mxu2 %v3481_v33  ;;  %v3505_v51 = vor.u32 %v3015_v48, %v2775_v47  ;;  %v2988_v55 = vld [vmem:[%s3219_s29 + $0x110] sm:$0xf0]  ;;  %v2763_v56 = vld [vmem:[%s3219_s29 + $0x1c8] sm:$0xf]  ;;  %v2572_v58 = vor.u32 %v2964_v53, %v2571_v52  ;;  %v2559_v61 = vld [vmem:[%s3219_s29 + $0x30] sm:$0xf] }
  0x4a   : > { %v3012_v57 = vld [vmem:[%s3219_s29 + $0x1d0] sm:$0xf0]  ;;  %v3515_v59 = vor.u32 %v2988_v55, %v2667_v54  ;;  %v2961_v62 = vld [vmem:[%s3219_s29 + $0x38] sm:$0xf0]  ;;  %v2655_v63 = vld [vmem:[%s3219_s29 + $0xf0] sm:$0xf] }
  0x4b   : > { %958 = vmatpush.bf16.msra.mxu0 %v2596_v40  ;;  %3060 = vmatpush.bf16.msra.mxu3 %v2596_v40  ;;  %v3517_v60 = vor.u32 %v3012_v57, %v2763_v56  ;;  %v2985_v0 = vld [vmem:[%s3219_s29 + $0xf8] sm:$0xf0]  ;;  %v2751_v1 = vld [vmem:[%s3219_s29 + $0x1b0] sm:$0xf]  ;;  %v2560_v3 = vor.u32 %v2961_v62, %v2559_v61  ;;  %v2547_v6 = vld [vmem:[%s3219_s29 + $0x18] sm:$0xf] }
  0x4c   : > { %3068 = vmatpush.bf16.msra.mxu1 %v3491_v41  ;;  %v3009_v2 = vld [vmem:[%s3219_s29 + $0x1b8] sm:$0xf0]  ;;  %v3527_v4 = vor.u32 %v2985_v0, %v2655_v63  ;;  %v2958_v7 = vld [vmem:[%s3219_s29 + $0x20] sm:$0xf0]  ;;  %v2643_v8 = vld [vmem:[%s3219_s29 + $0xd8] sm:$0xf] }
  0x4d   : > { %3076 = vmatpush.bf16.msra.mxu2 %v3493_v42  ;;  %v3529_v5 = vor.u32 %v3009_v2, %v2751_v1  ;;  %v2982_v9 = vld [vmem:[%s3219_s29 + $0xe0] sm:$0xf0]  ;;  %v2739_v10 = vld [vmem:[%s3219_s29 + $0x198] sm:$0xf]  ;;  %v2548_v12 = vor.u32 %v2958_v7, %v2547_v6  ;;  %v2535_v15 = vld [vmem:[%s3219_s29] sm:$0xf] }
  0x4e   : > { %v3006_v11 = vld [vmem:[%s3219_s29 + $0x1a0] sm:$0xf0]  ;;  %v2644_v13 = vor.u32 %v2982_v9, %v2643_v8  ;;  %v2955_v16 = vld [vmem:[%s3219_s29 + $0x8] sm:$0xf0]  ;;  %v2631_v17 = vld [vmem:[%s3219_s29 + $0xc0] sm:$0xf] }
  0x4f   : > { %959 = vmatpush.bf16.msra.mxu0 %v2584_v49  ;;  %3061 = vmatpush.bf16.msra.mxu3 %v2584_v49  ;;  %v3539_v14 = vor.u32 %v3006_v11, %v2739_v10  ;;  %v2979_v18 = vld [vmem:[%s3219_s29 + $0xc8] sm:$0xf0]  ;;  %v2727_v19 = vld [vmem:[%s3219_s29 + $0x180] sm:$0xf]  ;;  %v407_v22 = vld [vmem:[%s4497_s4 + $0x18] sm:$0xff]  ;;  %v2536_v25 = vor.u32 %v2955_v16, %v2535_v15 }
  0x50   : > { %3069 = vmatpush.bf16.msra.mxu1 %v3503_v50  ;;  %v3003_v20 = vld [vmem:[%s3219_s29 + $0x188] sm:$0xf0]  ;;  %v404_v21 = vld [vmem:[%s4497_s4] sm:$0xff]  ;;  %v419_v27 = vld [vmem:[%s4497_s4 + $0x78] sm:$0xff]  ;;  %v2632_v29 = vor.u32 %v2979_v18, %v2631_v17 }
  0x51   : > { %3077 = vmatpush.bf16.msra.mxu2 %v3505_v51  ;;  %v416_v26 = vld [vmem:[%s4497_s4 + $0x60] sm:$0xff]  ;;  %v417_v28 = vld [vmem:[%s4497_s4 + $0x68] sm:$0xff]  ;;  %v3563_v30 = vor.u32 %v3003_v20, %v2727_v19  ;;  %v418_v34 = vld [vmem:[%s4497_s4 + $0x70] sm:$0xff]  ;;  %v3574_v36 = vpack.c.bf16 %v407_v22, %v404_v21 }
  0x52   : > { %v420_v31 = vld [vmem:[%s4497_s4 + $0x80] sm:$0xff]  ;;  %v421_v35 = vld [vmem:[%s4497_s4 + $0x88] sm:$0xff]  ;;  %v3576_v37 = vpack.c.bf16 %v419_v27, %v416_v26  ;;  %v410_v40 = vld [vmem:[%s4497_s4 + $0x30] sm:$0xff] }
  0x53   : > { %960 = vmatpush.bf16.msra.mxu0 %v2572_v58  ;;  %3062 = vmatpush.bf16.msra.mxu3 %v2572_v58  ;;  %v3578_v38 = vpack.c.bf16 %v420_v31, %v417_v28  ;;  %v3580_v39 = vpack.c.bf16 %v421_v35, %v418_v34  ;;  %v422_v43 = vld [vmem:[%s4497_s4 + $0x90] sm:$0xff]  ;;  %v425_v44 = vld [vmem:[%s4497_s4 + $0xa8] sm:$0xff]  ;;  %v424_v45 = vld [vmem:[%s4497_s4 + $0xa0] sm:$0xff] }
  0x54   : > { %3070 = vmatpush.bf16.msra.mxu1 %v3515_v59  ;;  %v427_v46 = vld [vmem:[%s4497_s4 + $0xb8] sm:$0xff]  ;;  %v3617_v48 = vpack.c.bf16 %v425_v44, %v422_v43  ;;  %v405_v54 = vld [vmem:[%s4497_s4 + $0x8] sm:$0xff]  ;;  %v408_v55 = vld [vmem:[%s4497_s4 + $0x20] sm:$0xff] }
  0x55   : > { %3078 = vmatpush.bf16.msra.mxu2 %v3517_v60  ;;  %v3621_v52 = vpack.c.bf16 %v427_v46, %v424_v45  ;;  %v431_v53 = vld [vmem:[%s4497_s4 + $0xd8] sm:$0xff]  ;;  %v429_v56 = vld [vmem:[%s4497_s4 + $0xc8] sm:$0xff]  ;;  %v432_v57 = vld [vmem:[%s4497_s4 + $0xe0] sm:$0xff]  ;;  %v3655_v62 = vpack.c.bf16 %v408_v55, %v405_v54 }
  0x56   : > { %v430_v58 = vld [vmem:[%s4497_s4 + $0xd0] sm:$0xff]  ;;  %v3658_v63 = vpack.c.bf16 %v432_v57, %v429_v56  ;;  %v2975_v1 = vld [vmem:[%s3219_s29 + $0xac] sm:$0xf]  ;;  %v2621_v2 = vld [vmem:[%s3219_s29 + $0xb4] sm:$0xf0] }
  0x57   : > { %961 = vmatpush.bf16.msra.mxu0 %v2560_v3  ;;  %3063 = vmatpush.bf16.msra.mxu3 %v2560_v3  ;;  %v2624_v3 = vor.u32 %v2975_v1, %v2621_v2  ;;  %v2972_v7 = vld [vmem:[%s3219_s29 + $0x94] sm:$0xf]  ;;  %v2609_v8 = vld [vmem:[%s3219_s29 + $0x9c] sm:$0xf0]  ;;  %v2597_v15 = vld [vmem:[%s3219_s29 + $0x84] sm:$0xf0] }
  0x58   : > { %3071 = vmatpush.bf16.msra.mxu1 %v3527_v4  ;;  %v2612_v9 = vor.u32 %v2972_v7, %v2609_v8  ;;  %v3020_v10 = vld [vmem:[%s3219_s29 + $0x214] sm:$0xf]  ;;  %v2801_v11 = vld [vmem:[%s3219_s29 + $0x21c] sm:$0xf0]  ;;  %v3017_v16 = vld [vmem:[%s3219_s29 + $0x1fc] sm:$0xf] }
  0x59   : > { %3079 = vmatpush.bf16.msra.mxu2 %v3529_v5  ;;  %v2789_v17 = vld [vmem:[%s3219_s29 + $0x204] sm:$0xf0]  ;;  %v2585_v19 = vld [vmem:[%s3219_s29 + $0x6c] sm:$0xf0]  ;;  %v435_v26 = vld [vmem:[%s4497_s4 + $0xf8] sm:$0xff] }
  0x5a   : > { %v434_v20 = vld [vmem:[%s4497_s4 + $0xf0] sm:$0xff]  ;;  %v437_v21 = vld [vmem:[%s4497_s4 + $0x108] sm:$0xff]  ;;  %v2792_v22 = vor.u32 %v3017_v16, %v2789_v17  ;;  %v436_v28 = vld [vmem:[%s4497_s4 + $0x100] sm:$0xff] }
  0x5b   : > { %962 = vmatpush.bf16.msra.mxu0 %v2548_v12  ;;  %3064 = vmatpush.bf16.msra.mxu3 %v2548_v12  ;;  %v2804_v12 = vor.u32 %v3020_v10, %v2801_v11  ;;  %v438_v27 = vld [vmem:[%s4497_s4 + $0x110] sm:$0xff]  ;;  %v3014_v34 = vld [vmem:[%s3219_s29 + $0x1e4] sm:$0xf]  ;;  %v3011_v46 = vld [vmem:[%s3219_s29 + $0x1cc] sm:$0xf] }
  0x5c   : > { %3072 = vmatpush.bf16.msra.mxu1 %v2644_v13  ;;  %v2777_v35 = vld [vmem:[%s3219_s29 + $0x1ec] sm:$0xf0]  ;;  %v2561_v54 = vld [vmem:[%s3219_s29 + $0x3c] sm:$0xf0]  ;;  %v2999_v55 = vld [vmem:[%s3219_s29 + $0x16c] sm:$0xf] }
  0x5d   : > { %3080 = vmatpush.bf16.msra.mxu2 %v3539_v14  ;;  %v2780_v44 = vor.u32 %v3014_v34, %v2777_v35  ;;  %v3008_v57 = vld [vmem:[%s3219_s29 + $0x1b4] sm:$0xf]  ;;  %v2957_v1 = vld [vmem:[%s3219_s29 + $0x1c] sm:$0xf]  ;;  %v2549_v2 = vld [vmem:[%s3219_s29 + $0x24] sm:$0xf0] }
  0x5e   : > { %v2552_v7 = vor.u32 %v2957_v1, %v2549_v2  ;;  %v3005_v8 = vld [vmem:[%s3219_s29 + $0x19c] sm:$0xf]  ;;  %v2705_v10 = vld [vmem:[%s3219_s29 + $0x15c] sm:$0xf0]  ;;  %v2954_v11 = vld [vmem:[%s3219_s29 + $0x4] sm:$0xf] }
  0x5f   : > { %963 = vmatpush.bf16.msra.mxu0 %v2536_v25  ;;  %3065 = vmatpush.bf16.msra.mxu3 %v2536_v25  ;;  %v414_v25 = vld [vmem:[%s4497_s4 + $0x50] sm:$0xff]  ;;  %v444_v16 = vld [vmem:[%s4497_s4 + $0x140] sm:$0xff] }
  0x60   : > { %3073 = vmatpush.bf16.msra.mxu1 %v2632_v29  ;;  %v442_v17 = vld [vmem:[%s4497_s4 + $0x130] sm:$0xff]  ;;  %v2990_v34 = vld [vmem:[%s3219_s29 + $0x124] sm:$0xf] }
  0x61   : > { %3081 = vmatpush.bf16.msra.mxu2 %v3563_v30  ;;  %v2681_v35 = vld [vmem:[%s3219_s29 + $0x12c] sm:$0xf0] }
  0x62   : > { %964 = vmatmul.bf16.vlgmr.msra.gmra.mxu0 %v3574_v36  ;;  %974 = vmatmul.bf16.vlgmr.msra.gmra.mxu3 %v3576_v37 }
  0x63   : > { %1005 = vmatpush.bf16.msrb.mxu0 %v3467_v23  ;;  %1023 = vmatmul.bf16.vlgmr.msra.gmra.mxu1 %v3578_v38  ;;  %v413_v23 = vld [vmem:[%s4497_s4 + $0x48] sm:$0xff] }
  0x64   : > { %1072 = vmatmul.bf16.vlgmr.msra.gmra.mxu2 %v3580_v39  ;;  %v3615_v47 = vpack.c.bf16 %v413_v23, %v410_v40  ;;  %1103 = vmatpush.bf16.msrb.mxu3 %v2624_v3  ;;  %v3713_v23 = vpack.c.bf16 %v438_v27, %v435_v26  ;;  %v440_v3 = vld [vmem:[%s4497_s4 + $0x120] sm:$0xff]  ;;  %v2693_v26 = vld [vmem:[%s3219_s29 + $0x144] sm:$0xf0] }
  0x67   : > { %1006 = vmatpush.bf16.msrb.mxu0 %v3479_v32  ;;  %v423_v32 = vld [vmem:[%s4497_s4 + $0x98] sm:$0xff] }
  0x68   : > { %1104 = vmatpush.bf16.msrb.mxu3 %v2612_v9  ;;  %v2741_v9 = vld [vmem:[%s3219_s29 + $0x1a4] sm:$0xf0] }
  0x6b   : > { %1007 = vmatpush.bf16.msrb.mxu0 %v3491_v41  ;;  %v426_v41 = vld [vmem:[%s4497_s4 + $0xb0] sm:$0xff] }
  0x6c   : > { %v3619_v49 = vpack.c.bf16 %v426_v41, %v423_v32  ;;  %v2963_v32 = vld [vmem:[%s3219_s29 + $0x4c] sm:$0xf]  ;;  %v2573_v41 = vld [vmem:[%s3219_s29 + $0x54] sm:$0xf0] }
  0x6d   : > { %v2576_v45 = vor.u32 %v2963_v32, %v2573_v41  ;;  %v2987_v32 = vld [vmem:[%s3219_s29 + $0x10c] sm:$0xf]  ;;  %v2669_v41 = vld [vmem:[%s3219_s29 + $0x114] sm:$0xf0] }
  0x6f   : > { %1008 = vmatpush.bf16.msrb.mxu0 %v3503_v50  ;;  %v428_v50 = vld [vmem:[%s4497_s4 + $0xc0] sm:$0xff] }
  0x70   : > { %v3653_v61 = vpack.c.bf16 %v431_v53, %v428_v50  ;;  %v2960_v53 = vld [vmem:[%s3219_s29 + $0x34] sm:$0xf] }
  0x71   : > { %v2564_v56 = vor.u32 %v2960_v53, %v2561_v54  ;;  %v2657_v53 = vld [vmem:[%s3219_s29 + $0xfc] sm:$0xf0]  ;;  %v447_v54 = vld [vmem:[%s4497_s4 + $0x158] sm:$0xff] }
  0x72   : > { %969 = vmatmul.bf16.gmra.mxu0 %v3615_v47  ;;  %979 = vmatmul.bf16.gmra.mxu3 %v3617_v48 }
  0x73   : > { %1009 = vmatpush.bf16.msrb.mxu0 %v3515_v59  ;;  %1028 = vmatmul.bf16.gmra.mxu1 %v3619_v49  ;;  %v433_v59 = vld [vmem:[%s4497_s4 + $0xe8] sm:$0xff] }
  0x74   : > { %1077 = vmatmul.bf16.gmra.mxu2 %v3621_v52  ;;  %v3660_v0 = vpack.c.bf16 %v433_v59, %v430_v58  ;;  %v2753_v58 = vld [vmem:[%s3219_s29 + $0x1bc] sm:$0xf0]  ;;  %v2717_v59 = vld [vmem:[%s3219_s29 + $0x174] sm:$0xf0] }
  0x77   : > { %1010 = vmatpush.bf16.msrb.mxu0 %v3527_v4  ;;  %v3023_v4 = vld [vmem:[%s3219_s29 + $0x22c] sm:$0xf] }
  0x7b   : > { %1011 = vmatpush.bf16.msrb.mxu0 %v2644_v13  ;;  %v2969_v13 = vld [vmem:[%s3219_s29 + $0x7c] sm:$0xf] }
  0x7c   : > { %v2600_v18 = vor.u32 %v2969_v13, %v2597_v15  ;;  %v406_v13 = vld [vmem:[%s4497_s4 + $0x10] sm:$0xff]  ;;  %v409_v15 = vld [vmem:[%s4497_s4 + $0x28] sm:$0xff] }
  0x7e   : > { %1105 = vmatpush.bf16.msrb.mxu3 %v2600_v18  ;;  %v445_v18 = vld [vmem:[%s4497_s4 + $0x148] sm:$0xff] }
  0x7f   : > { %1012 = vmatpush.bf16.msrb.mxu0 %v2632_v29  ;;  %v439_v29 = vld [vmem:[%s4497_s4 + $0x118] sm:$0xff] }
  0x80   : > { %v3715_v43 = vpack.c.bf16 %v439_v29, %v436_v28  ;;  %v3777_v28 = vpack.c.bf16 %v445_v18, %v442_v17 }
  0x82   : > { %984 = vmatmul.bf16.gmra.mxu3 %v3653_v61  ;;  %1013 = vmatmul.bf16.vlgmr.msrb.gmra.mxu0 %v3655_v62 }
  0x83   : > { %1054 = vmatpush.bf16.msra.mxu0 %v3469_v24  ;;  %1033 = vmatmul.bf16.gmra.mxu1 %v3658_v63  ;;  %v2813_v24 = vld [vmem:[%s3219_s29 + $0x234] sm:$0xf0] }
  0x84   : > { %1082 = vmatmul.bf16.gmra.mxu2 %v3660_v0  ;;  %v2816_v6 = vor.u32 %v3023_v4, %v2813_v24  ;;  %v443_v4 = vld [vmem:[%s4497_s4 + $0x138] sm:$0xff]  ;;  %v2720_v24 = vor.u32 %v2999_v55, %v2717_v59  ;;  %v412_v55 = vld [vmem:[%s4497_s4 + $0x40] sm:$0xff] }
  0x85   : > { %v451_v59 = vld [vmem:[%s4497_s4 + $0x178] sm:$0xff] }
  0x86   : > { %1201 = vmatpush.bf16.msrb.mxu1 %v2816_v6  ;;  %v2996_v6 = vld [vmem:[%s3219_s29 + $0x154] sm:$0xf] }
  0x87   : > { %1055 = vmatpush.bf16.msra.mxu0 %v3481_v33  ;;  %v2966_v33 = vld [vmem:[%s3219_s29 + $0x64] sm:$0xf] }
  0x88   : > { %v2588_v31 = vor.u32 %v2966_v33, %v2585_v19  ;;  %v2744_v33 = vor.u32 %v3005_v8, %v2741_v9  ;;  %v2708_v19 = vor.u32 %v2996_v6, %v2705_v10  ;;  %v2978_v8 = vld [vmem:[%s3219_s29 + $0xc4] sm:$0xf]  ;;  %v2633_v9 = vld [vmem:[%s3219_s29 + $0xcc] sm:$0xf0] }
  0x89   : > { %v2636_v10 = vor.u32 %v2978_v8, %v2633_v9  ;;  %v2977_v8 = vld [vmem:[%s3219_s29 + $0xb8] sm:$0xf0]  ;;  %v2723_v9 = vld [vmem:[%s3219_s29 + $0x170] sm:$0xf] }
  0x8a   : > { %1202 = vmatpush.bf16.msrb.mxu1 %v2804_v12  ;;  %1106 = vmatpush.bf16.msrb.mxu3 %v2588_v31  ;;  %v441_v12 = vld [vmem:[%s4497_s4 + $0x128] sm:$0xff] }
  0x8b   : > { %1056 = vmatpush.bf16.msra.mxu0 %v3493_v42  ;;  %v411_v42 = vld [vmem:[%s4497_s4 + $0x38] sm:$0xff]  ;;  %v3775_v27 = vpack.c.bf16 %v444_v16, %v441_v12 }
  0x8c   : > { %v3711_v40 = vpack.c.bf16 %v414_v25, %v411_v42  ;;  %v3771_v42 = vpack.c.bf16 %v409_v15, %v406_v13  ;;  %v2993_v25 = vld [vmem:[%s3219_s29 + $0x13c] sm:$0xf] }
  0x8d   : > { %v2696_v31 = vor.u32 %v2993_v25, %v2693_v26 }
  0x8e   : > { %1203 = vmatpush.bf16.msrb.mxu1 %v2792_v22  ;;  %1107 = vmatpush.bf16.msrb.mxu3 %v2576_v45  ;;  %v3769_v22 = vpack.c.bf16 %v443_v4, %v440_v3  ;;  %v446_v45 = vld [vmem:[%s4497_s4 + $0x150] sm:$0xff]  ;;  %v2981_v3 = vld [vmem:[%s3219_s29 + $0xdc] sm:$0xf]  ;;  %v2645_v4 = vld [vmem:[%s3219_s29 + $0xe4] sm:$0xf0] }
  0x8f   : > { %1057 = vmatpush.bf16.msra.mxu0 %v3505_v51  ;;  %v3709_v51 = vpack.c.bf16 %v437_v21, %v434_v20  ;;  %v2729_v21 = vld [vmem:[%s3219_s29 + $0x18c] sm:$0xf0] }
  0x92   : > { %989 = vmatmul.bf16.gmra.mxu3 %v3709_v51  ;;  %1018 = vmatmul.bf16.gmra.mxu0 %v3711_v40 }
  0x93   : > { %1058 = vmatpush.bf16.msra.mxu0 %v3517_v60  ;;  %1038 = vmatmul.bf16.gmra.mxu1 %v3713_v23  ;;  %v2765_v60 = vld [vmem:[%s3219_s29 + $0x1d4] sm:$0xf0] }
  0x94   : > { %1087 = vmatmul.bf16.gmra.mxu2 %v3715_v43  ;;  %1204 = vmatpush.bf16.msrb.mxu1 %v2780_v44  ;;  %v2768_v50 = vor.u32 %v3011_v46, %v2765_v60  ;;  %v2684_v44 = vor.u32 %v2990_v34, %v2681_v35  ;;  %v2672_v46 = vor.u32 %v2987_v32, %v2669_v41  ;;  %v449_v60 = vld [vmem:[%s4497_s4 + $0x168] sm:$0xff] }
  0x95   : > { %1108 = vmatpush.bf16.msrb.mxu3 %v2564_v56  ;;  %v415_v56 = vld [vmem:[%s4497_s4 + $0x58] sm:$0xff]  ;;  %v3813_v2 = vpack.c.bf16 %v449_v60, %v446_v45 }
  0x97   : > { %1059 = vmatpush.bf16.msra.mxu0 %v3529_v5  ;;  %v2756_v5 = vor.u32 %v3008_v57, %v2753_v58  ;;  %v450_v57 = vld [vmem:[%s4497_s4 + $0x170] sm:$0xff]  ;;  %v448_v58 = vld [vmem:[%s4497_s4 + $0x160] sm:$0xff] }
  0x98   : > { %1205 = vmatpush.bf16.msrb.mxu1 %v2768_v50  ;;  %v2984_v50 = vld [vmem:[%s3219_s29 + $0xf4] sm:$0xf]  ;;  %v3821_v6 = vpack.c.bf16 %v451_v59, %v448_v58 }
  0x99   : > { %1109 = vmatpush.bf16.msrb.mxu3 %v2552_v7  ;;  %v2660_v1 = vor.u32 %v2984_v50, %v2657_v53  ;;  %v2648_v7 = vor.u32 %v2981_v3, %v2645_v4 }
  0x9a   : > { %4513 = vst [vmem:[#allocation3_spill] sm:$0xff] %v3821_v6 }
  0x9b   : > { %1060 = vmatpush.bf16.msra.mxu0 %v3539_v14  ;;  %v2537_v14 = vld [vmem:[%s3219_s29 + $0xc] sm:$0xf0] }
  0x9c   : > { %1206 = vmatpush.bf16.msrb.mxu1 %v2756_v5  ;;  %v2540_v20 = vor.u32 %v2954_v11, %v2537_v14  ;;  %v3815_v5 = vpack.c.bf16 %v415_v56, %v412_v55 }
  0x9e   : > { %1110 = vmatpush.bf16.msrb.mxu3 %v2540_v20 }
  0x9f   : > { %1061 = vmatpush.bf16.msra.mxu0 %v3563_v30  ;;  %v3002_v30 = vld [vmem:[%s3219_s29 + $0x184] sm:$0xf] }
  0xa0   : > { %1207 = vmatpush.bf16.msrb.mxu1 %v2744_v33  ;;  %v2732_v29 = vor.u32 %v3002_v30, %v2729_v21 }
  0xa2   : > { %994 = vmatmul.bf16.gmra.mxu3 %v3769_v22  ;;  %1062 = vmatmul.bf16.vlgmr.msra.gmra.mxu0 %v3771_v42 }
  0xa3   : > { %1152 = vmatpush.bf16.msrb.mxu0 %v2720_v24  ;;  %1043 = vmatmul.bf16.gmra.mxu1 %v3775_v27  ;;  %v3819_v24 = vpack.c.bf16 %v450_v57, %v447_v54 }
  0xa4   : > { %1092 = vmatmul.bf16.gmra.mxu2 %v3777_v28  ;;  %1208 = vmatpush.bf16.msrb.mxu1 %v2732_v29 }
  0xa7   : > { %1153 = vmatpush.bf16.msrb.mxu0 %v2708_v19 }
  0xab   : > { %1154 = vmatpush.bf16.msrb.mxu0 %v2696_v31 }
  0xaf   : > { %1155 = vmatpush.bf16.msrb.mxu0 %v2684_v44 }
  0xb2   : > { %999 = vmatmul.bf16.gmra.mxu3 %v3813_v2  ;;  %1067 = vmatmul.bf16.gmra.mxu0 %v3815_v5 }
  0xb3   : > { %1156 = vmatpush.bf16.msrb.mxu0 %v2672_v46  ;;  %1048 = vmatmul.bf16.gmra.mxu1 %v3819_v24 }
  0xb4   : > { %1097 = vmatmul.bf16.gmra.mxu2 %v3821_v6 }
  0xb7   : > { %1157 = vmatpush.bf16.msrb.mxu0 %v2660_v1 }
  0xbb   : > { %1158 = vmatpush.bf16.msrb.mxu0 %v2648_v7  ;;  %v2627_v7 = vld [vmem:[%s3219_s29 + $0xb0] sm:$0xf] }
  0xbf   : > { %1159 = vmatpush.bf16.msrb.mxu0 %v2636_v10 }
  0xc2   : > { %1111 = vmatmul.bf16.vlgmr.msrb.gmra.mxu3 %v3574_v36  ;;  %1160 = vmatmul.bf16.vlgmr.msrb.gmra.mxu0 %v3655_v62 }
  0xc3   : > { %1209 = vmatmul.bf16.vlgmr.msrb.gmra.mxu1 %v3771_v42 }
  0xd2   : > { %1116 = vmatmul.bf16.gmra.mxu3 %v3615_v47  ;;  %1165 = vmatmul.bf16.gmra.mxu0 %v3711_v40 }
  0xd3   : > { %1214 = vmatmul.bf16.gmra.mxu1 %v3815_v5 }
  0xdf   : > { %v965_v11 = vpop.f32.mrf.mxu0 }
  0xe0   : > { %v1024_v14 = vpop.f32.mrf.mxu1 }
  0xe2   : > { %1121 = vmatmul.bf16.gmra.mxu3 %v3576_v37  ;;  %1170 = vmatmul.bf16.gmra.mxu0 %v3578_v38 }
  0xe3   : > { %1219 = vmatmul.bf16.gmra.mxu1 %v3580_v39 }
  0xe5   : > { %v975_v12 = vpop.f32.mrf.mxu3 }
  0xe6   : > { %v3838_v13 = vadd.f32 %v1024_v14, %v975_v12  ;;  %v3001_v14 = vld [vmem:[%s3219_s29 + $0x178] sm:$0xf0] }
  0xe7   : > { %v967_v15 = vpop.f32.mrf.mxu0 }
  0xe8   : > { %v1026_v16 = vpop.f32.mrf.mxu1 }
  0xed   : > { %v977_v17 = vpop.f32.mrf.mxu3 }
  0xee   : > { %v3840_v18 = vadd.f32 %v1026_v16, %v977_v17 }
  0xef   : > { %v970_v33 = vpop.f32.mrf.mxu0 }
  0xf0   : > { %v1029_v19 = vpop.f32.mrf.mxu1 }
  0xf2   : > { %1126 = vmatmul.bf16.gmra.mxu3 %v3617_v48  ;;  %1175 = vmatmul.bf16.gmra.mxu0 %v3619_v49 }
  0xf3   : > { %1224 = vmatmul.bf16.gmra.mxu1 %v3621_v52 }
  0xf5   : > { %v980_v20 = vpop.f32.mrf.mxu3 }
  0xf6   : > { %v3845_v30 = vadd.f32 %v1029_v19, %v980_v20  ;;  %v2974_v19 = vld [vmem:[%s3219_s29 + $0xa0] sm:$0xf0]  ;;  %v2711_v20 = vld [vmem:[%s3219_s29 + $0x158] sm:$0xf] }
  0xf7   : > { %v972_v21 = vpop.f32.mrf.mxu0 }
  0xf8   : > { %v1031_v25 = vpop.f32.mrf.mxu1 }
  0xfd   : > { %v982_v26 = vpop.f32.mrf.mxu3 }
  0xfe   : > { %v3847_v29 = vadd.f32 %v1031_v25, %v982_v26  ;;  %v2998_v25 = vld [vmem:[%s3219_s29 + $0x160] sm:$0xf0] }
  0xff   : > { %v1014_v31 = vpop.f32.mrf.mxu0  ;;  %v2712_v26 = vor.u32 %v2998_v25, %v2711_v20  ;;  %v3022_v20 = vld [vmem:[%s3219_s29 + $0x220] sm:$0xf0] }
 0x100   : > { %v3849_v34 = vadd.f32 %v1014_v31, %v965_v11  ;;  %v1034_v35 = vpop.f32.mrf.mxu1  ;;  %v2628_v11 = vor.u32 %v2977_v8, %v2627_v7  ;;  %v2603_v31 = vld [vmem:[%s3219_s29 + $0x80] sm:$0xf] }
 0x102   : > { %1131 = vmatmul.bf16.gmra.mxu3 %v3653_v61  ;;  %1180 = vmatmul.bf16.gmra.mxu0 %v3658_v63 }
 0x103   : > { %1229 = vmatmul.bf16.gmra.mxu1 %v3660_v0  ;;  %1250 = vmatpush.bf16.msrb.mxu2 %v2628_v11  ;;  %v2968_v11 = vld [vmem:[%s3219_s29 + $0x70] sm:$0xf0] }
 0x105   : > { %v985_v44 = vpop.f32.mrf.mxu3 }
 0x106   : > { %v3854_v32 = vadd.f32 %v1034_v35, %v985_v44  ;;  %v2971_v35 = vld [vmem:[%s3219_s29 + $0x88] sm:$0xf0]  ;;  %v2699_v44 = vld [vmem:[%s3219_s29 + $0x140] sm:$0xf] }
 0x107   : > { %v1016_v41 = vpop.f32.mrf.mxu0 }
 0x108   : > { %v3856_v45 = vadd.f32 %v1016_v41, %v967_v15  ;;  %v3858_v46 = vpop.f32.mrf.mxu1  ;;  %v2724_v15 = vor.u32 %v3001_v14, %v2723_v9  ;;  %v2687_v14 = vld [vmem:[%s3219_s29 + $0x128] sm:$0xf] }
 0x10a   : > { %1299 = vmatpush.bf16.msra.mxu3 %v2724_v15 }
 0x10d   : > { %v3860_v60 = vpop.f32.mrf.mxu3 }
 0x10e   : > { %1300 = vmatpush.bf16.msra.mxu3 %v2712_v26  ;;  %v2579_v26 = vld [vmem:[%s3219_s29 + $0x50] sm:$0xf] }
 0x10f   : > { %v1019_v50 = vpop.f32.mrf.mxu0 }
 0x110   : > { %v3862_v53 = vadd.f32 %v1019_v50, %v970_v33  ;;  %v1039_v54 = vpop.f32.mrf.mxu1  ;;  %v2615_v33 = vld [vmem:[%s3219_s29 + $0x98] sm:$0xf]  ;;  %v2604_v50 = vor.u32 %v2971_v35, %v2603_v31  ;;  %v2965_v31 = vld [vmem:[%s3219_s29 + $0x58] sm:$0xf0]  ;;  %v2675_v35 = vld [vmem:[%s3219_s29 + $0x110] sm:$0xf] }
 0x112   : > { %1136 = vmatmul.bf16.gmra.mxu3 %v3709_v51  ;;  %1185 = vmatmul.bf16.gmra.mxu0 %v3713_v23 }
 0x113   : > { %1234 = vmatmul.bf16.gmra.mxu1 %v3715_v43 }
 0x115   : > { %v990_v55 = vpop.f32.mrf.mxu3 }
 0x116   : > { %v3867_v56 = vadd.f32 %v1039_v54, %v990_v55  ;;  %v2995_v54 = vld [vmem:[%s3219_s29 + $0x148] sm:$0xf0]  ;;  %v2819_v55 = vld [vmem:[%s3219_s29 + $0x230] sm:$0xf] }
 0x117   : > { %v1021_v57 = vpop.f32.mrf.mxu0 }
 0x118   : > { %v3869_v58 = vadd.f32 %v1021_v57, %v972_v21  ;;  %v3871_v59 = vpop.f32.mrf.mxu1  ;;  %v2616_v21 = vor.u32 %v2974_v19, %v2615_v33  ;;  %v3025_v57 = vld [vmem:[%s3219_s29 + $0x238] sm:$0xf0]  ;;  %v2992_v33 = vld [vmem:[%s3219_s29 + $0x130] sm:$0xf0]  ;;  %v2807_v19 = vld [vmem:[%s3219_s29 + $0x218] sm:$0xf] }
 0x119   : > { %v2820_v7 = vor.u32 %v3025_v57, %v2819_v55  ;;  %v2808_v25 = vor.u32 %v3022_v20, %v2807_v19  ;;  %v2795_v55 = vld [vmem:[%s3219_s29 + $0x200] sm:$0xf]  ;;  %v3019_v57 = vld [vmem:[%s3219_s29 + $0x208] sm:$0xf0]  ;;  %v2663_v19 = vld [vmem:[%s3219_s29 + $0xf8] sm:$0xf] }
 0x11a   : > { %1251 = vmatpush.bf16.msrb.mxu2 %v2616_v21  ;;  %v2688_v21 = vor.u32 %v2992_v33, %v2687_v14  ;;  %v2962_v33 = vld [vmem:[%s3219_s29 + $0x40] sm:$0xf0] }
 0x11b   : > { %1348 = vmatpush.bf16.msra.mxu0 %v2820_v7 }
 0x11d   : > { %v3873_v1 = vpop.f32.mrf.mxu3 }
 0x11e   : > { %1252 = vmatpush.bf16.msrb.mxu2 %v2604_v50  ;;  %v2580_v50 = vor.u32 %v2965_v31, %v2579_v26 }
 0x11f   : > { %v3875_v3 = vpop.f32.mrf.mxu0  ;;  %1349 = vmatpush.bf16.msra.mxu0 %v2808_v25  ;;  %v3016_v25 = vld [vmem:[%s3219_s29 + $0x1f0] sm:$0xf0] }
 0x120   : > { %v1044_v4 = vpop.f32.mrf.mxu1 }
 0x122   : > { %1141 = vmatmul.bf16.gmra.mxu3 %v3769_v22  ;;  %1190 = vmatmul.bf16.gmra.mxu0 %v3775_v27 }
 0x123   : > { %1239 = vmatmul.bf16.gmra.mxu1 %v3777_v28 }
 0x125   : > { %v995_v10 = vpop.f32.mrf.mxu3 }
 0x126   : > { %v3884_v12 = vadd.f32 %v1044_v4, %v995_v10  ;;  %v2700_v4 = vor.u32 %v2995_v54, %v2699_v44  ;;  %v2591_v10 = vld [vmem:[%s3219_s29 + $0x68] sm:$0xf]  ;;  %v2989_v54 = vld [vmem:[%s3219_s29 + $0x118] sm:$0xf0] }
 0x127   : > { %v3886_v16 = vpop.f32.mrf.mxu0  ;;  %v2592_v15 = vor.u32 %v2968_v11, %v2591_v10  ;;  %v2676_v7 = vor.u32 %v2989_v54, %v2675_v35  ;;  %v2796_v10 = vor.u32 %v3019_v57, %v2795_v55  ;;  %v2555_v35 = vld [vmem:[%s3219_s29 + $0x20] sm:$0xf]  ;;  %v2983_v57 = vld [vmem:[%s3219_s29 + $0xe8] sm:$0xf0] }
 0x128   : > { %v3888_v17 = vpop.f32.mrf.mxu1  ;;  %1301 = vmatpush.bf16.msra.mxu3 %v2700_v4 }
 0x129   : > { %1253 = vmatpush.bf16.msrb.mxu2 %v2592_v15  ;;  %v2567_v15 = vld [vmem:[%s3219_s29 + $0x38] sm:$0xf]  ;;  %1350 = vmatpush.bf16.msra.mxu0 %v2796_v10  ;;  %v3013_v10 = vld [vmem:[%s3219_s29 + $0x1d8] sm:$0xf0] }
 0x12a   : > { %v2568_v20 = vor.u32 %v2962_v33, %v2567_v15 }
 0x12c   : > { %1302 = vmatpush.bf16.msra.mxu3 %v2688_v21  ;;  %v2783_v21 = vld [vmem:[%s3219_s29 + $0x1e8] sm:$0xf] }
 0x12d   : > { %v3897_v41 = vpop.f32.mrf.mxu3  ;;  %1254 = vmatpush.bf16.msrb.mxu2 %v2580_v50  ;;  %v2784_v31 = vor.u32 %v3016_v25, %v2783_v21  ;;  %v2651_v50 = vld [vmem:[%s3219_s29 + $0xe0] sm:$0xf]  ;;  %v2956_v21 = vld [vmem:[%s3219_s29 + $0x10] sm:$0xf0]  ;;  %v2639_v25 = vld [vmem:[%s3219_s29 + $0xc8] sm:$0xf] }
 0x12e   : > { %v2652_v15 = vor.u32 %v2983_v57, %v2651_v50  ;;  %v2747_v50 = vld [vmem:[%s3219_s29 + $0x1a0] sm:$0xf] }
 0x12f   : > { %v3902_v8 = vpop.f32.mrf.mxu0  ;;  %1351 = vmatpush.bf16.msra.mxu0 %v2784_v31  ;;  %v2980_v31 = vld [vmem:[%s3219_s29 + $0xd0] sm:$0xf0] }
 0x130   : > { %v1049_v9 = vpop.f32.mrf.mxu1  ;;  %1303 = vmatpush.bf16.msra.mxu3 %v2676_v7  ;;  %v2771_v7 = vld [vmem:[%s3219_s29 + $0x1d0] sm:$0xf] }
 0x131   : > { %1255 = vmatpush.bf16.msrb.mxu2 %v2568_v20  ;;  %v2772_v33 = vor.u32 %v3013_v10, %v2771_v7 }
 0x132   : > { %1146 = vmatmul.bf16.gmra.mxu3 %v3813_v2  ;;  %1195 = vmatmul.bf16.gmra.mxu0 %v3819_v24 }
 0x133   : > { %1244 = vmatmul.bf16.gmra.mxu1 %v3821_v6  ;;  %1352 = vmatpush.bf16.msra.mxu0 %v2772_v33  ;;  %v2640_v6 = vor.u32 %v2980_v31, %v2639_v25  ;;  %v1064_v33 = vadd.f32 %v3875_v3, %v3849_v34  ;;  %v2735_v25 = vld [vmem:[%s3219_s29 + $0x188] sm:$0xf] }
 0x135   : > { %v1000_v44 = vpop.f32.mrf.mxu3 }
 0x136   : > { %v3919_v4 = vadd.f32 %v1049_v9, %v1000_v44  ;;  %v2986_v9 = vld [vmem:[%s3219_s29 + $0x100] sm:$0xf0]  ;;  %v2959_v44 = vld [vmem:[%s3219_s29 + $0x28] sm:$0xf0] }
 0x137   : > { %v3921_v11 = vpop.f32.mrf.mxu0  ;;  %v2664_v26 = vor.u32 %v2986_v9, %v2663_v19  ;;  %v2556_v55 = vor.u32 %v2959_v44, %v2555_v35  ;;  %v2543_v9 = vld [vmem:[%s3219_s29 + $0x8] sm:$0xf]  ;;  %v2759_v35 = vld [vmem:[%s3219_s29 + $0x1b8] sm:$0xf]  ;;  %v3010_v44 = vld [vmem:[%s3219_s29 + $0x1c0] sm:$0xf0] }
 0x138   : > { %v3923_v14 = vpop.f32.mrf.mxu1 }
 0x139   : > { %4514 = vst [vmem:[#allocation4_spill] sm:$0xff] %v3923_v14  ;;  %1304 = vmatpush.bf16.msra.mxu3 %v2664_v26  ;;  %1256 = vmatpush.bf16.msrb.mxu2 %v2556_v55  ;;  %v2544_v26 = vor.u32 %v2956_v21, %v2543_v9  ;;  %v2760_v14 = vor.u32 %v3010_v44, %v2759_v35  ;;  %v3007_v55 = vld [vmem:[%s3219_s29 + $0x1a8] sm:$0xf0]  ;;  %v1073_v35 = vpop.f32.mrf.mxu2 }
 0x13a   : > { %v2748_v7 = vor.u32 %v3007_v55, %v2747_v50 }
 0x13b   : > { %1353 = vmatpush.bf16.msra.mxu0 %v2760_v14 }
 0x13d   : > { %v3934_v54 = vpop.f32.mrf.mxu3  ;;  %1305 = vmatpush.bf16.msra.mxu3 %v2652_v15  ;;  %1257 = vmatpush.bf16.msrb.mxu2 %v2544_v26  ;;  %v3004_v26 = vld [vmem:[%s3219_s29 + $0x190] sm:$0xf0] }
 0x13f   : > { %v1161_v19 = vpop.f32.mrf.mxu0  ;;  %1354 = vmatpush.bf16.msra.mxu0 %v2748_v7  ;;  %v1069_v7 = vadd.f32 %v3902_v8, %v3862_v53  ;;  %v1074_v8 = vadd.f32 %v1073_v35, %v3838_v13 }
 0x140   : > { %v1210_v20 = vpop.f32.mrf.mxu1  ;;  %1258 = vmatmul.bf16.vlgmr.msrb.gmra.mxu2 %v3574_v36  ;;  %v1066_v36 = vadd.f32 %v3886_v16, %v3856_v45 }
 0x141   : > { %1306 = vmatpush.bf16.msra.mxu3 %v2640_v6  ;;  %v2736_v6 = vor.u32 %v3004_v26, %v2735_v25 }
 0x143   : > { %1355 = vmatpush.bf16.msra.mxu0 %v2736_v6 }
 0x144   : > { %1307 = vmatmul.bf16.vlgmr.msra.gmra.mxu3 %v3655_v62 }
 0x145   : > { %v1112_v57 = vpop.f32.mrf.mxu3 }
 0x146   : > { %v1162_v10 = vadd.f32 %v1161_v19, %v1112_v57  ;;  %1356 = vmatmul.bf16.vlgmr.msra.gmra.mxu0 %v3771_v42  ;;  %v1075_v57 = vpop.f32.mrf.mxu2 }
 0x147   : > { %v1163_v15 = vpop.f32.mrf.mxu0 }
 0x148   : > { %v1211_v9 = vadd.f32 %v1210_v20, %v1162_v10  ;;  %v1212_v21 = vpop.f32.mrf.mxu1 }
 0x14a   : > { %v1397_v14 = vpack.c.bf16 %v1211_v9, %v1064_v33  ;;  %v1071_v9 = vadd.f32 %v3921_v11, %v3869_v58 }
 0x14c   : > { %1429 = vst [vmem:[#allocation2] sm:$0xff] %v1397_v14 }
 0x14d   : > { %v1114_v31 = vpop.f32.mrf.mxu3 }
 0x14e   : > { %v1164_v19 = vadd.f32 %v1163_v15, %v1114_v31  ;;  %v1078_v25 = vpop.f32.mrf.mxu2 }
 0x14f   : > { %v1166_v44 = vpop.f32.mrf.mxu0  ;;  %v1079_v35 = vadd.f32 %v1078_v25, %v3845_v30 }
 0x150   : > { %v1213_v62 = vadd.f32 %v1212_v21, %v1164_v19  ;;  %v1215_v34 = vpop.f32.mrf.mxu1  ;;  %1263 = vmatmul.bf16.gmra.mxu2 %v3615_v47 }
 0x152   : > { %v1399_v3 = vpack.c.bf16 %v1213_v62, %v1066_v36  ;;  %v1076_v36 = vadd.f32 %v1075_v57, %v3840_v18 }
 0x154   : > { %1431 = vst [vmem:[#allocation2 + $0xc] sm:$0xff] %v1399_v3  ;;  %1312 = vmatmul.bf16.gmra.mxu3 %v3711_v40 }
 0x155   : > { %v1117_v20 = vpop.f32.mrf.mxu3 }
 0x156   : > { %v1167_v50 = vadd.f32 %v1166_v44, %v1117_v20  ;;  %1361 = vmatmul.bf16.gmra.mxu0 %v3815_v5  ;;  %v1080_v19 = vpop.f32.mrf.mxu2 }
 0x157   : > { %v1168_v55 = vpop.f32.mrf.mxu0 }
 0x158   : > { %v1216_v10 = vadd.f32 %v1215_v34, %v1167_v50  ;;  %v1217_v42 = vpop.f32.mrf.mxu1 }
 0x15a   : > { %v1401_v15 = vpack.c.bf16 %v1216_v10, %v1069_v7  ;;  %v1081_v10 = vadd.f32 %v1080_v19, %v3847_v29  ;;  %v1037_v29 = vadd.f32 %v3858_v46, %v3860_v60 }
 0x15c   : > { %1433 = vst [vmem:[#allocation2 + $0x18] sm:$0xff] %v1401_v15 }
 0x15d   : > { %v1119_v45 = vpop.f32.mrf.mxu3 }
 0x15e   : > { %v1169_v16 = vadd.f32 %v1168_v55, %v1119_v45 }
 0x15f   : > { %v1171_v33 = vpop.f32.mrf.mxu0 }
 0x160   : > { %v1218_v47 = vadd.f32 %v1217_v42, %v1169_v16  ;;  %v1220_v21 = vpop.f32.mrf.mxu1  ;;  %1268 = vmatmul.bf16.gmra.mxu2 %v3576_v37 }
 0x162   : > { %v1403_v40 = vpack.c.bf16 %v1218_v47, %v1071_v9 }
 0x164   : > { %1435 = vst [vmem:[#allocation2 + $0x24] sm:$0xff] %v1403_v40  ;;  %1317 = vmatmul.bf16.gmra.mxu3 %v3578_v38  ;;  %v1083_v38 = vpop.f32.mrf.mxu2 }
 0x165   : > { %v1122_v26 = vpop.f32.mrf.mxu3 }
 0x166   : > { %v1172_v6 = vadd.f32 %v1171_v33, %v1122_v26  ;;  %1366 = vmatmul.bf16.gmra.mxu0 %v3580_v39  ;;  %v1084_v33 = vadd.f32 %v1083_v38, %v3854_v32 }
 0x167   : > { %v1173_v53 = vpop.f32.mrf.mxu0 }
 0x168   : > { %v1221_v14 = vadd.f32 %v1220_v21, %v1172_v6  ;;  %v1222_v31 = vpop.f32.mrf.mxu1 }
 0x16a   : > { %v1405_v5 = vpack.c.bf16 %v1221_v14, %v1074_v8 }
 0x16c   : > { %1437 = vst [vmem:[#allocation2 + $0x30] sm:$0xff] %v1405_v5  ;;  %v1085_v42 = vpop.f32.mrf.mxu2 }
 0x16d   : > { %v1124_v58 = vpop.f32.mrf.mxu3  ;;  %v1086_v6 = vadd.f32 %v1085_v42, %v1037_v29  ;;  %v4515_v42 = vld [vmem:[#allocation4_spill] sm:$0xff] }
 0x16e   : > { %v1174_v11 = vadd.f32 %v1173_v53, %v1124_v58 }
 0x16f   : > { %v1176_v44 = vpop.f32.mrf.mxu0 }
 0x170   : > { %v1223_v62 = vadd.f32 %v1222_v31, %v1174_v11  ;;  %v1225_v34 = vpop.f32.mrf.mxu1  ;;  %1273 = vmatmul.bf16.gmra.mxu2 %v3617_v48 }
 0x172   : > { %v1407_v37 = vpack.c.bf16 %v1223_v62, %v1076_v36 }
 0x174   : > { %1439 = vst [vmem:[#allocation2 + $0x3c] sm:$0xff] %v1407_v37  ;;  %1322 = vmatmul.bf16.gmra.mxu3 %v3619_v49  ;;  %v1088_v21 = vpop.f32.mrf.mxu2 }
 0x175   : > { %v1127_v3 = vpop.f32.mrf.mxu3  ;;  %v1089_v46 = vadd.f32 %v1088_v21, %v3867_v56 }
 0x176   : > { %v1177_v20 = vadd.f32 %v1176_v44, %v1127_v3  ;;  %1371 = vmatmul.bf16.gmra.mxu0 %v3621_v52 }
 0x177   : > { %v1178_v13 = vpop.f32.mrf.mxu0 }
 0x178   : > { %v1226_v50 = vadd.f32 %v1225_v34, %v1177_v20  ;;  %v1227_v55 = vpop.f32.mrf.mxu1 }
 0x17a   : > { %v1409_v7 = vpack.c.bf16 %v1226_v50, %v1079_v35 }
 0x17c   : > { %1441 = vst [vmem:[#allocation2 + $0x48] sm:$0xff] %v1409_v7 }
 0x17d   : > { %v1129_v39 = vpop.f32.mrf.mxu3 }
 0x17e   : > { %v1179_v18 = vadd.f32 %v1178_v13, %v1129_v39 }
 0x17f   : > { %v1181_v57 = vpop.f32.mrf.mxu0 }
 0x180   : > { %v1228_v15 = vadd.f32 %v1227_v55, %v1179_v18  ;;  %v1230_v45 = vpop.f32.mrf.mxu1  ;;  %1278 = vmatmul.bf16.gmra.mxu2 %v3653_v61 }
 0x182   : > { %v1411_v48 = vpack.c.bf16 %v1228_v15, %v1081_v10 }
 0x184   : > { %1443 = vst [vmem:[#allocation2 + $0x54] sm:$0xff] %v1411_v48  ;;  %1327 = vmatmul.bf16.gmra.mxu3 %v3658_v63  ;;  %v1090_v63 = vpop.f32.mrf.mxu2 }
 0x185   : > { %v1132_v16 = vpop.f32.mrf.mxu3 }
 0x186   : > { %v1182_v49 = vadd.f32 %v1181_v57, %v1132_v16  ;;  %1376 = vmatmul.bf16.gmra.mxu0 %v3660_v0  ;;  %v1042_v0 = vadd.f32 %v3871_v59, %v3873_v1 }
 0x187   : > { %v1183_v30 = vpop.f32.mrf.mxu0 }
 0x188   : > { %v1231_v9 = vadd.f32 %v1230_v45, %v1182_v49  ;;  %v1232_v47 = vpop.f32.mrf.mxu1  ;;  %v1091_v62 = vadd.f32 %v1090_v63, %v1042_v0 }
 0x18a   : > { %v1413_v52 = vpack.c.bf16 %v1231_v9, %v1084_v33 }
 0x18c   : > { %1445 = vst [vmem:[#allocation2 + $0x60] sm:$0xff] %v1413_v52  ;;  %v1093_v11 = vpop.f32.mrf.mxu2 }
 0x18d   : > { %v1134_v25 = vpop.f32.mrf.mxu3  ;;  %v1094_v59 = vadd.f32 %v1093_v11, %v3884_v12 }
 0x18e   : > { %v1184_v40 = vadd.f32 %v1183_v30, %v1134_v25  ;;  %v4516_v30 = vld [vmem:[#allocation3_spill] sm:$0xff] }
 0x18f   : > { %v1186_v26 = vpop.f32.mrf.mxu0 }
 0x190   : > { %v1233_v61 = vadd.f32 %v1232_v47, %v1184_v40  ;;  %v1235_v53 = vpop.f32.mrf.mxu1  ;;  %1283 = vmatmul.bf16.gmra.mxu2 %v3709_v51 }
 0x192   : > { %v1415_v8 = vpack.c.bf16 %v1233_v61, %v1086_v6 }
 0x194   : > { %1447 = vst [vmem:[#allocation2 + $0x6c] sm:$0xff] %v1415_v8  ;;  %1332 = vmatmul.bf16.gmra.mxu3 %v3713_v23  ;;  %v1095_v1 = vpop.f32.mrf.mxu2 }
 0x195   : > { %v1137_v32 = vpop.f32.mrf.mxu3 }
 0x196   : > { %v1187_v14 = vadd.f32 %v1186_v26, %v1137_v32  ;;  %1381 = vmatmul.bf16.gmra.mxu0 %v3715_v43  ;;  %v1047_v43 = vadd.f32 %v3888_v17, %v3897_v41 }
 0x197   : > { %v1188_v31 = vpop.f32.mrf.mxu0 }
 0x198   : > { %v1236_v60 = vadd.f32 %v1235_v53, %v1187_v14  ;;  %v1237_v5 = vpop.f32.mrf.mxu1  ;;  %v1096_v55 = vadd.f32 %v1095_v1, %v1047_v43 }
 0x19a   : > { %v1417_v19 = vpack.c.bf16 %v1236_v60, %v1089_v46 }
 0x19c   : > { %1449 = vst [vmem:[#allocation2 + $0x78] sm:$0xff] %v1417_v19 }
 0x19d   : > { %v1139_v58 = vpop.f32.mrf.mxu3 }
 0x19e   : > { %v1189_v44 = vadd.f32 %v1188_v31, %v1139_v58 }
 0x19f   : > { %v1191_v36 = vpop.f32.mrf.mxu0 }
 0x1a0   : > { %v1238_v51 = vadd.f32 %v1237_v5, %v1189_v44  ;;  %v1240_v34 = vpop.f32.mrf.mxu1  ;;  %1288 = vmatmul.bf16.gmra.mxu2 %v3769_v22  ;;  %v1098_v22 = vpop.f32.mrf.mxu2 }
 0x1a1   : > { %v1099_v17 = vadd.f32 %v1098_v22, %v3919_v4 }
 0x1a2   : > { %v1419_v37 = vpack.c.bf16 %v1238_v51, %v1091_v62  ;;  %v3038_v62 = vld [vmem:[#allocation2 + $0x68] sm:$0xf0]  ;;  %v3054_v51 = vld [vmem:[#allocation2 + $0x6c] sm:$0xf0] }
 0x1a3   : > { %v2875_v5 = vld [vmem:[#allocation2 + $0x78] sm:$0xf]  ;;  %v2939_v19 = vld [vmem:[#allocation2 + $0x7c] sm:$0xf] }
 0x1a4   : > { %1451 = vst [vmem:[#allocation2 + $0x84] sm:$0xff] %v1419_v37  ;;  %1337 = vmatmul.bf16.gmra.mxu3 %v3775_v27 }
 0x1a5   : > { %v1142_v23 = vpop.f32.mrf.mxu3 }
 0x1a6   : > { %v1192_v56 = vadd.f32 %v1191_v36, %v1142_v23  ;;  %1386 = vmatmul.bf16.gmra.mxu0 %v3777_v28  ;;  %v1052_v28 = vadd.f32 %v4515_v42, %v3934_v54  ;;  %v2871_v23 = vld [vmem:[#allocation2 + $0x60] sm:$0xf] }
 0x1a7   : > { %v1193_v38 = vpop.f32.mrf.mxu0  ;;  %v2872_v1 = vor.u32 %v3038_v62, %v2871_v23 }
 0x1a8   : > { %v1241_v3 = vadd.f32 %v1240_v34, %v1192_v56  ;;  %v1242_v13 = vpop.f32.mrf.mxu1  ;;  %v1100_v15 = vpop.f32.mrf.mxu2  ;;  %v2935_v56 = vld [vmem:[#allocation2 + $0x64] sm:$0xf] }
 0x1a9   : > { %v1101_v33 = vadd.f32 %v1100_v15, %v1052_v28  ;;  %v3035_v28 = vld [vmem:[#allocation2 + $0x20] sm:$0xf0]  ;;  %v3051_v15 = vld [vmem:[#allocation2 + $0x24] sm:$0xf0] }
 0x1aa   : > { %v1421_v20 = vpack.c.bf16 %v1241_v3, %v1094_v59  ;;  %v2936_v3 = vor.u32 %v3054_v51, %v2935_v56 }
 0x1ab   : > { %v3039_v32 = vld [vmem:[#allocation2 + $0x80] sm:$0xf0]  ;;  %v3055_v14 = vld [vmem:[#allocation2 + $0x84] sm:$0xf0] }
 0x1ac   : > { %1453 = vst [vmem:[#allocation2 + $0x90] sm:$0xff] %v1421_v20  ;;  %v2876_v58 = vor.u32 %v3039_v32, %v2875_v5  ;;  %v2940_v11 = vor.u32 %v3055_v14, %v2939_v19  ;;  %v3053_v20 = vld [vmem:[#allocation2 + $0x54] sm:$0xf0]  ;;  %v3042_v32 = vld [vmem:[%s3214_s26] sm:$0xff] }
 0x1ad   : > { %v1144_v35 = vpop.f32.mrf.mxu3 }
 0x1ae   : > { %v1194_v50 = vadd.f32 %v1193_v38, %v1144_v35  ;;  %v3037_v38 = vld [vmem:[#allocation2 + $0x50] sm:$0xf0]  ;;  %v2867_v35 = vld [vmem:[#allocation2 + $0x48] sm:$0xf] }
 0x1af   : > { %v1196_v27 = vpop.f32.mrf.mxu0 }
 0x1b0   : > { %v1243_v7 = vadd.f32 %v1242_v13, %v1194_v50  ;;  %v1245_v12 = vpop.f32.mrf.mxu1  ;;  %1293 = vmatmul.bf16.gmra.mxu2 %v3813_v2  ;;  %v2931_v50 = vld [vmem:[#allocation2 + $0x4c] sm:$0xf] }
 0x1b2   : > { %v1423_v39 = vpack.c.bf16 %v1243_v7, %v1096_v55  ;;  %v2868_v55 = vor.u32 %v3037_v38, %v2867_v35  ;;  %v2932_v7 = vor.u32 %v3053_v20, %v2931_v50 }
 0x1b3   : > { %v2879_v61 = vld [vmem:[#allocation2 + $0x90] sm:$0xf]  ;;  %v2943_v53 = vld [vmem:[#allocation2 + $0x94] sm:$0xf] }
 0x1b4   : > { %1455 = vst [vmem:[#allocation2 + $0x9c] sm:$0xff] %v1423_v39  ;;  %1342 = vmatmul.bf16.gmra.mxu3 %v3819_v24  ;;  %v3036_v39 = vld [vmem:[#allocation2 + $0x38] sm:$0xf0] }
 0x1b5   : > { %v1147_v18 = vpop.f32.mrf.mxu3 }
 0x1b6   : > { %v1197_v57 = vadd.f32 %v1196_v27, %v1147_v18  ;;  %1391 = vmatmul.bf16.gmra.mxu0 %v4516_v30  ;;  %v3052_v27 = vld [vmem:[#allocation2 + $0x3c] sm:$0xf0]  ;;  %v2927_v18 = vld [vmem:[#allocation2 + $0x34] sm:$0xf] }
 0x1b7   : > { %v1198_v45 = vpop.f32.mrf.mxu0 }
 0x1b8   : > { %v1246_v41 = vadd.f32 %v1245_v12, %v1197_v57  ;;  %v1247_v49 = vpop.f32.mrf.mxu1  ;;  %v2863_v12 = vld [vmem:[#allocation2 + $0x30] sm:$0xf] }
 0x1ba   : > { %v1425_v10 = vpack.c.bf16 %v1246_v41, %v1099_v17  ;;  %v2864_v17 = vor.u32 %v3036_v39, %v2863_v12  ;;  %v2928_v41 = vor.u32 %v3052_v27, %v2927_v18 }
 0x1bb   : > { %v3040_v26 = vld [vmem:[#allocation2 + $0x98] sm:$0xf0]  ;;  %v3056_v6 = vld [vmem:[#allocation2 + $0x9c] sm:$0xf0] }
 0x1bc   : > { %1457 = vst [vmem:[#allocation2 + $0xa8] sm:$0xff] %v1425_v10  ;;  %v2880_v8 = vor.u32 %v3040_v26, %v2879_v61  ;;  %v2944_v63 = vor.u32 %v3056_v6, %v2943_v53  ;;  %v2855_v26 = vld [vmem:[#allocation2] sm:$0xf]  ;;  %v2919_v6 = vld [vmem:[#allocation2 + $0x4] sm:$0xf] }
 0x1bd   : > { %v1149_v48 = vpop.f32.mrf.mxu3 }
 0x1be   : > { %v1199_v16 = vadd.f32 %v1198_v45, %v1149_v48 }
 0x1c0   : > { %v1248_v9 = vadd.f32 %v1247_v49, %v1199_v16 }
 0x1c2   : > { %v1427_v2 = vpack.c.bf16 %v1248_v9, %v1101_v33  ;;  %v2859_v33 = vld [vmem:[#allocation2 + $0x18] sm:$0xf]  ;;  %v2923_v9 = vld [vmem:[#allocation2 + $0x1c] sm:$0xf] }
 0x1c3   : > { %v1259_v24 = vpop.f32.mrf.mxu2  ;;  %v2883_v47 = vld [vmem:[#allocation2 + $0xa8] sm:$0xf]  ;;  %v2947_v52 = vld [vmem:[#allocation2 + $0xac] sm:$0xf]  ;;  %v1357_v40 = vpop.f32.mrf.mxu0 }
 0x1c4   : > { %1459 = vst [vmem:[#allocation2 + $0xb4] sm:$0xff] %v1427_v2 }
 0x1c7   : > { %v1308_v4 = vpop.f32.mrf.mxu3 }
 0x1c8   : > { %v1309_v46 = vadd.f32 %v1308_v4, %v1259_v24  ;;  %v2924_v4 = vor.u32 %v3051_v15, %v2923_v9  ;;  %v3028_v15 = vld [vmem:[%s3209_s23 + $0x10] sm:$0xff] }
 0x1ca   : > { %v1358_v44 = vadd.f32 %v1357_v40, %v1309_v46 }
 0x1cb   : > { %v3041_v21 = vld [vmem:[#allocation2 + $0xb0] sm:$0xf0]  ;;  %v3057_v29 = vld [vmem:[#allocation2 + $0xb4] sm:$0xf0]  ;;  %v1261_v31 = vpop.f32.mrf.mxu2  ;;  %v1359_v36 = vpop.f32.mrf.mxu0 }
 0x1cc   : > { %v2884_v25 = vor.u32 %v3041_v21, %v2883_v47  ;;  %v2948_v54 = vor.u32 %v3057_v29, %v2947_v52  ;;  %v1398_v37 = vpack.c.bf16 %v1358_v44, %v1358_v44  ;;  %v2860_v47 = vor.u32 %v3035_v28, %v2859_v33  ;;  %v3034_v29 = vld [vmem:[#allocation2 + $0x8] sm:$0xf0] }
 0x1cd   : > { %v2856_v53 = vor.u32 %v3034_v29, %v2855_v26 }
 0x1ce   : > { %1590 = vmatpush.bf16.msra.mxu1 %v2884_v25  ;;  %1767 = vmatpush.bf16.msra.mxu2 %v2948_v54  ;;  %1430 = vst [vmem:[#allocation2 + $0x8] sm:$0xf] %v1398_v37  ;;  %v3050_v25 = vld [vmem:[#allocation2 + $0xc] sm:$0xf0] }
 0x1cf   : > { %v1310_v60 = vpop.f32.mrf.mxu3 }
 0x1d0   : > { %v1311_v0 = vadd.f32 %v1310_v60, %v1261_v31 }
 0x1d2   : > { %1591 = vmatpush.bf16.msra.mxu1 %v2880_v8  ;;  %1768 = vmatpush.bf16.msra.mxu2 %v2944_v63  ;;  %v1360_v34 = vadd.f32 %v1359_v36, %v1311_v0  ;;  %v2920_v8 = vor.u32 %v3050_v25, %v2919_v6  ;;  %v3026_v63 = vld [vmem:[%s3209_s23] sm:$0xff] }
 0x1d3   : > { %v1264_v13 = vpop.f32.mrf.mxu2  ;;  %v1362_v22 = vpop.f32.mrf.mxu0 }
 0x1d4   : > { %v1400_v59 = vpack.c.bf16 %v1360_v34, %v1360_v34 }
 0x1d5   : > { %v1821_v57 = vld [vmem:[#allocation2 + $0x8] sm:$0xf] }
 0x1d6   : > { %1592 = vmatpush.bf16.msra.mxu1 %v2876_v58  ;;  %1769 = vmatpush.bf16.msra.mxu2 %v2940_v11  ;;  %1432 = vst [vmem:[#allocation2 + $0x14] sm:$0xf] %v1400_v59  ;;  %v3997_v42 = vunpack.c.l.bf16 %v1821_v57 }
 0x1d7   : > { %v1313_v43 = vpop.f32.mrf.mxu3 }
 0x1d8   : > { %v1314_v16 = vadd.f32 %v1313_v43, %v1264_v13  ;;  %v1965_v30 = vmul.f32 %v3997_v42, %v3997_v42 }
 0x1da   : > { %1593 = vmatpush.bf16.msra.mxu1 %v2872_v1  ;;  %1770 = vmatpush.bf16.msra.mxu2 %v2936_v3  ;;  %v1363_v21 = vadd.f32 %v1362_v22, %v1314_v16  ;;  %v3027_v1 = vld [vmem:[%s3209_s23 + $0x8] sm:$0xff] }
 0x1db   : > { %v1266_v45 = vpop.f32.mrf.mxu2  ;;  %v1364_v52 = vpop.f32.mrf.mxu0  ;;  %1981 = vadd.xlane.f32.xlu2 %v1965_v30  ;;  %v3043_v3 = vld [vmem:[%s3214_s26 + $0x8] sm:$0xff] }
 0x1dc   : > { %v1402_v40 = vpack.c.bf16 %v1363_v21, %v1363_v21 }
 0x1dd   : > { %v1822_v10 = vld [vmem:[#allocation2 + $0x14] sm:$0xf] }
 0x1de   : > { %1594 = vmatpush.bf16.msra.mxu1 %v2868_v55  ;;  %1771 = vmatpush.bf16.msra.mxu2 %v2932_v7  ;;  %v3999_v48 = vunpack.c.l.bf16 %v1822_v10  ;;  %1434 = vst [vmem:[#allocation2 + $0x20] sm:$0xf] %v1402_v40 }
 0x1df   : > { %v1315_v49 = vpop.f32.mrf.mxu3 }
 0x1e0   : > { %v1316_v2 = vadd.f32 %v1315_v49, %v1266_v45  ;;  %v1966_v24 = vmul.f32 %v3999_v48, %v3999_v48  ;;  %v3044_v45 = vld [vmem:[%s3214_s26 + $0x10] sm:$0xff] }
 0x1e2   : > { %1595 = vmatpush.bf16.msra.mxu1 %v2864_v17  ;;  %1772 = vmatpush.bf16.msra.mxu2 %v2928_v41  ;;  %v1365_v54 = vadd.f32 %v1364_v52, %v1316_v2 }
 0x1e3   : > { %1983 = vadd.xlane.f32.xlu0 %v1966_v24  ;;  %v1269_v14 = vpop.f32.mrf.mxu2  ;;  %v1367_v46 = vpop.f32.mrf.mxu0 }
 0x1e4   : > { %v1404_v61 = vpack.c.bf16 %v1365_v54, %v1365_v54 }
 0x1e5   : > { %v1823_v60 = vld [vmem:[#allocation2 + $0x20] sm:$0xf] }
 0x1e6   : > { %1596 = vmatpush.bf16.msra.mxu1 %v2860_v47  ;;  %1773 = vmatpush.bf16.msra.mxu2 %v2924_v4  ;;  %1436 = vst [vmem:[#allocation2 + $0x2c] sm:$0xf] %v1404_v61  ;;  %v4007_v5 = vunpack.c.l.bf16 %v1823_v60 }
 0x1e7   : > { %v1318_v31 = vpop.f32.mrf.mxu3 }
 0x1e8   : > { %v1319_v11 = vadd.f32 %v1318_v31, %v1269_v14  ;;  %v1967_v36 = vmul.f32 %v4007_v5, %v4007_v5 }
 0x1ea   : > { %1597 = vmatpush.bf16.msra.mxu1 %v2856_v53  ;;  %1774 = vmatpush.bf16.msra.mxu2 %v2920_v8  ;;  %v1368_v34 = vadd.f32 %v1367_v46, %v1319_v11  ;;  %v3045_v53 = vld [vmem:[%s3214_s26 + $0x18] sm:$0xff] }
 0x1eb   : > { %v1271_v0 = vpop.f32.mrf.mxu2  ;;  %v1369_v37 = vpop.f32.mrf.mxu0  ;;  %1985 = vadd.xlane.f32.xlu1 %v1967_v36  ;;  %v3029_v8 = vld [vmem:[%s3209_s23 + $0x18] sm:$0xff] }
 0x1ec   : > { %v1406_v56 = vpack.c.bf16 %v1368_v34, %v1368_v34 }
 0x1ed   : > { %1598 = vmatmul.bf16.vlgmr.msra.gmra.mxu1 %v3026_v63  ;;  %1775 = vmatmul.bf16.vlgmr.msra.gmra.mxu2 %v3042_v32  ;;  %v1824_v19 = vld [vmem:[#allocation2 + $0x2c] sm:$0xf] }
 0x1ee   : > { %v4009_v58 = vunpack.c.l.bf16 %v1824_v19  ;;  %1438 = vst [vmem:[#allocation2 + $0x38] sm:$0xf] %v1406_v56 }
 0x1ef   : > { %v1320_v44 = vpop.f32.mrf.mxu3 }
 0x1f0   : > { %v1321_v62 = vadd.f32 %v1320_v44, %v1271_v0  ;;  %v1968_v51 = vmul.f32 %v4009_v58, %v4009_v58 }
 0x1f2   : > { %v1370_v23 = vadd.f32 %v1369_v37, %v1321_v62  ;;  %1987 = vadd.xlane.f32.xlu2 %v1968_v51 }
 0x1f3   : > { %v1274_v38 = vpop.f32.mrf.mxu2  ;;  %v1372_v13 = vpop.f32.mrf.mxu0 }
 0x1f4   : > { %v1408_v59 = vpack.c.bf16 %v1370_v23, %v1370_v23 }
 0x1f5   : > { %v1825_v43 = vld [vmem:[#allocation2 + $0x38] sm:$0xf] }
 0x1f6   : > { %1440 = vst [vmem:[#allocation2 + $0x44] sm:$0xf] %v1408_v59  ;;  %v4017_v50 = vunpack.c.l.bf16 %v1825_v43 }
 0x1f7   : > { %v1323_v20 = vpop.f32.mrf.mxu3 }
 0x1f8   : > { %v1324_v22 = vadd.f32 %v1323_v20, %v1274_v38  ;;  %v1969_v27 = vmul.f32 %v4017_v50, %v4017_v50 }
 0x1fa   : > { %v1373_v57 = vadd.f32 %v1372_v13, %v1324_v22  ;;  %1989 = vadd.xlane.f32.xlu0 %v1969_v27 }
 0x1fb   : > { %v1276_v55 = vpop.f32.mrf.mxu2  ;;  %v1374_v17 = vpop.f32.mrf.mxu0 }
 0x1fc   : > { %v1410_v10 = vpack.c.bf16 %v1373_v57, %v1373_v57 }
 0x1fd   : > { %1603 = vmatmul.bf16.gmra.mxu1 %v3027_v1  ;;  %1780 = vmatmul.bf16.gmra.mxu2 %v3043_v3  ;;  %v1826_v35 = vld [vmem:[#allocation2 + $0x44] sm:$0xf] }
 0x1fe   : > { %v4019_v7 = vunpack.c.l.bf16 %v1826_v35  ;;  %1442 = vst [vmem:[#allocation2 + $0x50] sm:$0xf] %v1410_v10  ;;  %v3046_v1 = vld [vmem:[%s3214_s26 + $0x20] sm:$0xff] }
 0x1ff   : > { %v1325_v39 = vpop.f32.mrf.mxu3  ;;  %v3030_v3 = vld [vmem:[%s3209_s23 + $0x20] sm:$0xff] }
 0x200   : > { %v1326_v12 = vadd.f32 %v1325_v39, %v1276_v55  ;;  %v1970_v18 = vmul.f32 %v4019_v7, %v4019_v7 }
 0x202   : > { %v1375_v41 = vadd.f32 %v1374_v17, %v1326_v12  ;;  %1991 = vadd.xlane.f32.xlu1 %v1970_v18 }
 0x203   : > { %v1279_v16 = vpop.f32.mrf.mxu2  ;;  %v1377_v30 = vpop.f32.mrf.mxu0 }
 0x204   : > { %v1412_v28 = vpack.c.bf16 %v1375_v41, %v1375_v41 }
 0x205   : > { %v1827_v33 = vld [vmem:[#allocation2 + $0x50] sm:$0xf] }
 0x206   : > { %1444 = vst [vmem:[#allocation2 + $0x5c] sm:$0xf] %v1412_v28  ;;  %v4027_v2 = vunpack.c.l.bf16 %v1827_v33 }
 0x207   : > { %v1328_v49 = vpop.f32.mrf.mxu3 }
 0x208   : > { %v1329_v4 = vadd.f32 %v1328_v49, %v1279_v16  ;;  %v1971_v52 = vmul.f32 %v4027_v2, %v4027_v2  ;;  %v3047_v16 = vld [vmem:[%s3214_s26 + $0x28] sm:$0xff] }
 0x209   : > { %v3031_v49 = vld [vmem:[%s3209_s23 + $0x28] sm:$0xff] }
 0x20a   : > { %v1378_v54 = vadd.f32 %v1377_v30, %v1329_v4  ;;  %1993 = vadd.xlane.f32.xlu2 %v1971_v52 }
 0x20b   : > { %v1281_v24 = vpop.f32.mrf.mxu2  ;;  %v1379_v40 = vpop.f32.mrf.mxu0 }
 0x20c   : > { %v1414_v6 = vpack.c.bf16 %v1378_v54, %v1378_v54 }
 0x20d   : > { %1608 = vmatmul.bf16.gmra.mxu1 %v3028_v15  ;;  %1785 = vmatmul.bf16.gmra.mxu2 %v3044_v45  ;;  %v1828_v9 = vld [vmem:[#allocation2 + $0x5c] sm:$0xf] }
 0x20e   : > { %v4029_v47 = vunpack.c.l.bf16 %v1828_v9  ;;  %1446 = vst [vmem:[#allocation2 + $0x68] sm:$0xf] %v1414_v6 }
 0x20f   : > { %v1330_v21 = vpop.f32.mrf.mxu3 }
 0x210   : > { %v1331_v29 = vadd.f32 %v1330_v21, %v1281_v24  ;;  %v1972_v25 = vmul.f32 %v4029_v47, %v4029_v47 }
 0x212   : > { %v1380_v26 = vadd.f32 %v1379_v40, %v1331_v29  ;;  %1995 = vadd.xlane.f32.xlu0 %v1972_v25 }
 0x213   : > { %v1284_v63 = vpop.f32.mrf.mxu2  ;;  %v1382_v14 = vpop.f32.mrf.mxu0 }
 0x214   : > { %v1416_v61 = vpack.c.bf16 %v1380_v26, %v1380_v26 }
 0x215   : > { %v1829_v31 = vld [vmem:[#allocation2 + $0x68] sm:$0xf] }
 0x216   : > { %1448 = vst [vmem:[#allocation2 + $0x74] sm:$0xf] %v1416_v61  ;;  %v4037_v46 = vunpack.c.l.bf16 %v1829_v31 }
 0x217   : > { %v1333_v32 = vpop.f32.mrf.mxu3 }
 0x218   : > { %v1334_v11 = vadd.f32 %v1333_v32, %v1284_v63  ;;  %v1973_v36 = vmul.f32 %v4037_v46, %v4037_v46  ;;  %v3032_v63 = vld [vmem:[%s3209_s23 + $0x30] sm:$0xff]  ;;  %v3049_v32 = vld [vmem:[%s3214_s26 + $0x38] sm:$0xff] }
 0x21a   : > { %v1383_v34 = vadd.f32 %v1382_v14, %v1334_v11  ;;  %1997 = vadd.xlane.f32.xlu1 %v1973_v36  ;;  %v3033_v14 = vld [vmem:[%s3209_s23 + $0x38] sm:$0xff] }
 0x21b   : > { %v1286_v19 = vpop.f32.mrf.mxu2  ;;  %v1384_v37 = vpop.f32.mrf.mxu0 }
 0x21c   : > { %v1418_v56 = vpack.c.bf16 %v1383_v34, %v1383_v34 }
 0x21d   : > { %1790 = vmatmul.bf16.gmra.mxu2 %v3045_v53  ;;  %1613 = vmatmul.bf16.gmra.mxu1 %v3029_v8  ;;  %v1830_v60 = vld [vmem:[#allocation2 + $0x74] sm:$0xf] }
 0x21e   : > { %v4039_v0 = vunpack.c.l.bf16 %v1830_v60  ;;  %1450 = vst [vmem:[#allocation2 + $0x80] sm:$0xf] %v1418_v56  ;;  %v3048_v8 = vld [vmem:[%s3214_s26 + $0x30] sm:$0xff] }
 0x21f   : > { %v1335_v44 = vpop.f32.mrf.mxu3 }
 0x220   : > { %v1336_v62 = vadd.f32 %v1335_v44, %v1286_v19  ;;  %v1974_v51 = vmul.f32 %v4039_v0, %v4039_v0 }
 0x222   : > { %v1385_v23 = vadd.f32 %v1384_v37, %v1336_v62  ;;  %1999 = vadd.xlane.f32.xlu2 %v1974_v51 }
 0x223   : > { %v1289_v38 = vpop.f32.mrf.mxu2  ;;  %v1387_v13 = vpop.f32.mrf.mxu0 }
 0x224   : > { %v1420_v59 = vpack.c.bf16 %v1385_v23, %v1385_v23 }
 0x225   : > { %v1831_v43 = vld [vmem:[#allocation2 + $0x80] sm:$0xf] }
 0x226   : > { %1452 = vst [vmem:[#allocation2 + $0x8c] sm:$0xf] %v1420_v59  ;;  %v4047_v55 = vunpack.c.l.bf16 %v1831_v43 }
 0x227   : > { %v1338_v20 = vpop.f32.mrf.mxu3 }
 0x228   : > { %v1339_v27 = vadd.f32 %v1338_v20, %v1289_v38  ;;  %v1975_v12 = vmul.f32 %v4047_v55, %v4047_v55 }
 0x22a   : > { %v1388_v41 = vadd.f32 %v1387_v13, %v1339_v27  ;;  %2001 = vadd.xlane.f32.xlu0 %v1975_v12 }
 0x22b   : > { %v1291_v22 = vpop.f32.mrf.mxu2  ;;  %v1389_v10 = vpop.f32.mrf.mxu0 }
 0x22c   : > { %v1422_v15 = vpack.c.bf16 %v1388_v41, %v1388_v41 }
 0x22d   : > { %1795 = vmatmul.bf16.gmra.mxu2 %v3046_v1  ;;  %1618 = vmatmul.bf16.gmra.mxu1 %v3030_v3  ;;  %v1832_v35 = vld [vmem:[#allocation2 + $0x8c] sm:$0xf] }
 0x22e   : > { %v4049_v39 = vunpack.c.l.bf16 %v1832_v35  ;;  %1454 = vst [vmem:[#allocation2 + $0x98] sm:$0xf] %v1422_v15 }
 0x22f   : > { %v1340_v18 = vpop.f32.mrf.mxu3 }
 0x230   : > { %4517 = vst [vmem:[#allocation4_spill] sm:$0xff] %v4049_v39  ;;  %v1976_v57 = vmul.f32 %v4049_v39, %v4049_v39  ;;  %v1341_v17 = vadd.f32 %v1340_v18, %v1291_v22 }
 0x232   : > { %2003 = vadd.xlane.f32.xlu1 %v1976_v57  ;;  %v1390_v28 = vadd.f32 %v1389_v10, %v1341_v17 }
 0x233   : > { %v1294_v30 = vpop.f32.mrf.mxu2  ;;  %v1392_v9 = vpop.f32.mrf.mxu0 }
 0x234   : > { %v1424_v45 = vpack.c.bf16 %v1390_v28, %v1390_v28 }
 0x235   : > { %v1833_v24 = vld [vmem:[#allocation2 + $0x98] sm:$0xf] }
 0x236   : > { %1456 = vst [vmem:[#allocation2 + $0xa4] sm:$0xf] %v1424_v45  ;;  %v4057_v4 = vunpack.c.l.bf16 %v1833_v24 }
 0x237   : > { %v1343_v33 = vpop.f32.mrf.mxu3 }
 0x238   : > { %4518 = vst [vmem:[#allocation3_spill] sm:$0xff] %v4057_v4  ;;  %v1977_v52 = vmul.f32 %v4057_v4, %v4057_v4  ;;  %v1344_v29 = vadd.f32 %v1343_v33, %v1294_v30 }
 0x23a   : > { %2005 = vadd.xlane.f32.xlu2 %v1977_v52  ;;  %v1393_v40 = vadd.f32 %v1392_v9, %v1344_v29 }
 0x23b   : > { %v1296_v21 = vpop.f32.mrf.mxu2  ;;  %v1394_v26 = vpop.f32.mrf.mxu0 }
 0x23c   : > { %v1426_v61 = vpack.c.bf16 %v1393_v40, %v1393_v40 }
 0x23d   : > { %1800 = vmatmul.bf16.gmra.mxu2 %v3047_v16  ;;  %1623 = vmatmul.bf16.gmra.mxu1 %v3031_v49  ;;  %v1834_v4 = vld [vmem:[#allocation2 + $0xa4] sm:$0xf] }
 0x23e   : > { %1458 = vst [vmem:[#allocation2 + $0xb0] sm:$0xf] %v1426_v61 }
 0x23f   : > { %v1345_v25 = vpop.f32.mrf.mxu3 }
 0x240   : > { %v1346_v54 = vadd.f32 %v1345_v25, %v1296_v21 }
 0x242   : > { %v1395_v6 = vadd.f32 %v1394_v26, %v1346_v54 }
 0x244   : > { %v1428_v53 = vpack.c.bf16 %v1395_v6, %v1395_v6 }
 0x246   : > { %1460 = vst [vmem:[#allocation2 + $0xbc] sm:$0xf] %v1428_v53 }
 0x24d   : > { %1805 = vmatmul.bf16.gmra.mxu2 %v3048_v8  ;;  %1628 = vmatmul.bf16.gmra.mxu1 %v3032_v63 }
 0x24e   : > { %v1982_v8 = vpop.xlane.xlu2 %1981 }
 0x256   : > { %v1984_v61 = vpop.xlane.xlu0 %1983 }
 0x25d   : > { %1810 = vmatmul.bf16.gmra.mxu2 %v3049_v32  ;;  %1633 = vmatmul.bf16.gmra.mxu1 %v3033_v14 }
 0x25e   : > { %v4155_v53 = vpop.xlane.xlu1 %1985 }
 0x26a   : > { %v4065_v31 = vpop.f32.mrf.mxu1 }
 0x26b   : > { %v1853_v60 = vmul.f32 %v4065_v31, %v4065_v31 }
 0x26d   : > { %1869 = vadd.xlane.f32.xlu0 %v1853_v60 }
 0x270   : > { %v4069_v19 = vpop.f32.mrf.mxu2 }
 0x271   : > { %v1901_v11 = vmul.f32 %v4069_v19, %v4069_v19 }
 0x272   : > { %v4073_v44 = vpop.f32.mrf.mxu1 }
 0x273   : > { %1917 = vadd.xlane.f32.xlu1 %v1901_v11  ;;  %v1854_v36 = vmul.f32 %v4073_v44, %v4073_v44  ;;  %v4165_v11 = vpop.xlane.xlu0 %1989 }
 0x275   : > { %1871 = vadd.xlane.f32.xlu0 %v1854_v36  ;;  %v4167_v36 = vpop.xlane.xlu1 %1991 }
 0x278   : > { %v4077_v62 = vpop.f32.mrf.mxu2 }
 0x279   : > { %v1902_v51 = vmul.f32 %v4077_v62, %v4077_v62 }
 0x27a   : > { %v4081_v34 = vpop.f32.mrf.mxu1 }
 0x27b   : > { %1919 = vadd.xlane.f32.xlu2 %v1902_v51  ;;  %v1855_v37 = vmul.f32 %v4081_v34, %v4081_v34  ;;  %v4169_v51 = vpop.xlane.xlu2 %1987 }
 0x27d   : > { %1873 = vadd.xlane.f32.xlu1 %v1855_v37 }
 0x280   : > { %v4085_v23 = vpop.f32.mrf.mxu2 }
 0x281   : > { %v1903_v56 = vmul.f32 %v4085_v23, %v4085_v23 }
 0x282   : > { %v4089_v59 = vpop.f32.mrf.mxu1 }
 0x283   : > { %1921 = vadd.xlane.f32.xlu0 %v1903_v56  ;;  %v1856_v1 = vmul.f32 %v4089_v59, %v4089_v59 }
 0x285   : > { %1875 = vadd.xlane.f32.xlu1 %v1856_v1 }
 0x288   : > { %v4093_v3 = vpop.f32.mrf.mxu2 }
 0x289   : > { %v1904_v20 = vmul.f32 %v4093_v3, %v4093_v3 }
 0x28a   : > { %v4095_v38 = vpop.f32.mrf.mxu1 }
 0x28b   : > { %v1857_v13 = vmul.f32 %v4095_v38, %v4095_v38 }
 0x28d   : > { %1923 = vadd.xlane.f32.xlu1 %v1904_v20  ;;  %1877 = vadd.xlane.f32.xlu2 %v1857_v13  ;;  %v4179_v13 = vpop.xlane.xlu0 %1995 }
 0x290   : > { %v4101_v43 = vpop.f32.mrf.mxu2 }
 0x291   : > { %v1905_v22 = vmul.f32 %v4101_v43, %v4101_v43 }
 0x292   : > { %v4103_v35 = vpop.f32.mrf.mxu1 }
 0x293   : > { %v1858_v57 = vmul.f32 %v4103_v35, %v4103_v35 }
 0x295   : > { %1925 = vadd.xlane.f32.xlu2 %v1905_v22  ;;  %v4181_v22 = vpop.xlane.xlu1 %1997 }
 0x298   : > { %v4107_v27 = vpop.f32.mrf.mxu2 }
 0x299   : > { %v1906_v12 = vmul.f32 %v4107_v27, %v4107_v27 }
 0x29a   : > { %v4111_v18 = vpop.f32.mrf.mxu1 }
 0x29b   : > { %1927 = vadd.xlane.f32.xlu0 %v1906_v12  ;;  %v1859_v17 = vmul.f32 %v4111_v18, %v4111_v18  ;;  %v4183_v12 = vpop.xlane.xlu2 %1993 }
 0x29d   : > { %1879 = vadd.xlane.f32.xlu2 %v1858_v57 }
 0x2a0   : > { %v4117_v41 = vpop.f32.mrf.mxu2 }
 0x2a1   : > { %v1907_v10 = vmul.f32 %v4117_v41, %v4117_v41 }
 0x2a2   : > { %v4121_v28 = vpop.f32.mrf.mxu1 }
 0x2a3   : > { %1929 = vadd.xlane.f32.xlu1 %v1907_v10  ;;  %1881 = vadd.xlane.f32.xlu0 %v1859_v17  ;;  %v1860_v16 = vmul.f32 %v4121_v28, %v4121_v28 }
 0x2a8   : > { %v4123_v15 = vpop.f32.mrf.mxu2 }
 0x2a9   : > { %v1908_v45 = vmul.f32 %v4123_v15, %v4123_v15 }
 0x2aa   : > { %v4129_v49 = vpop.f32.mrf.mxu1 }
 0x2ab   : > { %1931 = vadd.xlane.f32.xlu2 %v1908_v45  ;;  %1883 = vadd.xlane.f32.xlu1 %v1860_v16  ;;  %v1861_v30 = vmul.f32 %v4129_v49, %v4129_v49  ;;  %v4191_v45 = vpop.xlane.xlu0 %2001 }
 0x2b0   : > { %v4133_v33 = vpop.f32.mrf.mxu2 }
 0x2b1   : > { %v1909_v9 = vmul.f32 %v4133_v33, %v4133_v33 }
 0x2b2   : > { %v4137_v24 = vpop.f32.mrf.mxu1 }
 0x2b3   : > { %1933 = vadd.xlane.f32.xlu0 %v1909_v9  ;;  %1885 = vadd.xlane.f32.xlu2 %v1861_v30  ;;  %v1862_v29 = vmul.f32 %v4137_v24, %v4137_v24  ;;  %v4195_v30 = vpop.xlane.xlu1 %2003  ;;  %v4197_v9 = vpop.xlane.xlu2 %1999 }
 0x2b8   : > { %v4139_v21 = vpop.f32.mrf.mxu2 }
 0x2b9   : > { %v1910_v52 = vmul.f32 %v4139_v21, %v4139_v21 }
 0x2ba   : > { %v4145_v25 = vpop.f32.mrf.mxu1 }
 0x2bb   : > { %1935 = vadd.xlane.f32.xlu1 %v1910_v52  ;;  %1887 = vadd.xlane.f32.xlu0 %v1862_v29  ;;  %v1863_v54 = vmul.f32 %v4145_v25, %v4145_v25 }
 0x2c0   : > { %v4149_v40 = vpop.f32.mrf.mxu2 }
 0x2c1   : > { %v1911_v26 = vmul.f32 %v4149_v40, %v4149_v40 }
 0x2c2   : > { %v4153_v6 = vpop.f32.mrf.mxu1 }
 0x2c3   : > { %1937 = vadd.xlane.f32.xlu2 %v1911_v26  ;;  %1889 = vadd.xlane.f32.xlu1 %v1863_v54  ;;  %v1864_v14 = vmul.f32 %v4153_v6, %v4153_v6  ;;  %v1836_v26 = vld [vmem:[#allocation2 + $0xbc] sm:$0xf] }
 0x2c8   : > { %v4157_v63 = vpop.f32.mrf.mxu2 }
 0x2c9   : > { %4519 = vst [vmem:[#allocation5_spill] sm:$0xff] %v4157_v63  ;;  %v1912_v32 = vmul.f32 %v4157_v63, %v4157_v63 }
 0x2ca   : > { %v4163_v60 = vpop.f32.mrf.mxu1 }
 0x2cb   : > { %4520 = vst [vmem:[#allocation6_spill] sm:$0xff] %v4163_v60  ;;  %1939 = vadd.xlane.f32.xlu0 %v1912_v32  ;;  %1891 = vadd.xlane.f32.xlu2 %v1864_v14  ;;  %v1865_v37 = vmul.f32 %v4163_v60, %v4163_v60  ;;  %v4205_v14 = vunpack.c.l.bf16 %v1836_v26 }
 0x2cd   : > { %4526 = vst [vmem:[#allocation12_spill] sm:$0xff] %v4205_v14 }
 0x2d0   : > { %v4173_v56 = vpop.f32.mrf.mxu2 }
 0x2d1   : > { %4521 = vst [vmem:[#allocation7_spill] sm:$0xff] %v4173_v56  ;;  %v1913_v1 = vmul.f32 %v4173_v56, %v4173_v56 }
 0x2d2   : > { %v4177_v20 = vpop.f32.mrf.mxu1 }
 0x2d3   : > { %1941 = vadd.xlane.f32.xlu1 %v1913_v1  ;;  %1893 = vadd.xlane.f32.xlu0 %v1865_v37  ;;  %4522 = vst [vmem:[#allocation8_spill] sm:$0xff] %v4177_v20  ;;  %v1866_v10 = vmul.f32 %v4177_v20, %v4177_v20  ;;  %v4207_v37 = vpop.xlane.xlu2 %2005 }
 0x2d8   : > { %v4185_v57 = vpop.f32.mrf.mxu2 }
 0x2d9   : > { %4523 = vst [vmem:[#allocation9_spill] sm:$0xff] %v4185_v57  ;;  %v1914_v17 = vmul.f32 %v4185_v57, %v4185_v57 }
 0x2da   : > { %v4193_v16 = vpop.f32.mrf.mxu1 }
 0x2db   : > { %1943 = vadd.xlane.f32.xlu2 %v1914_v17  ;;  %1895 = vadd.xlane.f32.xlu1 %v1866_v10  ;;  %4524 = vst [vmem:[#allocation10_spill] sm:$0xff] %v4193_v16  ;;  %v1867_v52 = vmul.f32 %v4193_v16, %v4193_v16 }
 0x2e0   : > { %v4201_v29 = vpop.f32.mrf.mxu2  ;;  %v1870_v32 = vpop.xlane.xlu0 %1869 }
 0x2e1   : > { %4525 = vst [vmem:[#allocation11_spill] sm:$0xff] %v4201_v29  ;;  %v1915_v54 = vmul.f32 %v4201_v29, %v4201_v29  ;;  %v1980_v29 = vmul.f32 %v4205_v14, %v4205_v14 }
 0x2e2   : > { %v4209_v10 = vpop.f32.mrf.mxu1 }
 0x2e3   : > { %1945 = vadd.xlane.f32.xlu0 %v1915_v54  ;;  %1897 = vadd.xlane.f32.xlu2 %v1867_v52  ;;  %4527 = vst [vmem:[#allocation13_spill] sm:$0xff] %v4209_v10  ;;  %v1868_v52 = vmul.f32 %v4209_v10, %v4209_v10  ;;  %v1835_v54 = vld [vmem:[#allocation2 + $0xb0] sm:$0xf] }
 0x2e6   : > { %v1918_v1 = vpop.xlane.xlu1 %1917 }
 0x2e7   : > { %v1949_v17 = vadd.f32 %v1918_v1, %v1870_v32  ;;  %v4219_v32 = vunpack.c.l.bf16 %v1835_v54 }
 0x2e8   : > { %v4211_v57 = vpop.f32.mrf.mxu2 }
 0x2e9   : > { %4528 = vst [vmem:[#allocation14_spill] sm:$0xff] %v4211_v57  ;;  %v2013_v20 = vadd.f32 %v1982_v8, %v1949_v17  ;;  %v1916_v16 = vmul.f32 %v4211_v57, %v4211_v57  ;;  %v1872_v8 = vpop.xlane.xlu0 %1871  ;;  %v4221_v17 = vunpack.c.l.bf16 %v1834_v4  ;;  %v1979_v14 = vmul.f32 %v4219_v32, %v4219_v32 }
 0x2ea   : > { %4529 = vst [vmem:[#allocation15_spill] sm:$0xff] %v4219_v32 }
 0x2eb   : > { %v2029_v26 = vmax.f32 %v2013_v20, 1e-24  ;;  %1947 = vadd.xlane.f32.xlu1 %v1916_v16  ;;  %2011 = vadd.xlane.f32.xlu2 %v1980_v29  ;;  %4530 = vst [vmem:[#allocation16_spill] sm:$0xff] %v4221_v17  ;;  %v1978_v20 = vmul.f32 %v4221_v17, %v4221_v17 }
 0x2ec   : > { %1899 = vadd.xlane.f32.xlu0 %v1868_v52 }
 0x2ed   : > { %3107 = vrsqrt.f32 %v2029_v26  ;;  %vm2051_vm1 = vweird.f32 %v2029_v26 }
 0x2ee   : > { %v1920_v1 = vpop.xlane.xlu2 %1919 }
 0x2ef   : > { %v1950_v57 = vadd.f32 %v1920_v1, %v1872_v8 }
 0x2f0   : > { %v1874_v56 = vpop.xlane.xlu1 %1873 }
 0x2f1   : > { %v2014_v60 = vadd.f32 %v1984_v61, %v1950_v57 }
 0x2f3   : > { %v3108_v16 = vpop.eup %3107  ;;  %v2030_v29 = vmax.f32 %v2014_v60, 1e-24  ;;  %2009 = vadd.xlane.f32.xlu1 %v1979_v14 }
 0x2f4   : > { %v2046_v52 = vmul.f32 %v3108_v16, %v2029_v26  ;;  %2007 = vadd.xlane.f32.xlu0 %v1978_v20  ;;  %vm2052_vm0 = vweird.f32 %v3108_v16 }
 0x2f5   : > { %3109 = vrsqrt.f32 %v2030_v29  ;;  %vm2053_vm2 = vmor %vm2051_vm1, %vm2052_vm0  ;;  %vm2061_vm7 = vweird.f32 %v2030_v29 }
 0x2f6   : > { %v2047_v54 = vmul.f32 %v3108_v16, %v2046_v52  ;;  %v1922_v10 = vpop.xlane.xlu0 %1921 }
 0x2f7   : > { %v1951_v39 = vadd.f32 %v1922_v10, %v1874_v56 }
 0x2f8   : > { %v2048_v4 = vmul.f32 0.5, %v2047_v54  ;;  %v1876_v63 = vpop.xlane.xlu1 %1875 }
 0x2f9   : > { %v2015_v1 = vadd.f32 %v4155_v53, %v1951_v39 }
 0x2fa   : > { %v2049_v61 = vsub.f32 1.5, %v2048_v4 }
 0x2fb   : > { %v3110_v57 = vpop.eup %3109  ;;  %v2031_v8 = vmax.f32 %v2015_v1, 1e-24 }
 0x2fc   : > { %v2050_v32 = vmul.f32 %v3108_v16, %v2049_v61  ;;  %v2056_v17 = vmul.f32 %v3110_v57, %v2030_v29  ;;  %vm2062_vm3 = vweird.f32 %v3110_v57 }
 0x2fd   : > { %3111 = vrsqrt.f32 %v2031_v8  ;;  %vm2063_vm8 = vmor %vm2061_vm7, %vm2062_vm3  ;;  %vm2071_vm13 = vweird.f32 %v2031_v8 }
 0x2fe   : > { %v2054_v60 = vsel %vm2053_vm2, %v3108_v16, %v2050_v32  ;;  %v2057_v14 = vmul.f32 %v3110_v57, %v2056_v17 }
 0x2ff   : > { %v2205_v20 = vmul.f32 %v2054_v60, %v4065_v31  ;;  %v2287_v52 = vmul.f32 %v2054_v60, %v4069_v19  ;;  %v2367_v56 = vmul.f32 %v2054_v60, %v3997_v42 }
 0x300   : > { %v2058_v10 = vmul.f32 0.5, %v2057_v14  ;;  %v1924_v39 = vpop.xlane.xlu1 %1923  ;;  %v1878_v53 = vpop.xlane.xlu2 %1877 }
 0x301   : > { %vm2221_vm4 = vcmp.ge.f32.partialorder %v2205_v20, 0.0  ;;  %v2237_v54 = vmul.f32 0.1, %v2205_v20  ;;  %vm2303_vm5 = vcmp.ge.f32.partialorder %v2287_v52, 0.0  ;;  %v2319_v4 = vmul.f32 0.1, %v2287_v52 }
 0x302   : > { %vm2383_vm6 = vcmp.ge.f32.partialorder %v2367_v56, 0.0  ;;  %v2399_v26 = vmul.f32 0.1, %v2367_v56  ;;  %v2059_v1 = vsub.f32 1.5, %v2058_v10  ;;  %v1952_v61 = vadd.f32 %v1924_v39, %v1876_v63 }
 0x303   : > { %v3112_v32 = vpop.eup %3111  ;;  %v2253_v17 = vsel %vm2221_vm4, %v2205_v20, %v2237_v54  ;;  %v2335_v16 = vsel %vm2303_vm5, %v2287_v52, %v2319_v4 }
 0x304   : > { %2271 = vst [vmem:[%s4497_s4] sm:$0xff] %v2253_v17  ;;  %v2415_v42 = vsel %vm2383_vm6, %v2367_v56, %v2399_v26  ;;  %v2060_v31 = vmul.f32 %v3110_v57, %v2059_v1  ;;  %v2066_v19 = vmul.f32 %v3112_v32, %v2031_v8  ;;  %v2016_v60 = vadd.f32 %v4169_v51, %v1952_v61 }
 0x305   : > { %2351 = vst [vmem:[%s4497_s4 + $0x8] sm:$0xff] %v2335_v16  ;;  %vm2072_vm9 = vweird.f32 %v3112_v32 }
 0x306   : > { %2431 = vst [vmem:[%s4497_s4 + $0x10] sm:$0xff] %v2415_v42  ;;  %v2064_v63 = vsel %vm2063_vm8, %v3110_v57, %v2060_v31  ;;  %v2067_v14 = vmul.f32 %v3112_v32, %v2066_v19  ;;  %v2032_v56 = vmax.f32 %v2016_v60, 1e-24  ;;  %vm2073_vm14 = vmor %vm2071_vm13, %vm2072_vm9 }
 0x307   : > { %v2206_v20 = vmul.f32 %v2064_v63, %v4073_v44  ;;  %v2288_v52 = vmul.f32 %v2064_v63, %v4077_v62  ;;  %v2368_v29 = vmul.f32 %v2064_v63, %v3999_v48 }
 0x308   : > { %v2068_v10 = vmul.f32 0.5, %v2067_v14  ;;  %v1926_v39 = vpop.xlane.xlu2 %1925  ;;  %3113 = vrsqrt.f32 %v2032_v56  ;;  %vm2081_vm3 = vweird.f32 %v2032_v56 }
 0x309   : > { %vm2222_vm10 = vcmp.ge.f32.partialorder %v2206_v20, 0.0  ;;  %v2238_v54 = vmul.f32 0.1, %v2206_v20  ;;  %vm2304_vm11 = vcmp.ge.f32.partialorder %v2288_v52, 0.0  ;;  %v2320_v51 = vmul.f32 0.1, %v2288_v52 }
 0x30a   : > { %vm2384_vm12 = vcmp.ge.f32.partialorder %v2368_v29, 0.0  ;;  %v2400_v4 = vmul.f32 0.1, %v2368_v29  ;;  %v2069_v26 = vsub.f32 1.5, %v2068_v10  ;;  %v1953_v61 = vadd.f32 %v1926_v39, %v1878_v53 }
 0x30b   : > { %v2254_v57 = vsel %vm2222_vm10, %v2206_v20, %v2238_v54  ;;  %v2336_v1 = vsel %vm2304_vm11, %v2288_v52, %v2320_v51 }
 0x30c   : > { %2272 = vst [vmem:[%s4497_s4 + $0x18] sm:$0xff] %v2254_v57  ;;  %v2416_v48 = vsel %vm2384_vm12, %v2368_v29, %v2400_v4  ;;  %v2070_v44 = vmul.f32 %v3112_v32, %v2069_v26  ;;  %v2017_v62 = vadd.f32 %v4165_v11, %v1953_v61 }
 0x30d   : > { %2352 = vst [vmem:[%s4497_s4 + $0x20] sm:$0xff] %v2336_v1 }
 0x30e   : > { %2432 = vst [vmem:[%s4497_s4 + $0x28] sm:$0xff] %v2416_v48  ;;  %v2074_v53 = vsel %vm2073_vm14, %v3112_v32, %v2070_v44  ;;  %v1928_v17 = vpop.xlane.xlu0 %1927  ;;  %v4259_v31 = vmax.f32 %v2017_v62, 1e-24  ;;  %v3114_v19 = vpop.eup %3113 }
 0x30f   : > { %v2207_v16 = vmul.f32 %v2074_v53, %v4081_v34  ;;  %v2289_v42 = vmul.f32 %v2074_v53, %v4085_v23  ;;  %v2369_v8 = vmul.f32 %v2074_v53, %v4007_v5  ;;  %v2076_v20 = vmul.f32 %v3114_v19, %v2032_v56 }
 0x310   : > { %v1880_v11 = vpop.xlane.xlu2 %1879  ;;  %3115 = vrsqrt.f32 %v4259_v31  ;;  %vm2082_vm2 = vweird.f32 %v3114_v19  ;;  %vm2091_vm9 = vweird.f32 %v4259_v31 }
 0x311   : > { %vm2223_vm15 = vcmp.ge.f32.partialorder %v2207_v16, 0.0  ;;  %v2239_v60 = vmul.f32 0.1, %v2207_v16  ;;  %vm2305_vm0 = vcmp.ge.f32.partialorder %v2289_v42, 0.0  ;;  %v2321_v63 = vmul.f32 0.1, %v2289_v42  ;;  %vm2083_vm4 = vmor %vm2081_vm3, %vm2082_vm2 }
 0x312   : > { %vm2385_vm1 = vcmp.ge.f32.partialorder %v2369_v8, 0.0  ;;  %v2401_v14 = vmul.f32 0.1, %v2369_v8  ;;  %v2077_v34 = vmul.f32 %v3114_v19, %v2076_v20  ;;  %v1954_v23 = vadd.f32 %v1928_v17, %v1880_v11 }
 0x313   : > { %v2255_v52 = vsel %vm2223_vm15, %v2207_v16, %v2239_v60  ;;  %v2337_v32 = vsel %vm2305_vm0, %v2289_v42, %v2321_v63 }
 0x314   : > { %2273 = vst [vmem:[%s4497_s4 + $0x30] sm:$0xff] %v2255_v52  ;;  %v2417_v5 = vsel %vm2385_vm1, %v2369_v8, %v2401_v14  ;;  %v2078_v29 = vmul.f32 0.5, %v2077_v34  ;;  %v2018_v10 = vadd.f32 %v4167_v36, %v1954_v23 }
 0x315   : > { %2353 = vst [vmem:[%s4497_s4 + $0x38] sm:$0xff] %v2337_v32 }
 0x316   : > { %2433 = vst [vmem:[%s4497_s4 + $0x40] sm:$0xff] %v2417_v5  ;;  %v1930_v39 = vpop.xlane.xlu1 %1929  ;;  %v1882_v54 = vpop.xlane.xlu0 %1881  ;;  %v2079_v4 = vsub.f32 1.5, %v2078_v29  ;;  %v4272_v26 = vmax.f32 %v2018_v10, 1e-24 }
 0x317   : > { %v1955_v51 = vadd.f32 %v1930_v39, %v1882_v54  ;;  %v3116_v57 = vpop.eup %3115 }
 0x318   : > { %v2080_v61 = vmul.f32 %v3114_v19, %v2079_v4  ;;  %v2086_v48 = vmul.f32 %v3116_v57, %v4259_v31  ;;  %3117 = vrsqrt.f32 %v4272_v26  ;;  %vm2092_vm5 = vweird.f32 %v3116_v57 }
 0x319   : > { %v2019_v1 = vadd.f32 %v4183_v12, %v1955_v51  ;;  %vm2093_vm10 = vmor %vm2091_vm9, %vm2092_vm5  ;;  %vm2101_vm15 = vweird.f32 %v4272_v26 }
 0x31a   : > { %v2084_v36 = vsel %vm2083_vm4, %v3114_v19, %v2080_v61  ;;  %v2087_v62 = vmul.f32 %v3116_v57, %v2086_v48 }
 0x31b   : > { %v4277_v44 = vmax.f32 %v2019_v1, 1e-24  ;;  %v2208_v53 = vmul.f32 %v2084_v36, %v4089_v59  ;;  %v2290_v17 = vmul.f32 %v2084_v36, %v4093_v3  ;;  %v2370_v16 = vmul.f32 %v2084_v36, %v4009_v58 }
 0x31c   : > { %v2088_v12 = vmul.f32 0.5, %v2087_v62 }
 0x31d   : > { %3119 = vrsqrt.f32 %v4277_v44  ;;  %vm2224_vm6 = vcmp.ge.f32.partialorder %v2208_v53, 0.0  ;;  %v2240_v8 = vmul.f32 0.1, %v2208_v53  ;;  %vm2306_vm7 = vcmp.ge.f32.partialorder %v2290_v17, 0.0 }
 0x31e   : > { %v1932_v56 = vpop.xlane.xlu2 %1931  ;;  %v1884_v42 = vpop.xlane.xlu1 %1883  ;;  %v2322_v60 = vmul.f32 0.1, %v2290_v17  ;;  %vm2386_vm8 = vcmp.ge.f32.partialorder %v2370_v16, 0.0  ;;  %v2402_v19 = vmul.f32 0.1, %v2370_v16  ;;  %v2089_v11 = vsub.f32 1.5, %v2088_v12 }
 0x31f   : > { %v3118_v63 = vpop.eup %3117  ;;  %v1956_v14 = vadd.f32 %v1932_v56, %v1884_v42  ;;  %v2256_v59 = vsel %vm2224_vm6, %v2208_v53, %v2240_v8  ;;  %vm2111_vm2 = vweird.f32 %v4277_v44 }
 0x320   : > { %v2338_v20 = vsel %vm2306_vm7, %v2290_v17, %v2322_v60  ;;  %v2096_v3 = vmul.f32 %v3118_v63, %v4272_v26  ;;  %2274 = vst [vmem:[%s4497_s4 + $0x48] sm:$0xff] %v2256_v59  ;;  %v2418_v58 = vsel %vm2386_vm8, %v2370_v16, %v2402_v19  ;;  %v2090_v52 = vmul.f32 %v3116_v57, %v2089_v11 }
 0x321   : > { %v2020_v32 = vadd.f32 %v4179_v13, %v1956_v14  ;;  %2354 = vst [vmem:[%s4497_s4 + $0x50] sm:$0xff] %v2338_v20  ;;  %vm2102_vm11 = vweird.f32 %v3118_v63 }
 0x322   : > { %v2097_v34 = vmul.f32 %v3118_v63, %v2096_v3  ;;  %2434 = vst [vmem:[%s4497_s4 + $0x58] sm:$0xff] %v2418_v58  ;;  %v2094_v23 = vsel %vm2093_vm10, %v3116_v57, %v2090_v52  ;;  %vm2103_vm1 = vmor %vm2101_vm15, %vm2102_vm11 }
 0x323   : > { %v3120_v5 = vpop.eup %3119  ;;  %v4297_v10 = vmax.f32 %v2020_v32, 1e-24  ;;  %v2209_v31 = vmul.f32 %v2094_v23, %v4095_v38  ;;  %v2291_v13 = vmul.f32 %v2094_v23, %v4101_v43  ;;  %v2371_v39 = vmul.f32 %v2094_v23, %v4017_v50 }
 0x324   : > { %v2106_v29 = vmul.f32 %v3120_v5, %v4277_v44  ;;  %v2098_v54 = vmul.f32 0.5, %v2097_v34  ;;  %vm2112_vm0 = vweird.f32 %v3120_v5 }
 0x325   : > { %3121 = vrsqrt.f32 %v4297_v10  ;;  %vm2225_vm12 = vcmp.ge.f32.partialorder %v2209_v31, 0.0  ;;  %v2241_v61 = vmul.f32 0.1, %v2209_v31  ;;  %vm2307_vm13 = vcmp.ge.f32.partialorder %v2291_v13, 0.0  ;;  %vm2113_vm3 = vmor %vm2111_vm2, %vm2112_vm0 }
 0x326   : > { %v2107_v51 = vmul.f32 %v3120_v5, %v2106_v29  ;;  %v1934_v4 = vpop.xlane.xlu0 %1933  ;;  %v1886_v1 = vpop.xlane.xlu2 %1885  ;;  %v2323_v57 = vmul.f32 0.1, %v2291_v13  ;;  %vm2387_vm14 = vcmp.ge.f32.partialorder %v2371_v39, 0.0  ;;  %v2403_v48 = vmul.f32 0.1, %v2371_v39 }
 0x327   : > { %v2099_v36 = vsub.f32 1.5, %v2098_v54  ;;  %v2257_v38 = vsel %vm2225_vm12, %v2209_v31, %v2241_v61  ;;  %v1957_v50 = vadd.f32 %v1934_v4, %v1886_v1  ;;  %vm2121_vm11 = vweird.f32 %v4297_v10 }
 0x328   : > { %v2108_v62 = vmul.f32 0.5, %v2107_v51  ;;  %v2339_v53 = vsel %vm2307_vm13, %v2291_v13, %v2323_v57  ;;  %2275 = vst [vmem:[%s4497_s4 + $0x60] sm:$0xff] %v2257_v38  ;;  %v2419_v43 = vsel %vm2387_vm14, %v2371_v39, %v2403_v48 }
 0x329   : > { %v2100_v17 = vmul.f32 %v3118_v63, %v2099_v36  ;;  %2355 = vst [vmem:[%s4497_s4 + $0x68] sm:$0xff] %v2339_v53  ;;  %v2021_v12 = vadd.f32 %v4181_v22, %v1957_v50 }
 0x32a   : > { %v2109_v16 = vsub.f32 1.5, %v2108_v62  ;;  %2435 = vst [vmem:[%s4497_s4 + $0x70] sm:$0xff] %v2419_v43 }
 0x32b   : > { %v3122_v56 = vpop.eup %3121  ;;  %v2104_v26 = vsel %vm2103_vm1, %v3118_v63, %v2100_v17  ;;  %v4320_v22 = vmax.f32 %v2021_v12, 1e-24 }
 0x32c   : > { %v2110_v42 = vmul.f32 %v3120_v5, %v2109_v16  ;;  %v2210_v8 = vmul.f32 %v2104_v26, %v4103_v35  ;;  %v2292_v60 = vmul.f32 %v2104_v26, %v4107_v27  ;;  %v2372_v19 = vmul.f32 %v2104_v26, %v4019_v7 }
 0x32d   : > { %v2116_v11 = vmul.f32 %v3122_v56, %v4297_v10  ;;  %3123 = vrsqrt.f32 %v4320_v22  ;;  %vm2122_vm10 = vweird.f32 %v3122_v56  ;;  %vm2131_vm1 = vweird.f32 %v4320_v22 }
 0x32e   : > { %v2114_v14 = vsel %vm2113_vm3, %v3120_v5, %v2110_v42  ;;  %v1936_v59 = vpop.xlane.xlu1 %1935  ;;  %vm2226_vm4 = vcmp.ge.f32.partialorder %v2210_v8, 0.0  ;;  %v2242_v20 = vmul.f32 0.1, %v2210_v8  ;;  %vm2308_vm5 = vcmp.ge.f32.partialorder %v2292_v60, 0.0  ;;  %v1888_v32 = vpop.xlane.xlu0 %1887  ;;  %vm2123_vm12 = vmor %vm2121_vm11, %vm2122_vm10 }
 0x32f   : > { %v2324_v63 = vmul.f32 0.1, %v2292_v60  ;;  %vm2388_vm6 = vcmp.ge.f32.partialorder %v2372_v19, 0.0  ;;  %v2404_v3 = vmul.f32 0.1, %v2372_v19  ;;  %v2211_v44 = vmul.f32 %v2114_v14, %v4111_v18 }
 0x330   : > { %v2293_v35 = vmul.f32 %v2114_v14, %v4117_v41  ;;  %v2258_v27 = vsel %vm2226_vm4, %v2210_v8, %v2242_v20  ;;  %v2373_v7 = vmul.f32 %v2114_v14, %v4027_v2  ;;  %v2117_v52 = vmul.f32 %v3122_v56, %v2116_v11 }
 0x331   : > { %v2340_v58 = vsel %vm2308_vm5, %v2292_v60, %v2324_v63  ;;  %2276 = vst [vmem:[%s4497_s4 + $0x78] sm:$0xff] %v2258_v27  ;;  %v2420_v5 = vsel %vm2388_vm6, %v2372_v19, %v2404_v3  ;;  %vm2227_vm7 = vcmp.ge.f32.partialorder %v2211_v44, 0.0  ;;  %v2243_v34 = vmul.f32 0.1, %v2211_v44 }
 0x332   : > { %vm2309_vm8 = vcmp.ge.f32.partialorder %v2293_v35, 0.0  ;;  %2356 = vst [vmem:[%s4497_s4 + $0x80] sm:$0xff] %v2340_v58  ;;  %v2325_v18 = vmul.f32 0.1, %v2293_v35  ;;  %vm2389_vm9 = vcmp.ge.f32.partialorder %v2373_v7, 0.0  ;;  %v2118_v23 = vmul.f32 0.5, %v2117_v52 }
 0x333   : > { %v2405_v41 = vmul.f32 0.1, %v2373_v7  ;;  %2436 = vst [vmem:[%s4497_s4 + $0x88] sm:$0xff] %v2420_v5  ;;  %v2259_v2 = vsel %vm2227_vm7, %v2211_v44, %v2243_v34  ;;  %v1958_v29 = vadd.f32 %v1936_v59, %v1888_v32  ;;  %v3124_v48 = vpop.eup %3123 }
 0x334   : > { %2277 = vst [vmem:[%s4497_s4 + $0x90] sm:$0xff] %v2259_v2  ;;  %v2341_v31 = vsel %vm2309_vm8, %v2293_v35, %v2325_v18  ;;  %v2119_v39 = vsub.f32 1.5, %v2118_v23  ;;  %v2126_v38 = vmul.f32 %v3124_v48, %v4320_v22  ;;  %vm2132_vm0 = vweird.f32 %v3124_v48 }
 0x335   : > { %v2421_v13 = vsel %vm2389_vm9, %v2373_v7, %v2405_v41  ;;  %2357 = vst [vmem:[%s4497_s4 + $0x98] sm:$0xff] %v2341_v31  ;;  %v2022_v54 = vadd.f32 %v4197_v9, %v1958_v29  ;;  %vm2133_vm2 = vmor %vm2131_vm1, %vm2132_vm0 }
 0x336   : > { %v1938_v51 = vpop.xlane.xlu2 %1937  ;;  %v1890_v4 = vpop.xlane.xlu1 %1889  ;;  %2437 = vst [vmem:[%s4497_s4 + $0xa0] sm:$0xff] %v2421_v13  ;;  %v2120_v61 = vmul.f32 %v3122_v56, %v2119_v39  ;;  %v2127_v43 = vmul.f32 %v3124_v48, %v2126_v38 }
 0x337   : > { %v1959_v1 = vadd.f32 %v1938_v51, %v1890_v4  ;;  %v4346_v57 = vmax.f32 %v2022_v54, 1e-24 }
 0x338   : > { %v2124_v62 = vsel %vm2123_vm12, %v3122_v56, %v2120_v61  ;;  %v2128_v12 = vmul.f32 0.5, %v2127_v43 }
 0x339   : > { %v2023_v36 = vadd.f32 %v4191_v45, %v1959_v1  ;;  %3125 = vrsqrt.f32 %v4346_v57  ;;  %v2212_v9 = vmul.f32 %v2124_v62, %v4121_v28  ;;  %v2294_v53 = vmul.f32 %v2124_v62, %v4123_v15 }
 0x33a   : > { %v2374_v50 = vmul.f32 %v2124_v62, %v4029_v47  ;;  %v2129_v60 = vsub.f32 1.5, %v2128_v12  ;;  %vm2141_vm7 = vweird.f32 %v4346_v57 }
 0x33b   : > { %v4354_v17 = vmax.f32 %v2023_v36, 1e-24  ;;  %vm2228_vm13 = vcmp.ge.f32.partialorder %v2212_v9, 0.0  ;;  %v2244_v10 = vmul.f32 0.1, %v2212_v9  ;;  %vm2310_vm14 = vcmp.ge.f32.partialorder %v2294_v53, 0.0 }
 0x33c   : > { %v2326_v16 = vmul.f32 0.1, %v2294_v53  ;;  %vm2390_vm15 = vcmp.ge.f32.partialorder %v2374_v50, 0.0  ;;  %v2406_v45 = vmul.f32 0.1, %v2374_v50  ;;  %v2130_v14 = vmul.f32 %v3124_v48, %v2129_v60 }
 0x33d   : > { %3127 = vrsqrt.f32 %v4354_v17  ;;  %v2260_v42 = vsel %vm2228_vm13, %v2212_v9, %v2244_v10  ;;  %vm2151_vm10 = vweird.f32 %v4354_v17 }
 0x33e   : > { %v1940_v56 = vpop.xlane.xlu0 %1939  ;;  %v1892_v26 = vpop.xlane.xlu2 %1891  ;;  %v2342_v28 = vsel %vm2310_vm14, %v2294_v53, %v2326_v16  ;;  %2278 = vst [vmem:[%s4497_s4 + $0xa8] sm:$0xff] %v2260_v42  ;;  %v2422_v47 = vsel %vm2390_vm15, %v2374_v50, %v2406_v45  ;;  %v2134_v3 = vsel %vm2133_vm2, %v3124_v48, %v2130_v14  ;;  %v4532_v14 = vld [vmem:[#allocation4_spill] sm:$0xff] }
 0x33f   : > { %v1960_v8 = vadd.f32 %v1940_v56, %v1892_v26  ;;  %v3126_v15 = vpop.eup %3125  ;;  %2358 = vst [vmem:[%s4497_s4 + $0xb0] sm:$0xff] %v2342_v28  ;;  %v2213_v44 = vmul.f32 %v2134_v3, %v4129_v49  ;;  %v2295_v35 = vmul.f32 %v2134_v3, %v4133_v33  ;;  %v2375_v27 = vmul.f32 %v2134_v3, %v4037_v46 }
 0x340   : > { %v2136_v19 = vmul.f32 %v3126_v15, %v4346_v57  ;;  %2438 = vst [vmem:[%s4497_s4 + $0xb8] sm:$0xff] %v2422_v47  ;;  %vm2142_vm3 = vweird.f32 %v3126_v15 }
 0x341   : > { %v2024_v11 = vadd.f32 %v4195_v30, %v1960_v8  ;;  %vm2229_vm4 = vcmp.ge.f32.partialorder %v2213_v44, 0.0  ;;  %v2245_v52 = vmul.f32 0.1, %v2213_v44  ;;  %vm2311_vm5 = vcmp.ge.f32.partialorder %v2295_v35, 0.0  ;;  %vm2143_vm8 = vmor %vm2141_vm7, %vm2142_vm3 }
 0x342   : > { %v2137_v59 = vmul.f32 %v3126_v15, %v2136_v19  ;;  %v2327_v32 = vmul.f32 0.1, %v2295_v35  ;;  %vm2391_vm6 = vcmp.ge.f32.partialorder %v2375_v27, 0.0  ;;  %v2407_v5 = vmul.f32 0.1, %v2375_v27  ;;  %v4531_v19 = vld [vmem:[#allocation5_spill] sm:$0xff] }
 0x343   : > { %v4369_v20 = vmax.f32 %v2024_v11, 1e-24  ;;  %v3128_v63 = vpop.eup %3127  ;;  %v2261_v18 = vsel %vm2229_vm4, %v2213_v44, %v2245_v52 }
 0x344   : > { %v2138_v30 = vmul.f32 0.5, %v2137_v59  ;;  %v2146_v58 = vmul.f32 %v3128_v63, %v4354_v17  ;;  %v2343_v33 = vsel %vm2311_vm5, %v2295_v35, %v2327_v32  ;;  %2279 = vst [vmem:[%s4497_s4 + $0xc0] sm:$0xff] %v2261_v18  ;;  %v2423_v46 = vsel %vm2391_vm6, %v2375_v27, %v2407_v5  ;;  %v4533_v18 = vld [vmem:[#allocation6_spill] sm:$0xff] }
 0x345   : > { %3129 = vrsqrt.f32 %v4369_v20  ;;  %2359 = vst [vmem:[%s4497_s4 + $0xc8] sm:$0xff] %v2343_v33  ;;  %vm2152_vm9 = vweird.f32 %v3128_v63  ;;  %vm2161_vm3 = vweird.f32 %v4369_v20 }
 0x346   : > { %v1942_v7 = vpop.xlane.xlu1 %1941  ;;  %v1894_v22 = vpop.xlane.xlu0 %1893  ;;  %v2139_v34 = vsub.f32 1.5, %v2138_v30  ;;  %v2147_v49 = vmul.f32 %v3128_v63, %v2146_v58  ;;  %2439 = vst [vmem:[%s4497_s4 + $0xd0] sm:$0xff] %v2423_v46  ;;  %vm2153_vm13 = vmor %vm2151_vm10, %vm2152_vm9 }
 0x347   : > { %v1961_v41 = vadd.f32 %v1942_v7, %v1894_v22 }
 0x348   : > { %v2140_v2 = vmul.f32 %v3126_v15, %v2139_v34  ;;  %v2148_v23 = vmul.f32 0.5, %v2147_v49 }
 0x349   : > { %v2025_v29 = vadd.f32 %v4207_v37, %v1961_v41  ;;  %v4534_v41 = vld [vmem:[#allocation7_spill] sm:$0xff] }
 0x34a   : > { %v2144_v13 = vsel %vm2143_vm8, %v3126_v15, %v2140_v2  ;;  %v2149_v39 = vsub.f32 1.5, %v2148_v23  ;;  %v4535_v2 = vld [vmem:[#allocation3_spill] sm:$0xff] }
 0x34b   : > { %v3130_v31 = vpop.eup %3129  ;;  %v2214_v54 = vmul.f32 %v2144_v13, %v4137_v24  ;;  %v2296_v51 = vmul.f32 %v2144_v13, %v4139_v21  ;;  %v2376_v4 = vmul.f32 %v2144_v13, %v4039_v0  ;;  %v4393_v37 = vmax.f32 %v2025_v29, 1e-24 }
 0x34c   : > { %v2156_v1 = vmul.f32 %v3130_v31, %v4369_v20  ;;  %v2150_v61 = vmul.f32 %v3128_v63, %v2149_v39  ;;  %vm2162_vm2 = vweird.f32 %v3130_v31 }
 0x34d   : > { %vm2230_vm11 = vcmp.ge.f32.partialorder %v2214_v54, 0.0  ;;  %v2246_v48 = vmul.f32 0.1, %v2214_v54  ;;  %vm2312_vm12 = vcmp.ge.f32.partialorder %v2296_v51, 0.0  ;;  %v2328_v36 = vmul.f32 0.1, %v2296_v51  ;;  %vm2163_vm4 = vmor %vm2161_vm3, %vm2162_vm2 }
 0x34e   : > { %v4395_v57 = vpop.xlane.xlu2 %1943  ;;  %vm2392_vm14 = vcmp.ge.f32.partialorder %v2376_v4, 0.0  ;;  %v2408_v24 = vmul.f32 0.1, %v2376_v4  ;;  %v2154_v62 = vsel %vm2153_vm13, %v3128_v63, %v2150_v61  ;;  %v2157_v21 = vmul.f32 %v3130_v31, %v2156_v1  ;;  %v1896_v26 = vpop.xlane.xlu1 %1895 }
 0x34f   : > { %v2262_v38 = vsel %vm2230_vm11, %v2214_v54, %v2246_v48  ;;  %v2344_v0 = vsel %vm2312_vm12, %v2296_v51, %v2328_v36  ;;  %v2215_v9 = vmul.f32 %v2154_v62, %v4145_v25  ;;  %v2297_v53 = vmul.f32 %v2154_v62, %v4149_v40 }
 0x350   : > { %2280 = vst [vmem:[%s4497_s4 + $0xd8] sm:$0xff] %v2262_v38  ;;  %v2424_v50 = vsel %vm2392_vm14, %v2376_v4, %v2408_v24  ;;  %v2377_v43 = vmul.f32 %v2154_v62, %v4047_v55  ;;  %v2158_v17 = vmul.f32 0.5, %v2157_v21  ;;  %3131 = vrsqrt.f32 %v4393_v37 }
 0x351   : > { %2360 = vst [vmem:[%s4497_s4 + $0xe0] sm:$0xff] %v2344_v0  ;;  %vm2231_vm15 = vcmp.ge.f32.partialorder %v2215_v9, 0.0  ;;  %v2247_v10 = vmul.f32 0.1, %v2215_v9  ;;  %vm2313_vm0 = vcmp.ge.f32.partialorder %v2297_v53, 0.0  ;;  %vm2171_vm9 = vweird.f32 %v4393_v37 }
 0x352   : > { %2440 = vst [vmem:[%s4497_s4 + $0xe8] sm:$0xff] %v2424_v50  ;;  %v2329_v25 = vmul.f32 0.1, %v2297_v53  ;;  %vm2393_vm1 = vcmp.ge.f32.partialorder %v2377_v43, 0.0  ;;  %v2409_v40 = vmul.f32 0.1, %v2377_v43 }
 0x353   : > { %v2263_v16 = vsel %vm2231_vm15, %v2215_v9, %v2247_v10  ;;  %v2159_v45 = vsub.f32 1.5, %v2158_v17 }
 0x354   : > { %2281 = vst [vmem:[%s4497_s4 + $0xf0] sm:$0xff] %v2263_v16  ;;  %v2345_v55 = vsel %vm2313_vm0, %v2297_v53, %v2329_v25  ;;  %v2425_v12 = vsel %vm2393_vm1, %v2377_v43, %v2409_v40 }
 0x355   : > { %2361 = vst [vmem:[%s4497_s4 + $0xf8] sm:$0xff] %v2345_v55  ;;  %v2160_v42 = vmul.f32 %v3130_v31, %v2159_v45 }
 0x356   : > { %v1946_v56 = vpop.xlane.xlu0 %1945  ;;  %v1898_v28 = vpop.xlane.xlu2 %1897  ;;  %2441 = vst [vmem:[%s4497_s4 + $0x100] sm:$0xff] %v2425_v12 }
 0x357   : > { %v3132_v8 = vpop.eup %3131  ;;  %v2164_v15 = vsel %vm2163_vm4, %v3130_v31, %v2160_v42  ;;  %v1962_v31 = vadd.f32 %v4395_v57, %v1896_v26  ;;  %v1963_v13 = vadd.f32 %v1946_v56, %v1898_v28  ;;  %v4536_v56 = vld [vmem:[#allocation13_spill] sm:$0xff]  ;;  %v4537_v42 = vld [vmem:[#allocation14_spill] sm:$0xff] }
 0x358   : > { %v2166_v47 = vmul.f32 %v3132_v8, %v4393_v37  ;;  %v2216_v60 = vmul.f32 %v2164_v15, %v4153_v6  ;;  %v2298_v11 = vmul.f32 %v2164_v15, %v4531_v19  ;;  %v2378_v59 = vmul.f32 %v2164_v15, %v4532_v14 }
 0x359   : > { %vm2172_vm8 = vweird.f32 %v3132_v8 }
 0x35a   : > { %v2167_v63 = vmul.f32 %v3132_v8, %v2166_v47  ;;  %vm2232_vm5 = vcmp.ge.f32.partialorder %v2216_v60, 0.0  ;;  %v2248_v3 = vmul.f32 0.1, %v2216_v60  ;;  %vm2314_vm6 = vcmp.ge.f32.partialorder %v2298_v11, 0.0  ;;  %vm2173_vm10 = vmor %vm2171_vm9, %vm2172_vm8 }
 0x35b   : > { %v2330_v20 = vmul.f32 0.1, %v2298_v11  ;;  %vm2394_vm7 = vcmp.ge.f32.partialorder %v2378_v59, 0.0  ;;  %v2410_v44 = vmul.f32 0.1, %v2378_v59 }
 0x35c   : > { %v2168_v35 = vmul.f32 0.5, %v2167_v63  ;;  %v2264_v27 = vsel %vm2232_vm5, %v2216_v60, %v2248_v3 }
 0x35d   : > { %v2346_v30 = vsel %vm2314_vm6, %v2298_v11, %v2330_v20  ;;  %2282 = vst [vmem:[%s4497_s4 + $0x108] sm:$0xff] %v2264_v27  ;;  %v2426_v6 = vsel %vm2394_vm7, %v2378_v59, %v2410_v44 }
 0x35e   : > { %v1948_v58 = vpop.xlane.xlu1 %1947  ;;  %v2169_v7 = vsub.f32 1.5, %v2168_v35  ;;  %2362 = vst [vmem:[%s4497_s4 + $0x110] sm:$0xff] %v2346_v30  ;;  %v2012_v5 = vpop.xlane.xlu2 %2011  ;;  %v4539_v30 = vld [vmem:[#allocation10_spill] sm:$0xff] }
 0x35f   : > { %v1900_v22 = vpop.xlane.xlu0 %1899  ;;  %2442 = vst [vmem:[%s4497_s4 + $0x118] sm:$0xff] %v2426_v6  ;;  %v4540_v6 = vld [vmem:[#allocation11_spill] sm:$0xff] }
 0x360   : > { %v1964_v52 = vadd.f32 %v1948_v58, %v1900_v22  ;;  %v2170_v32 = vmul.f32 %v3132_v8, %v2169_v7  ;;  %v4541_v22 = vld [vmem:[#allocation15_spill] sm:$0xff] }
 0x362   : > { %v2028_v34 = vadd.f32 %v2012_v5, %v1964_v52  ;;  %v2174_v49 = vsel %vm2173_vm10, %v3132_v8, %v2170_v32  ;;  %v4538_v8 = vld [vmem:[#allocation12_spill] sm:$0xff] }
 0x363   : > { %v2217_v33 = vmul.f32 %v2174_v49, %v4533_v18  ;;  %v2299_v46 = vmul.f32 %v2174_v49, %v4534_v41  ;;  %v2379_v23 = vmul.f32 %v2174_v49, %v4535_v2  ;;  %v4542_v32 = vld [vmem:[#allocation8_spill] sm:$0xff] }
 0x364   : > { %v2044_v29 = vmax.f32 %v2028_v34, 1e-24  ;;  %v4543_v34 = vld [vmem:[#allocation9_spill] sm:$0xff]  ;;  %v4544_v18 = vld [vmem:[#allocation16_spill] sm:$0xff] }
 0x365   : > { %vm2233_vm11 = vcmp.ge.f32.partialorder %v2217_v33, 0.0  ;;  %v2249_v39 = vmul.f32 0.1, %v2217_v33  ;;  %vm2315_vm12 = vcmp.ge.f32.partialorder %v2299_v46, 0.0  ;;  %v2331_v54 = vmul.f32 0.1, %v2299_v46 }
 0x366   : > { %v2010_v51 = vpop.xlane.xlu1 %2009  ;;  %vm2395_vm13 = vcmp.ge.f32.partialorder %v2379_v23, 0.0  ;;  %v2411_v4 = vmul.f32 0.1, %v2379_v23  ;;  %3133 = vrsqrt.f32 %v2044_v29  ;;  %vm2201_vm15 = vweird.f32 %v2044_v29 }
 0x367   : > { %v2008_v1 = vpop.xlane.xlu0 %2007  ;;  %v2265_v61 = vsel %vm2233_vm11, %v2217_v33, %v2249_v39  ;;  %v2347_v37 = vsel %vm2315_vm12, %v2299_v46, %v2331_v54  ;;  %v2027_v48 = vadd.f32 %v2010_v51, %v1963_v13 }
 0x368   : > { %v2026_v36 = vadd.f32 %v2008_v1, %v1962_v31  ;;  %2283 = vst [vmem:[%s4497_s4 + $0x120] sm:$0xff] %v2265_v61  ;;  %v2427_v24 = vsel %vm2395_vm13, %v2379_v23, %v2411_v4 }
 0x369   : > { %2363 = vst [vmem:[%s4497_s4 + $0x128] sm:$0xff] %v2347_v37  ;;  %v2043_v57 = vmax.f32 %v2027_v48, 1e-24 }
 0x36a   : > { %v2042_v62 = vmax.f32 %v2026_v36, 1e-24  ;;  %2443 = vst [vmem:[%s4497_s4 + $0x130] sm:$0xff] %v2427_v24 }
 0x36b   : > { %3135 = vrsqrt.f32 %v2043_v57  ;;  %vm2191_vm2 = vweird.f32 %v2043_v57 }
 0x36c   : > { %v3134_v21 = vpop.eup %3133  ;;  %3137 = vrsqrt.f32 %v2042_v62  ;;  %vm2181_vm3 = vweird.f32 %v2042_v62 }
 0x36d   : > { %v2196_v38 = vmul.f32 %v3134_v21, %v2044_v29  ;;  %vm2202_vm14 = vweird.f32 %v3134_v21 }
 0x36e   : > { %vm2203_vm0 = vmor %vm2201_vm15, %vm2202_vm14 }
 0x36f   : > { %v2197_v0 = vmul.f32 %v3134_v21, %v2196_v38 }
 0x371   : > { %v3136_v9 = vpop.eup %3135  ;;  %v2198_v53 = vmul.f32 0.5, %v2197_v0 }
 0x372   : > { %v3138_v50 = vpop.eup %3137  ;;  %v2186_v43 = vmul.f32 %v3136_v9, %v2043_v57  ;;  %vm2192_vm1 = vweird.f32 %v3136_v9 }
 0x373   : > { %v2199_v17 = vsub.f32 1.5, %v2198_v53  ;;  %v2176_v10 = vmul.f32 %v3138_v50, %v2042_v62  ;;  %vm2182_vm4 = vweird.f32 %v3138_v50  ;;  %vm2193_vm8 = vmor %vm2191_vm2, %vm2192_vm1 }
 0x374   : > { %v2187_v25 = vmul.f32 %v3136_v9, %v2186_v43  ;;  %vm2183_vm9 = vmor %vm2181_vm3, %vm2182_vm4 }
 0x375   : > { %v2200_v40 = vmul.f32 %v3134_v21, %v2199_v17  ;;  %v2177_v16 = vmul.f32 %v3138_v50, %v2176_v10 }
 0x376   : > { %v2188_v45 = vmul.f32 0.5, %v2187_v25 }
 0x377   : > { %v2204_v55 = vsel %vm2203_vm0, %v3134_v21, %v2200_v40  ;;  %v2178_v12 = vmul.f32 0.5, %v2177_v16 }
 0x378   : > { %v2220_v26 = vmul.f32 %v2204_v55, %v4536_v56  ;;  %v2302_v28 = vmul.f32 %v2204_v55, %v4537_v42  ;;  %v2382_v15 = vmul.f32 %v2204_v55, %v4538_v8  ;;  %v2189_v47 = vsub.f32 1.5, %v2188_v45 }
 0x379   : > { %v2179_v60 = vsub.f32 1.5, %v2178_v12 }
 0x37a   : > { %vm2236_vm5 = vcmp.ge.f32.partialorder %v2220_v26, 0.0  ;;  %v2252_v19 = vmul.f32 0.1, %v2220_v26  ;;  %vm2318_vm6 = vcmp.ge.f32.partialorder %v2302_v28, 0.0  ;;  %v2334_v11 = vmul.f32 0.1, %v2302_v28 }
 0x37b   : > { %vm2398_vm7 = vcmp.ge.f32.partialorder %v2382_v15, 0.0  ;;  %v2414_v14 = vmul.f32 0.1, %v2382_v15  ;;  %v2190_v59 = vmul.f32 %v3136_v9, %v2189_v47  ;;  %v2180_v63 = vmul.f32 %v3138_v50, %v2179_v60 }
 0x37c   : > { %v2268_v3 = vsel %vm2236_vm5, %v2220_v26, %v2252_v19  ;;  %v2350_v20 = vsel %vm2318_vm6, %v2302_v28, %v2334_v11 }
 0x37d   : > { %2286 = vst [vmem:[%s4497_s4 + $0x168] sm:$0xff] %v2268_v3  ;;  %v2430_v44 = vsel %vm2398_vm7, %v2382_v15, %v2414_v14  ;;  %v2194_v35 = vsel %vm2193_vm8, %v3136_v9, %v2190_v59  ;;  %v2184_v27 = vsel %vm2183_vm9, %v3138_v50, %v2180_v63 }
 0x37e   : > { %2366 = vst [vmem:[%s4497_s4 + $0x170] sm:$0xff] %v2350_v20  ;;  %v2219_v58 = vmul.f32 %v2194_v35, %v4539_v30  ;;  %v2301_v7 = vmul.f32 %v2194_v35, %v4540_v6  ;;  %v2381_v52 = vmul.f32 %v2194_v35, %v4541_v22  ;;  %v2218_v5 = vmul.f32 %v2184_v27, %v4542_v32 }
 0x37f   : > { %2446 = vst [vmem:[%s4497_s4 + $0x178] sm:$0xff] %v2430_v44  ;;  %v2300_v49 = vmul.f32 %v2184_v27, %v4543_v34  ;;  %v2380_v33 = vmul.f32 %v2184_v27, %v4544_v18 }
 0x380   : > { %vm2235_vm10 = vcmp.ge.f32.partialorder %v2219_v58, 0.0  ;;  %v2251_v41 = vmul.f32 0.1, %v2219_v58  ;;  %vm2317_vm11 = vcmp.ge.f32.partialorder %v2301_v7, 0.0  ;;  %v2333_v46 = vmul.f32 0.1, %v2301_v7 }
 0x381   : > { %vm2397_vm12 = vcmp.ge.f32.partialorder %v2381_v52, 0.0  ;;  %v2413_v2 = vmul.f32 0.1, %v2381_v52  ;;  %vm2234_vm13 = vcmp.ge.f32.partialorder %v2218_v5, 0.0  ;;  %v2250_v23 = vmul.f32 0.1, %v2218_v5 }
 0x382   : > { %v2267_v29 = vsel %vm2235_vm10, %v2219_v58, %v2251_v41  ;;  %v2349_v31 = vsel %vm2317_vm11, %v2301_v7, %v2333_v46  ;;  %vm2316_vm14 = vcmp.ge.f32.partialorder %v2300_v49, 0.0  ;;  %v2332_v13 = vmul.f32 0.1, %v2300_v49 }
 0x383   : > { %2285 = vst [vmem:[%s4497_s4 + $0x150] sm:$0xff] %v2267_v29  ;;  %v2429_v39 = vsel %vm2397_vm12, %v2381_v52, %v2413_v2  ;;  %v2266_v54 = vsel %vm2234_vm13, %v2218_v5, %v2250_v23  ;;  %vm2396_vm15 = vcmp.ge.f32.partialorder %v2380_v33, 0.0  ;;  %v2412_v51 = vmul.f32 0.1, %v2380_v33 }
 0x384   : > { %2365 = vst [vmem:[%s4497_s4 + $0x158] sm:$0xff] %v2349_v31  ;;  %v2348_v4 = vsel %vm2316_vm14, %v2300_v49, %v2332_v13 }
 0x385   : > { %2445 = vst [vmem:[%s4497_s4 + $0x160] sm:$0xff] %v2429_v39  ;;  %v2428_v1 = vsel %vm2396_vm15, %v2380_v33, %v2412_v51 }
 0x386   : > { %2284 = vst [vmem:[%s4497_s4 + $0x138] sm:$0xff] %v2266_v54 }
 0x387   : > { %2364 = vst [vmem:[%s4497_s4 + $0x140] sm:$0xff] %v2348_v4 }
 0x388   : > { %2444 = vst [vmem:[%s4497_s4 + $0x148] sm:$0xff] %v2428_v1 }
 0x389 PF: > { %s14_s17 = sadd.s32 1, %s3161_s17   ;;  %s4545_s15 = smov %s3157_s16 }
 0x38a   : > { %p11_p6 = scmp.ge.s32.totalorder %s14_s17, 5   ;;  %s4546_s16 = smov %s4548_s18 }
 0x38c   :  { %13 = sbr.rel (!%p11_p6) target bundleno = 2 (0x2), region = 78 }

</bundles_post_ra>
